<compile_context>
chip_gen: v6e
topology: v6e:2x2x1
jax: 0.10.0
libtpu: 0.0.40
codegen_flags: <defaults>
</compile_context>

<pallas_src>
import functools

import jax
import jax.numpy as jnp
import numpy as np
from jax.experimental import pallas as pl
from jax.experimental.pallas import tpu as pltpu


def _round_up(x, m):
    return (x + m - 1) // m * m


# ----------------------------------------------------------------------------
# (1) Hoisted input projection: gi = x2d @ W_ih^T + (b_ih + [b_hr, b_hz, 0])
# ----------------------------------------------------------------------------
def _proj_kernel(x_ref, w_ref, b_ref, gi_ref):
    w = w_ref[...]                                   # (F, tn), bf16 by default
    x = x_ref[...].astype(w.dtype)                   # cast in-kernel (no extra HBM pass)
    gi_ref[...] = (
        jnp.dot(x, w, preferred_element_type=jnp.float32) + b_ref[...]
    ).astype(gi_ref.dtype)


def _pick_gate_tile(G, cap=512):
    """Largest multiple of 128 <= cap that divides G (or G itself if small)."""
    if G <= cap:
        return G
    tn = cap - cap % 128
    while tn >= 128:
        if G % tn == 0:
            return tn
        tn -= 128
    return G


def _proj_vmem_limit(tm, tn, F, x_bytes, w_bytes, gi_bytes):
    need = (2 * tm * F * x_bytes        # double-buffered x tiles
            + 2 * F * tn * w_bytes      # double-buffered weight tiles
            + 2 * tn * 4                # bias tiles
            + 2 * tm * tn * gi_bytes)   # double-buffered output tiles
    need = int(1.5 * need) + (2 << 20)
    return max(min(need, 56 << 20), 16 << 20)


def input_projection(x2d, wih_t, bias_rz, *, tm=256):
    """x2d: (M, F) f32; wih_t: (F, 3H); bias_rz: (1, 3H) f32. Returns (M, 3H) wih dtype."""
    M, F = x2d.shape
    G = wih_t.shape[1]
    out_dtype = wih_t.dtype

    tm = min(tm, _round_up(M, 8))
    Mp = _round_up(M, tm)
    if Mp != M:
        x2d = jnp.pad(x2d, ((0, Mp - M), (0, 0)))
    tn = _pick_gate_tile(G)

    vmem_limit = _proj_vmem_limit(
        tm, tn, F,
        jnp.dtype(x2d.dtype).itemsize,
        jnp.dtype(wih_t.dtype).itemsize,
        jnp.dtype(out_dtype).itemsize)

    gi = pl.pallas_call(
        _proj_kernel,
        out_shape=jax.ShapeDtypeStruct((Mp, G), out_dtype),
        grid_spec=pltpu.PrefetchScalarGridSpec(
            num_scalar_prefetch=0,
            grid=(Mp // tm, G // tn),
            in_specs=[
                pl.BlockSpec((tm, F), lambda i, j: (i, 0)),   # revisited block -> not re-copied
                pl.BlockSpec((F, tn), lambda i, j: (0, j)),
                pl.BlockSpec((1, tn), lambda i, j: (0, j)),
            ],
            out_specs=pl.BlockSpec((tm, tn), lambda i, j: (i, j)),
        ),
        compiler_params=pltpu.CompilerParams(
            dimension_semantics=("parallel", "parallel"),
            vmem_limit_bytes=vmem_limit,
        ),
    )(x2d, wih_t, bias_rz)
    return gi[:M]


# ----------------------------------------------------------------------------
# (2) Recurrent GRU kernel: one (batch_block, time_block) tile per grid step.
# ----------------------------------------------------------------------------
def _make_gru_kernel(H, t_blk, fuse_residual):
    def kernel(*refs):
        if fuse_residual:
            (gi_ref, x_ref, whh_hbm, bhh_hbm,
             y_ref, h_ref, whh_vmem, bhh_vmem, load_sem) = refs
        else:
            (gi_ref, whh_hbm, bhh_hbm,
             y_ref, h_ref, whh_vmem, bhh_vmem, load_sem) = refs
            x_ref = None

        b_idx = pl.program_id(0)
        t_idx = pl.program_id(1)

        # W_hh^T / b_hn are grid-invariant: DMA them into VMEM exactly once.  Both
        # grid axes are "arbitrary" so the whole grid runs in order on one core and
        # grid step (0, 0) is guaranteed to execute first.
        @pl.when(jnp.logical_and(b_idx == 0, t_idx == 0))
        def _():
            w_cp = pltpu.make_async_copy(whh_hbm, whh_vmem, load_sem.at[0])
            b_cp = pltpu.make_async_copy(bhh_hbm, bhh_vmem, load_sem.at[1])
            w_cp.start()
            b_cp.start()
            w_cp.wait()
            b_cp.wait()

        # New batch block: PyTorch GRU default h0 = 0.
        @pl.when(t_idx == 0)
        def _():
            h_ref[...] = jnp.zeros_like(h_ref)

        n_blk = h_ref.shape[0]
        whh = whh_vmem[...]                                    # (H, 3H), bf16 by default
        bhn = jnp.broadcast_to(bhh_vmem[...], (n_blk, H))      # hoisted broadcast (f32)

        h = h_ref[...]                                         # (n_blk, H) f32 carry
        # Short, statically unrolled recurrence over the time chunk.  Gate slices
        # 0:H / H:2H / 2H:3H are free only because H % 128 == 0.
        for i in range(t_blk):
            gi_t = gi_ref[:, i, :]                             # (n_blk, 3H) bf16/f32, per-step load
            gh = jnp.dot(h.astype(whh.dtype), whh,
                         preferred_element_type=jnp.float32)   # (n_blk, 3H) f32
            r = jax.nn.sigmoid(gi_t[:, 0:H] + gh[:, 0:H])            # b_hr folded into gi
            z = jax.nn.sigmoid(gi_t[:, H:2 * H] + gh[:, H:2 * H])    # b_hz folded into gi
            n_gate = jnp.tanh(gi_t[:, 2 * H:] + r * (gh[:, 2 * H:] + bhn))
            h = n_gate + z * (h - n_gate)                      # == (1-z)*n + z*h
            out_t = h
            if fuse_residual:
                out_t = out_t + x_ref[:, i, :]
            y_ref[:, i, :] = out_t.astype(y_ref.dtype)         # per-step lane-dense store

        h_ref[...] = h

    return kernel


def _pick_t_blk(T, t_blk_max=8):
    """Time-chunk length whose block keeps the sublane dim a multiple of 8 or == T."""
    if T <= t_blk_max:
        return T
    for cand in range(t_blk_max, 0, -1):
        if T % cand == 0 and cand % 8 == 0:
            return cand
    return T


def _gru_resident_bytes(n_blk, t_blk, H, gi_bytes, w_bytes, x_bytes):
    resident = H * 3 * H * w_bytes + H * 4 + n_blk * H * 4
    pipelined = 2 * n_blk * t_blk * 3 * H * gi_bytes + 2 * n_blk * t_blk * H * 4
    if x_bytes:
        pipelined += 2 * n_blk * t_blk * H * x_bytes
    return resident + pipelined


def _choose_blocks(N, T, H, gi_bytes, w_bytes, x_bytes,
                   n_blk_target=128, t_blk_max=8, vmem_budget=44 << 20):
    t_blk = _pick_t_blk(T, t_blk_max)
    n_blk = min(n_blk_target, _round_up(N, 8))
    while (_gru_resident_bytes(n_blk, t_blk, H, gi_bytes, w_bytes, x_bytes)
           > vmem_budget and n_blk > 8):
        n_blk = max(8, _round_up(n_blk // 2, 8))
    return n_blk, t_blk


def _gru_vmem_limit(n_blk, t_blk, H, gi_bytes, w_bytes, x_bytes):
    need = int(1.3 * _gru_resident_bytes(n_blk, t_blk, H, gi_bytes, w_bytes, x_bytes))
    need += 2 << 20
    # Cap at 56 MiB: leaves headroom inside v7x's 64 MiB physical VMEM.
    return max(min(need, 56 << 20), 16 << 20)


def gru_pallas(gi, whh_t, bhh_n, x_res=None, *, n_blk, t_blk):
    """gi: (N, T, 3H) (b_ih + b_hh[r,z] folded in); whh_t: (H, 3H); bhh_n: (1, H) f32."""
    N, T, G = gi.shape
    H = G // 3
    assert N % n_blk == 0 and T % t_blk == 0
    fuse_residual = x_res is not None

    kernel = _make_gru_kernel(H, t_blk, fuse_residual)

    in_specs = [pl.BlockSpec((n_blk, t_blk, G), lambda b, t: (b, t, 0))]   # gi chunk
    inputs = [gi]
    if fuse_residual:
        in_specs.append(pl.BlockSpec((n_blk, t_blk, H), lambda b, t: (b, t, 0)))
        inputs.append(x_res)
    in_specs += [
        pl.BlockSpec(memory_space=pl.ANY),   # W_hh^T: stays in HBM, DMA'd once
        pl.BlockSpec(memory_space=pl.ANY),   # b_hn
    ]
    inputs += [whh_t, bhh_n]

    vmem_limit = _gru_vmem_limit(
        n_blk, t_blk, H,
        jnp.dtype(gi.dtype).itemsize,
        jnp.dtype(whh_t.dtype).itemsize,
        jnp.dtype(x_res.dtype).itemsize if fuse_residual else 0)

    return pl.pallas_call(
        kernel,
        out_shape=jax.ShapeDtypeStruct((N, T, H), jnp.float32),
        grid_spec=pltpu.PrefetchScalarGridSpec(
            num_scalar_prefetch=0,
            grid=(N // n_blk, T // t_blk),
            in_specs=in_specs,
            out_specs=pl.BlockSpec((n_blk, t_blk, H), lambda b, t: (b, t, 0)),
            scratch_shapes=[
                pltpu.VMEM((n_blk, H), jnp.float32),   # hidden-state carry
                pltpu.VMEM((H, G), whh_t.dtype),       # resident W_hh^T (loaded once)
                pltpu.VMEM((1, H), jnp.float32),       # resident b_hn
                pltpu.SemaphoreType.DMA((2,)),
            ],
        ),
        compiler_params=pltpu.CompilerParams(
            # Both axes "arbitrary": guarantees in-order single-core execution so the
            # one-time W_hh load at grid step (0, 0) is safe.
            # TODO(synk): v7x: batch axis -> pltpu.CORE_PARALLEL + per-core W_hh load.
            dimension_semantics=("arbitrary", "arbitrary"),
            vmem_limit_bytes=vmem_limit,
        ),
    )(*inputs)


# ----------------------------------------------------------------------------
# TemporalEncoder forward (batch-major end-to-end; no activation transposes).
# ----------------------------------------------------------------------------
def _forward_impl(x, params, add_residual):
    N, T, F = x.shape
    H = params["whh_t"].shape[0]
    if add_residual:
        assert F == H, "residual add requires input_size == hidden_size"

    gi_bytes = jnp.dtype(params["wih_t"].dtype).itemsize
    w_bytes = jnp.dtype(params["whh_t"].dtype).itemsize
    x_bytes = jnp.dtype(x.dtype).itemsize if add_residual else 0
    n_blk, t_blk = _choose_blocks(N, T, H, gi_bytes, w_bytes, x_bytes)

    # Pad batch to a multiple of n_blk (>= 8 -> full sublanes on the MXU LHS rows);
    # padded rows are dropped at the end.
    Np = _round_up(N, n_blk)
    if Np != N:
        x = jnp.pad(x, ((0, Np - N), (0, 0), (0, 0)))

    # Hoisted MXU-dense input projection over all Np*T rows (biases folded in).
    gi = input_projection(x.reshape(Np * T, F), params["wih_t"], params["bih_rz"])
    gi = gi.reshape(Np, T, 3 * H)

    # Sequential GRU recurrence (+ fused residual when requested).
    y = gru_pallas(gi, params["whh_t"], params["bhh_n"],
                   x_res=(x if add_residual else None),
                   n_blk=n_blk, t_blk=t_blk)
    return y[:N]


def temporal_encoder_forward(x, params, use_residual=True):
    """x: (n, t, f) -> (n, t, hidden).  add_linear=False, bidirectional=False."""
    hidden = params["whh_t"].shape[0]
    # self.linear is None for this configuration (no-op); PyTorch literal check:
    add_residual = bool(use_residual) and hidden == 2048
    return _forward_impl(x, params, add_residual=add_residual)


# ----------------------------------------------------------------------------
# Pure-JAX reference (PyTorch nn.GRU math, mirroring the kernel's dtype pipeline).
# ----------------------------------------------------------------------------
def temporal_encoder_ref(x, params, add_residual):
    wih_t, whh_t = params["wih_t"], params["whh_t"]
    bias_rz, bhh_n = params["bih_rz"], params["bhh_n"]
    H = whh_t.shape[0]
    gi = (jnp.einsum("ntf,fg->ntg", x.astype(wih_t.dtype), wih_t,
                     preferred_element_type=jnp.float32) + bias_rz).astype(wih_t.dtype)

    def step(h, gi_t):
        gh = jnp.dot(h.astype(whh_t.dtype), whh_t, preferred_element_type=jnp.float32)
        r = jax.nn.sigmoid(gi_t[:, 0:H] + gh[:, 0:H])
        z = jax.nn.sigmoid(gi_t[:, H:2 * H] + gh[:, H:2 * H])
        n = jnp.tanh(gi_t[:, 2 * H:] + r * (gh[:, 2 * H:] + bhh_n))
        h_new = n + z * (h - n)
        return h_new, h_new

    h0 = jnp.zeros((x.shape[0], H), jnp.float32)
    _, ys = jax.lax.scan(step, h0, jnp.transpose(gi, (1, 0, 2)))
    y = jnp.transpose(ys, (1, 0, 2))
    if add_residual:
        y = y + x
    return y


def init_params(key, input_size, hidden_size, w_dtype=jnp.bfloat16):
    # PyTorch GRU init: U(-1/sqrt(H), 1/sqrt(H)), gate order [r, z, n].
    H = hidden_size
    k = 1.0 / np.sqrt(H)
    k1, k2, k3, k4 = jax.random.split(key, 4)
    wih = jax.random.uniform(k1, (3 * H, input_size), jnp.float32, -k, k)
    whh = jax.random.uniform(k2, (3 * H, H), jnp.float32, -k, k)
    bih = jax.random.uniform(k3, (3 * H,), jnp.float32, -k, k)
    bhh = jax.random.uniform(k4, (3 * H,), jnp.float32, -k, k)
    # Fold b_hh's r/z components into b_ih (r and z are plain sums of the two gate
    # pre-activations); only the n-gate b_hh stays separate (multiplied by r).
    bias_rz = bih + jnp.concatenate([bhh[:2 * H], jnp.zeros((H,), jnp.float32)])
    return {
        "wih_t": wih.T.astype(w_dtype),     # (F, 3H)  projection weight (bf16 default)
        "whh_t": whh.T.astype(w_dtype),     # (H, 3H)  recurrent weight (bf16 default)
        "bih_rz": bias_rz[None, :],         # (1, 3H)  f32, b_hh[r,z] folded in
        "bhh_n": bhh[2 * H:][None, :],      # (1, H)   f32, n-gate b_hh
    }


if __name__ == "__main__":
    # Small shapes consistent with the module: batch n=2, seq t=16, input_size=128,
    # hidden_size=128 (scaled-down 2048).  With hidden != 2048 the residual branch
    # is (correctly) skipped, matching the PyTorch literal check.
    N, T, F_IN, H = 2, 16, 128, 128

    key = jax.random.PRNGKey(0)
    kx, kp = jax.random.split(key)
    x = jax.random.normal(kx, (N, T, F_IN), jnp.float32)

    fwd = jax.jit(temporal_encoder_forward)

    # --- f32 weights: exact PyTorch GRU math ---
    params_f32 = init_params(kp, F_IN, H, w_dtype=jnp.float32)
    y = jax.block_until_ready(fwd(x, params_f32))
    assert y.shape == (N, T, H), y.shape
    y_ref = temporal_encoder_ref(x, params_f32, add_residual=False)
    np.testing.assert_allclose(np.asarray(y), np.asarray(y_ref), atol=2e-4, rtol=2e-4)

    # --- bf16 weights / bf16 gi (default fast path), checked against a reference
    #     that uses the same bf16 pipeline; gate math stays f32 in both ---
    params_bf16 = init_params(kp, F_IN, H)   # w_dtype defaults to bf16
    y_bf16 = jax.block_until_ready(fwd(x, params_bf16))
    assert y_bf16.shape == (N, T, H), y_bf16.shape
    y_bf16_ref = temporal_encoder_ref(x, params_bf16, add_residual=False)
    np.testing.assert_allclose(np.asarray(y_bf16), np.asarray(y_bf16_ref),
                               atol=1e-2, rtol=1e-2)

    # --- fused-residual output path (only taken at hidden==2048 in the real module;
    #     forced here at small size to exercise the fused y = y + x store) ---
    fwd_res = jax.jit(functools.partial(_forward_impl, add_residual=True))
    y_res = jax.block_until_ready(fwd_res(x, params_f32))
    y_res_ref = temporal_encoder_ref(x, params_f32, add_residual=True)
    np.testing.assert_allclose(np.asarray(y_res), np.asarray(y_res_ref),
                               atol=2e-4, rtol=2e-4)

    print("KERNEL_OK")
</pallas_src>

<mosaic_0001>
module attributes {stable_mosaic.version = 11 : i64} {
  func.func @kernel(%arg0: i32, %arg1: i32, %arg2: memref<8x8x384xf32, #tpu.memory_space<vmem>>, %arg3: memref<128x384xf32, #tpu.memory_space<any>>, %arg4: memref<1x128xf32, #tpu.memory_space<any>>, %arg5: memref<8x8x128xf32, #tpu.memory_space<vmem>>, %arg6: memref<8x128xf32, #tpu.memory_space<vmem>>, %arg7: memref<128x384xf32, #tpu.memory_space<vmem>>, %arg8: memref<1x128xf32, #tpu.memory_space<vmem>>, %arg9: memref<2x!tpu.dma_semaphore, #tpu.memory_space<semaphore_mem>>) attributes {dimension_semantics = [#tpu.dimension_semantics<arbitrary>, #tpu.dimension_semantics<arbitrary>], iteration_bounds = array<i64: 1, 2>, scalar_prefetch = 0 : i64, scratch_operands = 4 : i64, tpu.core_type = #tpu.core_type<tc>, window_params = [{transform_indices = @transform_0, window_bounds = array<i64: 8, 8, 384>}, {}, {}, {transform_indices = @transform_3, window_bounds = array<i64: 8, 8, 128>}]} {
    %c0_i32 = arith.constant 0 : i32
    %0 = arith.cmpi eq, %arg0, %c0_i32 : i32
    %c0_i32_0 = arith.constant 0 : i32
    %1 = arith.cmpi eq, %arg1, %c0_i32_0 : i32
    %2 = arith.andi %0, %1 : i1
    %3 = arith.extui %2 : i1 to i32
    %c0_i32_1 = arith.constant 0 : i32
    %4 = arith.cmpi ne, %3, %c0_i32_1 : i32
    scf.if %4 {
      %c0_i32_75 = arith.constant 0 : i32
      %262 = tpu.memref_slice %arg9[%c0_i32_75] : memref<2x!tpu.dma_semaphore, #tpu.memory_space<semaphore_mem>> -> memref<1x!tpu.dma_semaphore, #tpu.memory_space<semaphore_mem>>
      %263 = tpu.memref_squeeze %262 : memref<1x!tpu.dma_semaphore, #tpu.memory_space<semaphore_mem>> -> memref<!tpu.dma_semaphore, #tpu.memory_space<semaphore_mem>>
      tpu.enqueue_dma source(%arg3 : memref<128x384xf32, #tpu.memory_space<any>>) target(%arg7 : memref<128x384xf32, #tpu.memory_space<vmem>>) target_semaphore(%263 : memref<!tpu.dma_semaphore, #tpu.memory_space<semaphore_mem>>)
      %c1_i32 = arith.constant 1 : i32
      %264 = tpu.memref_slice %arg9[%c1_i32] : memref<2x!tpu.dma_semaphore, #tpu.memory_space<semaphore_mem>> -> memref<1x!tpu.dma_semaphore, #tpu.memory_space<semaphore_mem>>
      %265 = tpu.memref_squeeze %264 : memref<1x!tpu.dma_semaphore, #tpu.memory_space<semaphore_mem>> -> memref<!tpu.dma_semaphore, #tpu.memory_space<semaphore_mem>>
      tpu.enqueue_dma source(%arg4 : memref<1x128xf32, #tpu.memory_space<any>>) target(%arg8 : memref<1x128xf32, #tpu.memory_space<vmem>>) target_semaphore(%265 : memref<!tpu.dma_semaphore, #tpu.memory_space<semaphore_mem>>)
      %c0_i32_76 = arith.constant 0 : i32
      %266 = tpu.memref_slice %arg9[%c0_i32_76] : memref<2x!tpu.dma_semaphore, #tpu.memory_space<semaphore_mem>> -> memref<1x!tpu.dma_semaphore, #tpu.memory_space<semaphore_mem>>
      %267 = tpu.memref_squeeze %266 : memref<1x!tpu.dma_semaphore, #tpu.memory_space<semaphore_mem>> -> memref<!tpu.dma_semaphore, #tpu.memory_space<semaphore_mem>>
      tpu.wait_dma2 semaphore(%267 : memref<!tpu.dma_semaphore, #tpu.memory_space<semaphore_mem>>) src(%arg3 : memref<128x384xf32, #tpu.memory_space<any>>) dst(%arg7 : memref<128x384xf32, #tpu.memory_space<vmem>>)
      %c1_i32_77 = arith.constant 1 : i32
      %268 = tpu.memref_slice %arg9[%c1_i32_77] : memref<2x!tpu.dma_semaphore, #tpu.memory_space<semaphore_mem>> -> memref<1x!tpu.dma_semaphore, #tpu.memory_space<semaphore_mem>>
      %269 = tpu.memref_squeeze %268 : memref<1x!tpu.dma_semaphore, #tpu.memory_space<semaphore_mem>> -> memref<!tpu.dma_semaphore, #tpu.memory_space<semaphore_mem>>
      tpu.wait_dma2 semaphore(%269 : memref<!tpu.dma_semaphore, #tpu.memory_space<semaphore_mem>>) src(%arg4 : memref<1x128xf32, #tpu.memory_space<any>>) dst(%arg8 : memref<1x128xf32, #tpu.memory_space<vmem>>)
    } else {
    }
    %c0_i32_2 = arith.constant 0 : i32
    %5 = arith.cmpi eq, %arg1, %c0_i32_2 : i32
    %6 = arith.extui %5 : i1 to i32
    %c0_i32_3 = arith.constant 0 : i32
    %7 = arith.cmpi ne, %6, %c0_i32_3 : i32
    scf.if %7 {
      %cst_75 = arith.constant 0.000000e+00 : f32
      %262 = vector.broadcast %cst_75 : f32 to vector<8x128xf32>
      %c0_76 = arith.constant 0 : index
      %c0_77 = arith.constant 0 : index
      %263 = vector.load %arg6[%c0_76, %c0_77] : memref<8x128xf32, #tpu.memory_space<vmem>>, vector<8x128xf32>
      tpu.vector_store %arg6[%c0_76, %c0_77], %262 {strides = array<i32>} : memref<8x128xf32, #tpu.memory_space<vmem>>, vector<8x128xf32>,
    } else {
    }
    %c0 = arith.constant 0 : index
    %c0_4 = arith.constant 0 : index
    %8 = vector.load %arg7[%c0, %c0_4] : memref<128x384xf32, #tpu.memory_space<vmem>>, vector<128x384xf32>
    %c0_5 = arith.constant 0 : index
    %c0_6 = arith.constant 0 : index
    %9 = vector.load %arg8[%c0_5, %c0_6] : memref<1x128xf32, #tpu.memory_space<vmem>>, vector<1x128xf32>
    %10 = vector.shape_cast %9 : vector<1x128xf32> to vector<1x128xf32>
    %11 = vector.broadcast %10 : vector<1x128xf32> to vector<8x128xf32>
    %c0_7 = arith.constant 0 : index
    %c0_8 = arith.constant 0 : index
    %12 = vector.load %arg6[%c0_7, %c0_8] : memref<8x128xf32, #tpu.memory_space<vmem>>, vector<8x128xf32>
    %c0_9 = arith.constant 0 : index
    %c0_10 = arith.constant 0 : index
    %c0_11 = arith.constant 0 : index
    %13 = vector.load %arg2[%c0_9, %c0_10, %c0_11] : memref<8x8x384xf32, #tpu.memory_space<vmem>>, vector<8x1x384xf32>
    %14 = vector.shape_cast %13 : vector<8x1x384xf32> to vector<8x384xf32>
    %cst = arith.constant dense<0.000000e+00> : vector<8x384xf32>
    %15 = tpu.matmul %12, %8, %cst {dimension_numbers = #tpu.dot_dimension_numbers<[1], [0], [0], [1], [0, 0, 1, 1], [], []>} : vector<8x128xf32>, vector<128x384xf32>, vector<8x384xf32> -> vector<8x384xf32>
    %16 = vector.extract_strided_slice %14 {offsets = [0, 0], sizes = [8, 128], strides = [1, 1]} : vector<8x384xf32> to vector<8x128xf32>
    %17 = vector.extract_strided_slice %15 {offsets = [0, 0], sizes = [8, 128], strides = [1, 1]} : vector<8x384xf32> to vector<8x128xf32>
    %18 = arith.addf %16, %17 : vector<8x128xf32>
    %19 = arith.negf %18 : vector<8x128xf32>
    %20 = math.exp %19 : vector<8x128xf32>
    %cst_12 = arith.constant 1.000000e+00 : f32
    %21 = vector.broadcast %cst_12 : f32 to vector<8x128xf32>
    %22 = arith.addf %21, %20 : vector<8x128xf32>
    %23 = arith.divf %21, %22 : vector<8x128xf32>
    %24 = vector.extract_strided_slice %14 {offsets = [0, 128], sizes = [8, 128], strides = [1, 1]} : vector<8x384xf32> to vector<8x128xf32>
    %25 = vector.extract_strided_slice %15 {offsets = [0, 128], sizes = [8, 128], strides = [1, 1]} : vector<8x384xf32> to vector<8x128xf32>
    %26 = arith.addf %24, %25 : vector<8x128xf32>
    %27 = arith.negf %26 : vector<8x128xf32>
    %28 = math.exp %27 : vector<8x128xf32>
    %cst_13 = arith.constant 1.000000e+00 : f32
    %29 = vector.broadcast %cst_13 : f32 to vector<8x128xf32>
    %30 = arith.addf %29, %28 : vector<8x128xf32>
    %31 = arith.divf %29, %30 : vector<8x128xf32>
    %32 = vector.extract_strided_slice %14 {offsets = [0, 256], sizes = [8, 128], strides = [1, 1]} : vector<8x384xf32> to vector<8x128xf32>
    %33 = vector.extract_strided_slice %15 {offsets = [0, 256], sizes = [8, 128], strides = [1, 1]} : vector<8x384xf32> to vector<8x128xf32>
    %34 = arith.addf %33, %11 : vector<8x128xf32>
    %35 = arith.mulf %23, %34 : vector<8x128xf32>
    %36 = arith.addf %32, %35 : vector<8x128xf32>
    %37 = math.tanh %36 : vector<8x128xf32>
    %38 = arith.subf %12, %37 : vector<8x128xf32>
    %39 = arith.mulf %31, %38 : vector<8x128xf32>
    %40 = arith.addf %37, %39 : vector<8x128xf32>
    %c0_14 = arith.constant 0 : index
    %c0_15 = arith.constant 0 : index
    %c0_16 = arith.constant 0 : index
    %41 = vector.load %arg5[%c0_14, %c0_15, %c0_16] : memref<8x8x128xf32, #tpu.memory_space<vmem>>, vector<8x1x128xf32>
    %42 = vector.shape_cast %41 : vector<8x1x128xf32> to vector<8x128xf32>
    %43 = vector.shape_cast %40 : vector<8x128xf32> to vector<8x1x128xf32>
    tpu.vector_store %arg5[%c0_14, %c0_15, %c0_16], %43 {strides = array<i32>} : memref<8x8x128xf32, #tpu.memory_space<vmem>>, vector<8x1x128xf32>,
    %c0_17 = arith.constant 0 : index
    %c1 = arith.constant 1 : index
    %c0_18 = arith.constant 0 : index
    %44 = vector.load %arg2[%c0_17, %c1, %c0_18] : memref<8x8x384xf32, #tpu.memory_space<vmem>>, vector<8x1x384xf32>
    %45 = vector.shape_cast %44 : vector<8x1x384xf32> to vector<8x384xf32>
    %cst_19 = arith.constant dense<0.000000e+00> : vector<8x384xf32>
    %46 = tpu.matmul %40, %8, %cst_19 {dimension_numbers = #tpu.dot_dimension_numbers<[1], [0], [0], [1], [0, 0, 1, 1], [], []>} : vector<8x128xf32>, vector<128x384xf32>, vector<8x384xf32> -> vector<8x384xf32>
    %47 = vector.extract_strided_slice %45 {offsets = [0, 0], sizes = [8, 128], strides = [1, 1]} : vector<8x384xf32> to vector<8x128xf32>
    %48 = vector.extract_strided_slice %46 {offsets = [0, 0], sizes = [8, 128], strides = [1, 1]} : vector<8x384xf32> to vector<8x128xf32>
    %49 = arith.addf %47, %48 : vector<8x128xf32>
    %50 = arith.negf %49 : vector<8x128xf32>
    %51 = math.exp %50 : vector<8x128xf32>
    %cst_20 = arith.constant 1.000000e+00 : f32
    %52 = vector.broadcast %cst_20 : f32 to vector<8x128xf32>
    %53 = arith.addf %52, %51 : vector<8x128xf32>
    %54 = arith.divf %52, %53 : vector<8x128xf32>
    %55 = vector.extract_strided_slice %45 {offsets = [0, 128], sizes = [8, 128], strides = [1, 1]} : vector<8x384xf32> to vector<8x128xf32>
    %56 = vector.extract_strided_slice %46 {offsets = [0, 128], sizes = [8, 128], strides = [1, 1]} : vector<8x384xf32> to vector<8x128xf32>
    %57 = arith.addf %55, %56 : vector<8x128xf32>
    %58 = arith.negf %57 : vector<8x128xf32>
    %59 = math.exp %58 : vector<8x128xf32>
    %cst_21 = arith.constant 1.000000e+00 : f32
    %60 = vector.broadcast %cst_21 : f32 to vector<8x128xf32>
    %61 = arith.addf %60, %59 : vector<8x128xf32>
    %62 = arith.divf %60, %61 : vector<8x128xf32>
    %63 = vector.extract_strided_slice %45 {offsets = [0, 256], sizes = [8, 128], strides = [1, 1]} : vector<8x384xf32> to vector<8x128xf32>
    %64 = vector.extract_strided_slice %46 {offsets = [0, 256], sizes = [8, 128], strides = [1, 1]} : vector<8x384xf32> to vector<8x128xf32>
    %65 = arith.addf %64, %11 : vector<8x128xf32>
    %66 = arith.mulf %54, %65 : vector<8x128xf32>
    %67 = arith.addf %63, %66 : vector<8x128xf32>
    %68 = math.tanh %67 : vector<8x128xf32>
    %69 = arith.subf %40, %68 : vector<8x128xf32>
    %70 = arith.mulf %62, %69 : vector<8x128xf32>
    %71 = arith.addf %68, %70 : vector<8x128xf32>
    %c0_22 = arith.constant 0 : index
    %c1_23 = arith.constant 1 : index
    %c0_24 = arith.constant 0 : index
    %72 = vector.load %arg5[%c0_22, %c1_23, %c0_24] : memref<8x8x128xf32, #tpu.memory_space<vmem>>, vector<8x1x128xf32>
    %73 = vector.shape_cast %72 : vector<8x1x128xf32> to vector<8x128xf32>
    %74 = vector.shape_cast %71 : vector<8x128xf32> to vector<8x1x128xf32>
    tpu.vector_store %arg5[%c0_22, %c1_23, %c0_24], %74 {strides = array<i32>} : memref<8x8x128xf32, #tpu.memory_space<vmem>>, vector<8x1x128xf32>,
    %c0_25 = arith.constant 0 : index
    %c2 = arith.constant 2 : index
    %c0_26 = arith.constant 0 : index
    %75 = vector.load %arg2[%c0_25, %c2, %c0_26] : memref<8x8x384xf32, #tpu.memory_space<vmem>>, vector<8x1x384xf32>
    %76 = vector.shape_cast %75 : vector<8x1x384xf32> to vector<8x384xf32>
    %cst_27 = arith.constant dense<0.000000e+00> : vector<8x384xf32>
    %77 = tpu.matmul %71, %8, %cst_27 {dimension_numbers = #tpu.dot_dimension_numbers<[1], [0], [0], [1], [0, 0, 1, 1], [], []>} : vector<8x128xf32>, vector<128x384xf32>, vector<8x384xf32> -> vector<8x384xf32>
    %78 = vector.extract_strided_slice %76 {offsets = [0, 0], sizes = [8, 128], strides = [1, 1]} : vector<8x384xf32> to vector<8x128xf32>
    %79 = vector.extract_strided_slice %77 {offsets = [0, 0], sizes = [8, 128], strides = [1, 1]} : vector<8x384xf32> to vector<8x128xf32>
    %80 = arith.addf %78, %79 : vector<8x128xf32>
    %81 = arith.negf %80 : vector<8x128xf32>
    %82 = math.exp %81 : vector<8x128xf32>
    %cst_28 = arith.constant 1.000000e+00 : f32
    %83 = vector.broadcast %cst_28 : f32 to vector<8x128xf32>
    %84 = arith.addf %83, %82 : vector<8x128xf32>
    %85 = arith.divf %83, %84 : vector<8x128xf32>
    %86 = vector.extract_strided_slice %76 {offsets = [0, 128], sizes = [8, 128], strides = [1, 1]} : vector<8x384xf32> to vector<8x128xf32>
    %87 = vector.extract_strided_slice %77 {offsets = [0, 128], sizes = [8, 128], strides = [1, 1]} : vector<8x384xf32> to vector<8x128xf32>
    %88 = arith.addf %86, %87 : vector<8x128xf32>
    %89 = arith.negf %88 : vector<8x128xf32>
    %90 = math.exp %89 : vector<8x128xf32>
    %cst_29 = arith.constant 1.000000e+00 : f32
    %91 = vector.broadcast %cst_29 : f32 to vector<8x128xf32>
    %92 = arith.addf %91, %90 : vector<8x128xf32>
    %93 = arith.divf %91, %92 : vector<8x128xf32>
    %94 = vector.extract_strided_slice %76 {offsets = [0, 256], sizes = [8, 128], strides = [1, 1]} : vector<8x384xf32> to vector<8x128xf32>
    %95 = vector.extract_strided_slice %77 {offsets = [0, 256], sizes = [8, 128], strides = [1, 1]} : vector<8x384xf32> to vector<8x128xf32>
    %96 = arith.addf %95, %11 : vector<8x128xf32>
    %97 = arith.mulf %85, %96 : vector<8x128xf32>
    %98 = arith.addf %94, %97 : vector<8x128xf32>
    %99 = math.tanh %98 : vector<8x128xf32>
    %100 = arith.subf %71, %99 : vector<8x128xf32>
    %101 = arith.mulf %93, %100 : vector<8x128xf32>
    %102 = arith.addf %99, %101 : vector<8x128xf32>
    %c0_30 = arith.constant 0 : index
    %c2_31 = arith.constant 2 : index
    %c0_32 = arith.constant 0 : index
    %103 = vector.load %arg5[%c0_30, %c2_31, %c0_32] : memref<8x8x128xf32, #tpu.memory_space<vmem>>, vector<8x1x128xf32>
    %104 = vector.shape_cast %103 : vector<8x1x128xf32> to vector<8x128xf32>
    %105 = vector.shape_cast %102 : vector<8x128xf32> to vector<8x1x128xf32>
    tpu.vector_store %arg5[%c0_30, %c2_31, %c0_32], %105 {strides = array<i32>} : memref<8x8x128xf32, #tpu.memory_space<vmem>>, vector<8x1x128xf32>,
    %c0_33 = arith.constant 0 : index
    %c3 = arith.constant 3 : index
    %c0_34 = arith.constant 0 : index
    %106 = vector.load %arg2[%c0_33, %c3, %c0_34] : memref<8x8x384xf32, #tpu.memory_space<vmem>>, vector<8x1x384xf32>
    %107 = vector.shape_cast %106 : vector<8x1x384xf32> to vector<8x384xf32>
    %cst_35 = arith.constant dense<0.000000e+00> : vector<8x384xf32>
    %108 = tpu.matmul %102, %8, %cst_35 {dimension_numbers = #tpu.dot_dimension_numbers<[1], [0], [0], [1], [0, 0, 1, 1], [], []>} : vector<8x128xf32>, vector<128x384xf32>, vector<8x384xf32> -> vector<8x384xf32>
    %109 = vector.extract_strided_slice %107 {offsets = [0, 0], sizes = [8, 128], strides = [1, 1]} : vector<8x384xf32> to vector<8x128xf32>
    %110 = vector.extract_strided_slice %108 {offsets = [0, 0], sizes = [8, 128], strides = [1, 1]} : vector<8x384xf32> to vector<8x128xf32>
    %111 = arith.addf %109, %110 : vector<8x128xf32>
    %112 = arith.negf %111 : vector<8x128xf32>
    %113 = math.exp %112 : vector<8x128xf32>
    %cst_36 = arith.constant 1.000000e+00 : f32
    %114 = vector.broadcast %cst_36 : f32 to vector<8x128xf32>
    %115 = arith.addf %114, %113 : vector<8x128xf32>
    %116 = arith.divf %114, %115 : vector<8x128xf32>
    %117 = vector.extract_strided_slice %107 {offsets = [0, 128], sizes = [8, 128], strides = [1, 1]} : vector<8x384xf32> to vector<8x128xf32>
    %118 = vector.extract_strided_slice %108 {offsets = [0, 128], sizes = [8, 128], strides = [1, 1]} : vector<8x384xf32> to vector<8x128xf32>
    %119 = arith.addf %117, %118 : vector<8x128xf32>
    %120 = arith.negf %119 : vector<8x128xf32>
    %121 = math.exp %120 : vector<8x128xf32>
    %cst_37 = arith.constant 1.000000e+00 : f32
    %122 = vector.broadcast %cst_37 : f32 to vector<8x128xf32>
    %123 = arith.addf %122, %121 : vector<8x128xf32>
    %124 = arith.divf %122, %123 : vector<8x128xf32>
    %125 = vector.extract_strided_slice %107 {offsets = [0, 256], sizes = [8, 128], strides = [1, 1]} : vector<8x384xf32> to vector<8x128xf32>
    %126 = vector.extract_strided_slice %108 {offsets = [0, 256], sizes = [8, 128], strides = [1, 1]} : vector<8x384xf32> to vector<8x128xf32>
    %127 = arith.addf %126, %11 : vector<8x128xf32>
    %128 = arith.mulf %116, %127 : vector<8x128xf32>
    %129 = arith.addf %125, %128 : vector<8x128xf32>
    %130 = math.tanh %129 : vector<8x128xf32>
    %131 = arith.subf %102, %130 : vector<8x128xf32>
    %132 = arith.mulf %124, %131 : vector<8x128xf32>
    %133 = arith.addf %130, %132 : vector<8x128xf32>
    %c0_38 = arith.constant 0 : index
    %c3_39 = arith.constant 3 : index
    %c0_40 = arith.constant 0 : index
    %134 = vector.load %arg5[%c0_38, %c3_39, %c0_40] : memref<8x8x128xf32, #tpu.memory_space<vmem>>, vector<8x1x128xf32>
    %135 = vector.shape_cast %134 : vector<8x1x128xf32> to vector<8x128xf32>
    %136 = vector.shape_cast %133 : vector<8x128xf32> to vector<8x1x128xf32>
    tpu.vector_store %arg5[%c0_38, %c3_39, %c0_40], %136 {strides = array<i32>} : memref<8x8x128xf32, #tpu.memory_space<vmem>>, vector<8x1x128xf32>,
    %c0_41 = arith.constant 0 : index
    %c4 = arith.constant 4 : index
    %c0_42 = arith.constant 0 : index
    %137 = vector.load %arg2[%c0_41, %c4, %c0_42] : memref<8x8x384xf32, #tpu.memory_space<vmem>>, vector<8x1x384xf32>
    %138 = vector.shape_cast %137 : vector<8x1x384xf32> to vector<8x384xf32>
    %cst_43 = arith.constant dense<0.000000e+00> : vector<8x384xf32>
    %139 = tpu.matmul %133, %8, %cst_43 {dimension_numbers = #tpu.dot_dimension_numbers<[1], [0], [0], [1], [0, 0, 1, 1], [], []>} : vector<8x128xf32>, vector<128x384xf32>, vector<8x384xf32> -> vector<8x384xf32>
    %140 = vector.extract_strided_slice %138 {offsets = [0, 0], sizes = [8, 128], strides = [1, 1]} : vector<8x384xf32> to vector<8x128xf32>
    %141 = vector.extract_strided_slice %139 {offsets = [0, 0], sizes = [8, 128], strides = [1, 1]} : vector<8x384xf32> to vector<8x128xf32>
    %142 = arith.addf %140, %141 : vector<8x128xf32>
    %143 = arith.negf %142 : vector<8x128xf32>
    %144 = math.exp %143 : vector<8x128xf32>
    %cst_44 = arith.constant 1.000000e+00 : f32
    %145 = vector.broadcast %cst_44 : f32 to vector<8x128xf32>
    %146 = arith.addf %145, %144 : vector<8x128xf32>
    %147 = arith.divf %145, %146 : vector<8x128xf32>
    %148 = vector.extract_strided_slice %138 {offsets = [0, 128], sizes = [8, 128], strides = [1, 1]} : vector<8x384xf32> to vector<8x128xf32>
    %149 = vector.extract_strided_slice %139 {offsets = [0, 128], sizes = [8, 128], strides = [1, 1]} : vector<8x384xf32> to vector<8x128xf32>
    %150 = arith.addf %148, %149 : vector<8x128xf32>
    %151 = arith.negf %150 : vector<8x128xf32>
    %152 = math.exp %151 : vector<8x128xf32>
    %cst_45 = arith.constant 1.000000e+00 : f32
    %153 = vector.broadcast %cst_45 : f32 to vector<8x128xf32>
    %154 = arith.addf %153, %152 : vector<8x128xf32>
    %155 = arith.divf %153, %154 : vector<8x128xf32>
    %156 = vector.extract_strided_slice %138 {offsets = [0, 256], sizes = [8, 128], strides = [1, 1]} : vector<8x384xf32> to vector<8x128xf32>
    %157 = vector.extract_strided_slice %139 {offsets = [0, 256], sizes = [8, 128], strides = [1, 1]} : vector<8x384xf32> to vector<8x128xf32>
    %158 = arith.addf %157, %11 : vector<8x128xf32>
    %159 = arith.mulf %147, %158 : vector<8x128xf32>
    %160 = arith.addf %156, %159 : vector<8x128xf32>
    %161 = math.tanh %160 : vector<8x128xf32>
    %162 = arith.subf %133, %161 : vector<8x128xf32>
    %163 = arith.mulf %155, %162 : vector<8x128xf32>
    %164 = arith.addf %161, %163 : vector<8x128xf32>
    %c0_46 = arith.constant 0 : index
    %c4_47 = arith.constant 4 : index
    %c0_48 = arith.constant 0 : index
    %165 = vector.load %arg5[%c0_46, %c4_47, %c0_48] : memref<8x8x128xf32, #tpu.memory_space<vmem>>, vector<8x1x128xf32>
    %166 = vector.shape_cast %165 : vector<8x1x128xf32> to vector<8x128xf32>
    %167 = vector.shape_cast %164 : vector<8x128xf32> to vector<8x1x128xf32>
    tpu.vector_store %arg5[%c0_46, %c4_47, %c0_48], %167 {strides = array<i32>} : memref<8x8x128xf32, #tpu.memory_space<vmem>>, vector<8x1x128xf32>,
    %c0_49 = arith.constant 0 : index
    %c5 = arith.constant 5 : index
    %c0_50 = arith.constant 0 : index
    %168 = vector.load %arg2[%c0_49, %c5, %c0_50] : memref<8x8x384xf32, #tpu.memory_space<vmem>>, vector<8x1x384xf32>
    %169 = vector.shape_cast %168 : vector<8x1x384xf32> to vector<8x384xf32>
    %cst_51 = arith.constant dense<0.000000e+00> : vector<8x384xf32>
    %170 = tpu.matmul %164, %8, %cst_51 {dimension_numbers = #tpu.dot_dimension_numbers<[1], [0], [0], [1], [0, 0, 1, 1], [], []>} : vector<8x128xf32>, vector<128x384xf32>, vector<8x384xf32> -> vector<8x384xf32>
    %171 = vector.extract_strided_slice %169 {offsets = [0, 0], sizes = [8, 128], strides = [1, 1]} : vector<8x384xf32> to vector<8x128xf32>
    %172 = vector.extract_strided_slice %170 {offsets = [0, 0], sizes = [8, 128], strides = [1, 1]} : vector<8x384xf32> to vector<8x128xf32>
    %173 = arith.addf %171, %172 : vector<8x128xf32>
    %174 = arith.negf %173 : vector<8x128xf32>
    %175 = math.exp %174 : vector<8x128xf32>
    %cst_52 = arith.constant 1.000000e+00 : f32
    %176 = vector.broadcast %cst_52 : f32 to vector<8x128xf32>
    %177 = arith.addf %176, %175 : vector<8x128xf32>
    %178 = arith.divf %176, %177 : vector<8x128xf32>
    %179 = vector.extract_strided_slice %169 {offsets = [0, 128], sizes = [8, 128], strides = [1, 1]} : vector<8x384xf32> to vector<8x128xf32>
    %180 = vector.extract_strided_slice %170 {offsets = [0, 128], sizes = [8, 128], strides = [1, 1]} : vector<8x384xf32> to vector<8x128xf32>
    %181 = arith.addf %179, %180 : vector<8x128xf32>
    %182 = arith.negf %181 : vector<8x128xf32>
    %183 = math.exp %182 : vector<8x128xf32>
    %cst_53 = arith.constant 1.000000e+00 : f32
    %184 = vector.broadcast %cst_53 : f32 to vector<8x128xf32>
    %185 = arith.addf %184, %183 : vector<8x128xf32>
    %186 = arith.divf %184, %185 : vector<8x128xf32>
    %187 = vector.extract_strided_slice %169 {offsets = [0, 256], sizes = [8, 128], strides = [1, 1]} : vector<8x384xf32> to vector<8x128xf32>
    %188 = vector.extract_strided_slice %170 {offsets = [0, 256], sizes = [8, 128], strides = [1, 1]} : vector<8x384xf32> to vector<8x128xf32>
    %189 = arith.addf %188, %11 : vector<8x128xf32>
    %190 = arith.mulf %178, %189 : vector<8x128xf32>
    %191 = arith.addf %187, %190 : vector<8x128xf32>
    %192 = math.tanh %191 : vector<8x128xf32>
    %193 = arith.subf %164, %192 : vector<8x128xf32>
    %194 = arith.mulf %186, %193 : vector<8x128xf32>
    %195 = arith.addf %192, %194 : vector<8x128xf32>
    %c0_54 = arith.constant 0 : index
    %c5_55 = arith.constant 5 : index
    %c0_56 = arith.constant 0 : index
    %196 = vector.load %arg5[%c0_54, %c5_55, %c0_56] : memref<8x8x128xf32, #tpu.memory_space<vmem>>, vector<8x1x128xf32>
    %197 = vector.shape_cast %196 : vector<8x1x128xf32> to vector<8x128xf32>
    %198 = vector.shape_cast %195 : vector<8x128xf32> to vector<8x1x128xf32>
    tpu.vector_store %arg5[%c0_54, %c5_55, %c0_56], %198 {strides = array<i32>} : memref<8x8x128xf32, #tpu.memory_space<vmem>>, vector<8x1x128xf32>,
    %c0_57 = arith.constant 0 : index
    %c6 = arith.constant 6 : index
    %c0_58 = arith.constant 0 : index
    %199 = vector.load %arg2[%c0_57, %c6, %c0_58] : memref<8x8x384xf32, #tpu.memory_space<vmem>>, vector<8x1x384xf32>
    %200 = vector.shape_cast %199 : vector<8x1x384xf32> to vector<8x384xf32>
    %cst_59 = arith.constant dense<0.000000e+00> : vector<8x384xf32>
    %201 = tpu.matmul %195, %8, %cst_59 {dimension_numbers = #tpu.dot_dimension_numbers<[1], [0], [0], [1], [0, 0, 1, 1], [], []>} : vector<8x128xf32>, vector<128x384xf32>, vector<8x384xf32> -> vector<8x384xf32>
    %202 = vector.extract_strided_slice %200 {offsets = [0, 0], sizes = [8, 128], strides = [1, 1]} : vector<8x384xf32> to vector<8x128xf32>
    %203 = vector.extract_strided_slice %201 {offsets = [0, 0], sizes = [8, 128], strides = [1, 1]} : vector<8x384xf32> to vector<8x128xf32>
    %204 = arith.addf %202, %203 : vector<8x128xf32>
    %205 = arith.negf %204 : vector<8x128xf32>
    %206 = math.exp %205 : vector<8x128xf32>
    %cst_60 = arith.constant 1.000000e+00 : f32
    %207 = vector.broadcast %cst_60 : f32 to vector<8x128xf32>
    %208 = arith.addf %207, %206 : vector<8x128xf32>
    %209 = arith.divf %207, %208 : vector<8x128xf32>
    %210 = vector.extract_strided_slice %200 {offsets = [0, 128], sizes = [8, 128], strides = [1, 1]} : vector<8x384xf32> to vector<8x128xf32>
    %211 = vector.extract_strided_slice %201 {offsets = [0, 128], sizes = [8, 128], strides = [1, 1]} : vector<8x384xf32> to vector<8x128xf32>
    %212 = arith.addf %210, %211 : vector<8x128xf32>
    %213 = arith.negf %212 : vector<8x128xf32>
    %214 = math.exp %213 : vector<8x128xf32>
    %cst_61 = arith.constant 1.000000e+00 : f32
    %215 = vector.broadcast %cst_61 : f32 to vector<8x128xf32>
    %216 = arith.addf %215, %214 : vector<8x128xf32>
    %217 = arith.divf %215, %216 : vector<8x128xf32>
    %218 = vector.extract_strided_slice %200 {offsets = [0, 256], sizes = [8, 128], strides = [1, 1]} : vector<8x384xf32> to vector<8x128xf32>
    %219 = vector.extract_strided_slice %201 {offsets = [0, 256], sizes = [8, 128], strides = [1, 1]} : vector<8x384xf32> to vector<8x128xf32>
    %220 = arith.addf %219, %11 : vector<8x128xf32>
    %221 = arith.mulf %209, %220 : vector<8x128xf32>
    %222 = arith.addf %218, %221 : vector<8x128xf32>
    %223 = math.tanh %222 : vector<8x128xf32>
    %224 = arith.subf %195, %223 : vector<8x128xf32>
    %225 = arith.mulf %217, %224 : vector<8x128xf32>
    %226 = arith.addf %223, %225 : vector<8x128xf32>
    %c0_62 = arith.constant 0 : index
    %c6_63 = arith.constant 6 : index
    %c0_64 = arith.constant 0 : index
    %227 = vector.load %arg5[%c0_62, %c6_63, %c0_64] : memref<8x8x128xf32, #tpu.memory_space<vmem>>, vector<8x1x128xf32>
    %228 = vector.shape_cast %227 : vector<8x1x128xf32> to vector<8x128xf32>
    %229 = vector.shape_cast %226 : vector<8x128xf32> to vector<8x1x128xf32>
    tpu.vector_store %arg5[%c0_62, %c6_63, %c0_64], %229 {strides = array<i32>} : memref<8x8x128xf32, #tpu.memory_space<vmem>>, vector<8x1x128xf32>,
    %c0_65 = arith.constant 0 : index
    %c7 = arith.constant 7 : index
    %c0_66 = arith.constant 0 : index
    %230 = vector.load %arg2[%c0_65, %c7, %c0_66] : memref<8x8x384xf32, #tpu.memory_space<vmem>>, vector<8x1x384xf32>
    %231 = vector.shape_cast %230 : vector<8x1x384xf32> to vector<8x384xf32>
    %cst_67 = arith.constant dense<0.000000e+00> : vector<8x384xf32>
    %232 = tpu.matmul %226, %8, %cst_67 {dimension_numbers = #tpu.dot_dimension_numbers<[1], [0], [0], [1], [0, 0, 1, 1], [], []>} : vector<8x128xf32>, vector<128x384xf32>, vector<8x384xf32> -> vector<8x384xf32>
    %233 = vector.extract_strided_slice %231 {offsets = [0, 0], sizes = [8, 128], strides = [1, 1]} : vector<8x384xf32> to vector<8x128xf32>
    %234 = vector.extract_strided_slice %232 {offsets = [0, 0], sizes = [8, 128], strides = [1, 1]} : vector<8x384xf32> to vector<8x128xf32>
    %235 = arith.addf %233, %234 : vector<8x128xf32>
    %236 = arith.negf %235 : vector<8x128xf32>
    %237 = math.exp %236 : vector<8x128xf32>
    %cst_68 = arith.constant 1.000000e+00 : f32
    %238 = vector.broadcast %cst_68 : f32 to vector<8x128xf32>
    %239 = arith.addf %238, %237 : vector<8x128xf32>
    %240 = arith.divf %238, %239 : vector<8x128xf32>
    %241 = vector.extract_strided_slice %231 {offsets = [0, 128], sizes = [8, 128], strides = [1, 1]} : vector<8x384xf32> to vector<8x128xf32>
    %242 = vector.extract_strided_slice %232 {offsets = [0, 128], sizes = [8, 128], strides = [1, 1]} : vector<8x384xf32> to vector<8x128xf32>
    %243 = arith.addf %241, %242 : vector<8x128xf32>
    %244 = arith.negf %243 : vector<8x128xf32>
    %245 = math.exp %244 : vector<8x128xf32>
    %cst_69 = arith.constant 1.000000e+00 : f32
    %246 = vector.broadcast %cst_69 : f32 to vector<8x128xf32>
    %247 = arith.addf %246, %245 : vector<8x128xf32>
    %248 = arith.divf %246, %247 : vector<8x128xf32>
    %249 = vector.extract_strided_slice %231 {offsets = [0, 256], sizes = [8, 128], strides = [1, 1]} : vector<8x384xf32> to vector<8x128xf32>
    %250 = vector.extract_strided_slice %232 {offsets = [0, 256], sizes = [8, 128], strides = [1, 1]} : vector<8x384xf32> to vector<8x128xf32>
    %251 = arith.addf %250, %11 : vector<8x128xf32>
    %252 = arith.mulf %240, %251 : vector<8x128xf32>
    %253 = arith.addf %249, %252 : vector<8x128xf32>
    %254 = math.tanh %253 : vector<8x128xf32>
    %255 = arith.subf %226, %254 : vector<8x128xf32>
    %256 = arith.mulf %248, %255 : vector<8x128xf32>
    %257 = arith.addf %254, %256 : vector<8x128xf32>
    %c0_70 = arith.constant 0 : index
    %c7_71 = arith.constant 7 : index
    %c0_72 = arith.constant 0 : index
    %258 = vector.load %arg5[%c0_70, %c7_71, %c0_72] : memref<8x8x128xf32, #tpu.memory_space<vmem>>, vector<8x1x128xf32>
    %259 = vector.shape_cast %258 : vector<8x1x128xf32> to vector<8x128xf32>
    %260 = vector.shape_cast %257 : vector<8x128xf32> to vector<8x1x128xf32>
    tpu.vector_store %arg5[%c0_70, %c7_71, %c0_72], %260 {strides = array<i32>} : memref<8x8x128xf32, #tpu.memory_space<vmem>>, vector<8x1x128xf32>,
    %c0_73 = arith.constant 0 : index
    %c0_74 = arith.constant 0 : index
    %261 = vector.load %arg6[%c0_73, %c0_74] : memref<8x128xf32, #tpu.memory_space<vmem>>, vector<8x128xf32>
    tpu.vector_store %arg6[%c0_73, %c0_74], %257 {strides = array<i32>} : memref<8x128xf32, #tpu.memory_space<vmem>>, vector<8x128xf32>,
    return
  }
  func.func @transform_0(%arg0: i32, %arg1: i32) -> (i32, i32, i32) {
    %c0_i32 = arith.constant 0 : i32
    %c0_i32_0 = arith.constant 0 : i32
    return %arg0, %arg1, %c0_i32 : i32, i32, i32
  }
  func.func @transform_3(%arg0: i32, %arg1: i32) -> (i32, i32, i32) {
    %c0_i32 = arith.constant 0 : i32
    %c0_i32_0 = arith.constant 0 : i32
    return %arg0, %arg1, %c0_i32 : i32, i32, i32
  }
}

module attributes {stable_mosaic.version = 11 : i64} {
  func.func @_proj_kernel(%arg0: i32, %arg1: i32, %arg2: memref<128x128xf32, #tpu.memory_space<vmem>>, %arg3: memref<128x384xf32, #tpu.memory_space<vmem>>, %arg4: memref<1x384xf32, #tpu.memory_space<vmem>>, %arg5: memref<128x384xf32, #tpu.memory_space<vmem>>) attributes {dimension_semantics = [#tpu.dimension_semantics<parallel>, #tpu.dimension_semantics<parallel>], iteration_bounds = array<i64: 1, 1>, scalar_prefetch = 0 : i64, scratch_operands = 0 : i64, tpu.core_type = #tpu.core_type<tc>, window_params = [{transform_indices = @transform_0, window_bounds = array<i64: 128, 128>}, {transform_indices = @transform_1, window_bounds = array<i64: 128, 384>}, {transform_indices = @transform_2, window_bounds = array<i64: 1, 384>}, {transform_indices = @transform_3, window_bounds = array<i64: 128, 384>}]} {
    %c0 = arith.constant 0 : index
    %c0_0 = arith.constant 0 : index
    %0 = vector.load %arg3[%c0, %c0_0] : memref<128x384xf32, #tpu.memory_space<vmem>>, vector<128x384xf32>
    %c0_1 = arith.constant 0 : index
    %c0_2 = arith.constant 0 : index
    %1 = vector.load %arg2[%c0_1, %c0_2] : memref<128x128xf32, #tpu.memory_space<vmem>>, vector<128x128xf32>
    %cst = arith.constant dense<0.000000e+00> : vector<128x384xf32>
    %2 = tpu.matmul %1, %0, %cst {dimension_numbers = #tpu.dot_dimension_numbers<[1], [0], [0], [1], [0, 0, 1, 1], [], []>} : vector<128x128xf32>, vector<128x384xf32>, vector<128x384xf32> -> vector<128x384xf32>
    %c0_3 = arith.constant 0 : index
    %c0_4 = arith.constant 0 : index
    %3 = vector.load %arg4[%c0_3, %c0_4] : memref<1x384xf32, #tpu.memory_space<vmem>>, vector<1x384xf32>
    %4 = vector.broadcast %3 : vector<1x384xf32> to vector<128x384xf32>
    %5 = arith.addf %2, %4 : vector<128x384xf32>
    %c0_5 = arith.constant 0 : index
    %c0_6 = arith.constant 0 : index
    %6 = vector.load %arg5[%c0_5, %c0_6] : memref<128x384xf32, #tpu.memory_space<vmem>>, vector<128x384xf32>
    tpu.vector_store %arg5[%c0_5, %c0_6], %5 {strides = array<i32>} : memref<128x384xf32, #tpu.memory_space<vmem>>, vector<128x384xf32>,
    return
  }
  func.func @transform_0(%arg0: i32, %arg1: i32) -> (i32, i32) {
    %c0_i32 = arith.constant 0 : i32
    %c0_i32_0 = arith.constant 0 : i32
    return %arg0, %c0_i32 : i32, i32
  }
  func.func @transform_1(%arg0: i32, %arg1: i32) -> (i32, i32) {
    %c0_i32 = arith.constant 0 : i32
    %c0_i32_0 = arith.constant 0 : i32
    return %c0_i32, %arg1 : i32, i32
  }
  func.func @transform_2(%arg0: i32, %arg1: i32) -> (i32, i32) {
    %c0_i32 = arith.constant 0 : i32
    %c0_i32_0 = arith.constant 0 : i32
    return %c0_i32, %arg1 : i32, i32
  }
  func.func @transform_3(%arg0: i32, %arg1: i32) -> (i32, i32) {
    %c0_i32 = arith.constant 0 : i32
    return %arg0, %arg1 : i32, i32
  }
}

</mosaic_0001>

<bundles_post_ra>
// kernel: temporal_encoder_forward.2
= control target key start
LH: loop header
LB: loop body
LE: loop exit
PB: predicated region body
PF: predicated region fallthrough
CT: control target
= control target key end

     0   :  { %8 = vsyncpa [#allocation3], 0  ;;  %s582_s12 = smov [#allocation2]   ;;  %s874_s0 = inlined_call_operand.vmem [shape: f32[128,128], index: 0, kind: input, shape index: {}]   ;;  %s875_s1 = inlined_call_operand.hbm [shape: f32[128,384], index: 1, kind: input, shape index: {}]   ;;  %s876_s2 = inlined_call_operand.vmem [shape: f32[1,384], index: 2, kind: input, shape index: {}]   ;;  %s877_s3 = inlined_call_operand.vmem [shape: f32[128,384], index: 3, kind: output, shape index: {}]  }
   0x1   :  { %s16_s13 = sshll.u32 %s582_s12, 4  ;;  %s17_s13 = int_to_ptr.vmem [resolvable:$true] %s16_s13 }
   0x2   :  { %s568_s14 = scalar_lea.vmem %s17_s13, 6144  ;;  %p573_p1 = scmp.lt.s32.totalorder %s17_s13, %s17_s13 }
   0x3   :  { %p569_p0 = scmp.ne.s32.totalorder %s17_s13, %s568_s14  ;;  %p574_p2 = scmp.lt.s32.totalorder %s568_s14, %s568_s14 }
   0x5   :  { %p575_p3 = por %p574_p2, %p573_p1 }
   0x7   :  { %p576_p4 = pnand %p575_p3, %p569_p0 }
   0x9   :  { %579 = shalt.err (!%p576_p4)
}
   0xa   :  { %s583_s15 = smov 384   ;;  %s584_s16 = smov 24  }
   0xb   :  { %22 = dma.hbm_to_vmem [thread:$0]  %s875_s1, 6144, %s17_s13, [#allocation3], %s583_s15, %s583_s15, %s584_s16  }
   0xc   :  { %580 = dma.done.wait [#allocation3], 6144  }
   0xd   :  { %581 = vsyncadd [#allocation3], 4294961152  ;;  %v585_v0 = vmov 0.0   ;;  %v74_v1 = vld [vmem:[#allocation2 + $0x170] sm:$0xff]  ;;  %v73_v2 = vld [vmem:[#allocation2 + $0x168] sm:$0xff] }
   0xe   :  { %173 = vmatprep.mubr.f32.mxu0 %v585_v0  ;;  %v71_v3 = vld [vmem:[#allocation2 + $0x158] sm:$0xff]  ;;  %109 = vmatprep.subr.mxu0 %v74_v1  ;;  %v70_v4 = vld [vmem:[#allocation2 + $0x150] sm:$0xff]  ;;  %v68_v5 = vld [vmem:[#allocation2 + $0x140] sm:$0xff] }
   0xf   :  { %110 = vmatpush1.msra.mxu0 %v73_v2  ;;  %v67_v6 = vld [vmem:[#allocation2 + $0x138] sm:$0xff]  ;;  %v65_v7 = vld [vmem:[#allocation2 + $0x128] sm:$0xff]  ;;  %v64_v8 = vld [vmem:[#allocation2 + $0x120] sm:$0xff]  ;;  %v94_v2 = vlaneseq }
  0x10   :  { %111 = vmatprep.subr.mxu0 %v71_v3  ;;  %v62_v9 = vld [vmem:[#allocation2 + $0x110] sm:$0xff]  ;;  %v61_v10 = vld [vmem:[#allocation2 + $0x108] sm:$0xff]  ;;  %v59_v11 = vld [vmem:[#allocation2 + $0xf8] sm:$0xff] }
  0x11   :  { %112 = vmatpush1.msra.mxu0 %v70_v4  ;;  %v58_v12 = vld [vmem:[#allocation2 + $0xf0] sm:$0xff]  ;;  %v56_v13 = vld [vmem:[#allocation2 + $0xe0] sm:$0xff]  ;;  %v75_v14 = vld [vmem:[#allocation2 + $0x178] sm:$0xff]  ;;  %v95_v3 = vshrl.u32 %v94_v2, 7 }
  0x12   :  { %113 = vmatprep.subr.mxu0 %v68_v5  ;;  %v55_v15 = vld [vmem:[#allocation2 + $0xd8] sm:$0xff]  ;;  %500 = vmatprep.subr.mxu1 %v75_v14  ;;  %v72_v16 = vld [vmem:[#allocation2 + $0x160] sm:$0xff]  ;;  %v53_v17 = vld [vmem:[#allocation2 + $0xc8] sm:$0xff] }
  0x13   :  { %114 = vmatpush1.msra.mxu0 %v67_v6  ;;  %501 = vmatpush3.msra.mxu1 %v75_v14  ;;  %v69_v18 = vld [vmem:[#allocation2 + $0x148] sm:$0xff]  ;;  %v52_v19 = vld [vmem:[#allocation2 + $0xc0] sm:$0xff]  ;;  %v50_v20 = vld [vmem:[#allocation2 + $0xb0] sm:$0xff]  ;;  %v96_v4 = vsub.s32 0, %v95_v3  ;;  %v100_v6 = vsub.s32 1, %v95_v3 }
  0x14   :  { %115 = vmatprep.subr.mxu0 %v65_v7  ;;  %502 = vmatprep.subr.mxu1 %v72_v16  ;;  %v66_v21 = vld [vmem:[#allocation2 + $0x130] sm:$0xff]  ;;  %v49_v22 = vld [vmem:[#allocation2 + $0xa8] sm:$0xff]  ;;  %v47_v23 = vld [vmem:[#allocation2 + $0x98] sm:$0xff] }
  0x15   :  { %116 = vmatpush1.msra.mxu0 %v64_v8  ;;  %503 = vmatpush3.msra.mxu1 %v72_v16  ;;  %v63_v24 = vld [vmem:[#allocation2 + $0x118] sm:$0xff]  ;;  %v46_v25 = vld [vmem:[#allocation2 + $0x90] sm:$0xff]  ;;  %v44_v26 = vld [vmem:[#allocation2 + $0x80] sm:$0xff] }
  0x16   :  { %117 = vmatprep.subr.mxu0 %v62_v9  ;;  %504 = vmatprep.subr.mxu1 %v69_v18  ;;  %v60_v27 = vld [vmem:[#allocation2 + $0x100] sm:$0xff]  ;;  %v43_v28 = vld [vmem:[#allocation2 + $0x78] sm:$0xff]  ;;  %v41_v29 = vld [vmem:[#allocation2 + $0x68] sm:$0xff] }
  0x17   :  { %118 = vmatpush1.msra.mxu0 %v61_v10  ;;  %505 = vmatpush3.msra.mxu1 %v69_v18  ;;  %v57_v30 = vld [vmem:[#allocation2 + $0xe8] sm:$0xff]  ;;  %v40_v31 = vld [vmem:[#allocation2 + $0x60] sm:$0xff]  ;;  %v38_v32 = vld [vmem:[#allocation2 + $0x50] sm:$0xff] }
  0x18   :  { %119 = vmatprep.subr.mxu0 %v59_v11  ;;  %506 = vmatprep.subr.mxu1 %v66_v21  ;;  %v54_v33 = vld [vmem:[#allocation2 + $0xd0] sm:$0xff]  ;;  %v37_v34 = vld [vmem:[#allocation2 + $0x48] sm:$0xff]  ;;  %v35_v35 = vld [vmem:[#allocation2 + $0x38] sm:$0xff] }
  0x19   :  { %120 = vmatpush1.msra.mxu0 %v58_v12  ;;  %507 = vmatpush3.msra.mxu1 %v66_v21  ;;  %v51_v36 = vld [vmem:[#allocation2 + $0xb8] sm:$0xff]  ;;  %v34_v37 = vld [vmem:[#allocation2 + $0x30] sm:$0xff]  ;;  %v32_v38 = vld [vmem:[#allocation2 + $0x20] sm:$0xff]  ;;  %v104_v12 = vsub.s32 2, %v95_v3 }
  0x1a   :  { %121 = vmatprep.subr.mxu0 %v56_v13  ;;  %508 = vmatprep.subr.mxu1 %v63_v24  ;;  %v48_v39 = vld [vmem:[#allocation2 + $0xa0] sm:$0xff]  ;;  %v31_v40 = vld [vmem:[#allocation2 + $0x18] sm:$0xff]  ;;  %v29_v41 = vld [vmem:[#allocation2 + $0x8] sm:$0xff] }
  0x1b   :  { %122 = vmatpush1.msra.mxu0 %v55_v15  ;;  %509 = vmatpush3.msra.mxu1 %v63_v24  ;;  %v45_v42 = vld [vmem:[#allocation2 + $0x88] sm:$0xff]  ;;  %v28_v43 = vld [vmem:[#allocation2] sm:$0xff]  ;;  %v42_v45 = vld [vmem:[#allocation2 + $0x70] sm:$0xff] }
  0x1c   :  { %123 = vmatprep.subr.mxu0 %v53_v17  ;;  %510 = vmatprep.subr.mxu1 %v60_v27  ;;  %v76_v44 = vld [vmem:[%s874_s0] sm:$0xff]  ;;  %v39_v46 = vld [vmem:[#allocation2 + $0x58] sm:$0xff]  ;;  %v77_v47 = vld [vmem:[%s874_s0 + $0x8] sm:$0xff] }
  0x1d   :  { %124 = vmatpush1.msra.mxu0 %v52_v19  ;;  %511 = vmatpush3.msra.mxu1 %v60_v27  ;;  %v36_v48 = vld [vmem:[#allocation2 + $0x40] sm:$0xff]  ;;  %v33_v49 = vld [vmem:[#allocation2 + $0x28] sm:$0xff]  ;;  %v78_v50 = vld [vmem:[%s874_s0 + $0x10] sm:$0xff] }
  0x1e   :  { %125 = vmatprep.subr.mxu0 %v50_v20  ;;  %512 = vmatprep.subr.mxu1 %v57_v30  ;;  %v30_v51 = vld [vmem:[#allocation2 + $0x10] sm:$0xff]  ;;  %v79_v52 = vld [vmem:[%s874_s0 + $0x18] sm:$0xff]  ;;  %v80_v53 = vld [vmem:[%s874_s0 + $0x20] sm:$0xff] }
  0x1f   :  { %126 = vmatpush1.msra.mxu0 %v49_v22  ;;  %513 = vmatpush3.msra.mxu1 %v57_v30  ;;  %v81_v54 = vld [vmem:[%s874_s0 + $0x28] sm:$0xff]  ;;  %v82_v55 = vld [vmem:[%s874_s0 + $0x30] sm:$0xff]  ;;  %v83_v56 = vld [vmem:[%s874_s0 + $0x38] sm:$0xff] }
  0x20   :  { %127 = vmatprep.subr.mxu0 %v47_v23  ;;  %514 = vmatprep.subr.mxu1 %v54_v33  ;;  %v84_v57 = vld [vmem:[%s874_s0 + $0x40] sm:$0xff]  ;;  %v85_v58 = vld [vmem:[%s874_s0 + $0x48] sm:$0xff]  ;;  %v86_v59 = vld [vmem:[%s874_s0 + $0x50] sm:$0xff] }
  0x21   :  { %128 = vmatpush1.msra.mxu0 %v46_v25  ;;  %515 = vmatpush3.msra.mxu1 %v54_v33  ;;  %v87_v60 = vld [vmem:[%s874_s0 + $0x58] sm:$0xff]  ;;  %v88_v61 = vld [vmem:[%s874_s0 + $0x60] sm:$0xff]  ;;  %v90_v62 = vld [vmem:[%s874_s0 + $0x70] sm:$0xff] }
  0x22   :  { %129 = vmatprep.subr.mxu0 %v44_v26  ;;  %516 = vmatprep.subr.mxu1 %v51_v36  ;;  %v89_v63 = vld [vmem:[%s874_s0 + $0x68] sm:$0xff]  ;;  %v91_v1 = vld [vmem:[%s874_s0 + $0x78] sm:$0xff]  ;;  %v92_v5 = vld [vmem:[%s876_s2] sm:$0x7] }
  0x23   :  { %130 = vmatpush1.msra.mxu0 %v43_v28  ;;  %517 = vmatpush3.msra.mxu1 %v51_v36  ;;  %v676_v7 = vrot.slane %v92_v5, %v96_v4  ;;  %v678_v8 = vrot.slane %v92_v5, %v100_v6  ;;  %v693_v17 = vrot.slane %v92_v5, %v104_v12 }
  0x24   :  { %131 = vmatprep.subr.mxu0 %v41_v29  ;;  %518 = vmatprep.subr.mxu1 %v48_v39 }
  0x25   :  { %132 = vmatpush1.msra.mxu0 %v40_v31  ;;  %519 = vmatpush3.msra.mxu1 %v48_v39 }
  0x26   :  { %133 = vmatprep.subr.mxu0 %v38_v32  ;;  %520 = vmatprep.subr.mxu1 %v45_v42 }
  0x27   :  { %134 = vmatpush1.msra.mxu0 %v37_v34  ;;  %521 = vmatpush3.msra.mxu1 %v45_v42 }
  0x28   :  { %135 = vmatprep.subr.mxu0 %v35_v35  ;;  %522 = vmatprep.subr.mxu1 %v42_v45 }
  0x29   :  { %136 = vmatpush1.msra.mxu0 %v34_v37  ;;  %523 = vmatpush3.msra.mxu1 %v42_v45 }
  0x2a   :  { %137 = vmatprep.subr.mxu0 %v32_v38  ;;  %524 = vmatprep.subr.mxu1 %v39_v46 }
  0x2b   :  { %138 = vmatpush1.msra.mxu0 %v31_v40  ;;  %532 = vmatprep.mubr.f32.mxu1 %v76_v44 }
  0x2c   :  { %139 = vmatprep.subr.mxu0 %v29_v41  ;;  %525 = vmatpush3.msra.mxu1 %v39_v46 }
  0x2d   :  { %140 = vmatpush1.msra.mxu0 %v28_v43  ;;  %526 = vmatprep.subr.mxu1 %v36_v48 }
  0x2e   :  { %174 = vmatmul.mubr.f32.vlgmr.msra.gmra.mxu0 %v76_v44  ;;  %527 = vmatpush3.msra.mxu1 %v36_v48 }
  0x2f   :  { %179 = vmatprep.mubr.f32.mxu0 %v585_v0  ;;  %528 = vmatprep.subr.mxu1 %v33_v49 }
  0x30   :  { %529 = vmatpush3.msra.mxu1 %v33_v49 }
  0x31   :  { %530 = vmatprep.subr.mxu1 %v30_v51 }
  0x32   :  { %180 = vmatmul.mubr.f32.gmra.mxu0 %v77_v47  ;;  %531 = vmatpush3.msra.mxu1 %v30_v51 }
  0x33   :  { %185 = vmatprep.mubr.f32.mxu0 %v585_v0  ;;  %533 = vmatmul.mubr.f32.vlgmr.msra.gmra.mxu1 %v77_v47 }
  0x34   :  { %535 = vmatprep.mubr.f32.mxu1 %v78_v50 }
  0x36   :  { %186 = vmatmul.mubr.f32.gmra.mxu0 %v78_v50 }
  0x37   :  { %191 = vmatprep.mubr.f32.mxu0 %v585_v0  ;;  %536 = vmatmul.mubr.f32.gmra.mxu1 %v79_v52 }
  0x38   :  { %538 = vmatprep.mubr.f32.mxu1 %v80_v53 }
  0x3a   :  { %192 = vmatmul.mubr.f32.gmra.mxu0 %v79_v52 }
  0x3b   :  { %197 = vmatprep.mubr.f32.mxu0 %v585_v0  ;;  %539 = vmatmul.mubr.f32.gmra.mxu1 %v81_v54 }
  0x3c   :  { %541 = vmatprep.mubr.f32.mxu1 %v82_v55 }
  0x3e   :  { %198 = vmatmul.mubr.f32.gmra.mxu0 %v80_v53 }
  0x3f   :  { %203 = vmatprep.mubr.f32.mxu0 %v585_v0  ;;  %542 = vmatmul.mubr.f32.gmra.mxu1 %v83_v56 }
  0x40   :  { %544 = vmatprep.mubr.f32.mxu1 %v84_v57 }
  0x42   :  { %204 = vmatmul.mubr.f32.gmra.mxu0 %v81_v54 }
  0x43   :  { %209 = vmatprep.mubr.f32.mxu0 %v585_v0  ;;  %545 = vmatmul.mubr.f32.gmra.mxu1 %v85_v58 }
  0x44   :  { %547 = vmatprep.mubr.f32.mxu1 %v86_v59 }
  0x46   :  { %210 = vmatmul.mubr.f32.gmra.mxu0 %v82_v55 }
  0x47   :  { %215 = vmatprep.mubr.f32.mxu0 %v585_v0  ;;  %548 = vmatmul.mubr.f32.gmra.mxu1 %v87_v60 }
  0x48   :  { %550 = vmatprep.mubr.f32.mxu1 %v88_v61 }
  0x4a   :  { %216 = vmatmul.mubr.f32.gmra.mxu0 %v83_v56 }
  0x4b   :  { %221 = vmatprep.mubr.f32.mxu0 %v585_v0  ;;  %551 = vmatmul.mubr.f32.gmra.mxu1 %v89_v63 }
  0x4c   :  { %553 = vmatprep.mubr.f32.mxu1 %v90_v62 }
  0x4e   :  { %222 = vmatmul.mubr.f32.gmra.mxu0 %v84_v57 }
  0x4f   :  { %227 = vmatprep.mubr.f32.mxu0 %v585_v0  ;;  %554 = vmatmul.mubr.f32.gmra.mxu1 %v91_v1 }
  0x52   :  { %228 = vmatmul.mubr.f32.gmra.mxu0 %v85_v58 }
  0x53   :  { %233 = vmatprep.mubr.f32.mxu0 %v585_v0 }
  0x56   :  { %234 = vmatmul.mubr.f32.gmra.mxu0 %v86_v59 }
  0x57   :  { %239 = vmatprep.mubr.f32.mxu0 %v585_v0 }
  0x5a   :  { %240 = vmatmul.mubr.f32.gmra.mxu0 %v87_v60 }
  0x5b   :  { %245 = vmatprep.mubr.f32.mxu0 %v585_v0 }
  0x5e   :  { %246 = vmatmul.mubr.f32.gmra.mxu0 %v88_v61 }
  0x5f   :  { %251 = vmatprep.mubr.f32.mxu0 %v585_v0 }
  0x62   :  { %252 = vmatmul.mubr.f32.gmra.mxu0 %v89_v63 }
  0x63   :  { %257 = vmatprep.mubr.f32.mxu0 %v585_v0 }
  0x66   :  { %258 = vmatmul.mubr.f32.gmra.mxu0 %v90_v62 }
  0x67   :  { %263 = vmatprep.mubr.f32.mxu0 %v585_v0 }
  0x6a   :  { %264 = vmatmul.mubr.f32.gmra.mxu0 %v91_v1 }
  0xee   :  { %v175_v9 = vpop.f32.mrf.mxu0 }
  0xef   :  { %v176_v10 = vadd.f32 %v175_v9, %v676_v7 }
  0xf0   :  { %v177_v11 = vpop.f32.mrf.mxu0 }
  0xf1   :  { %415 = vst [vmem:[%s877_s3] sm:$0xff] %v176_v10  ;;  %v178_v0 = vadd.f32 %v177_v11, %v678_v8 }
  0xf2   :  { %v181_v13 = vpop.f32.mrf.mxu0 }
  0xf3   :  { %416 = vst [vmem:[%s877_s3 + $0x8] sm:$0xff] %v178_v0  ;;  %v182_v14 = vadd.f32 %v181_v13, %v676_v7  ;;  %v534_v21 = vpop.f32.mrf.mxu1 }
  0xf4   :  { %v183_v15 = vpop.f32.mrf.mxu0  ;;  %v342_v23 = vadd.f32 %v534_v21, %v693_v17 }
  0xf5   :  { %418 = vst [vmem:[%s877_s3 + $0x18] sm:$0xff] %v182_v14  ;;  %v184_v16 = vadd.f32 %v183_v15, %v678_v8  ;;  %v336_v25 = vpop.f32.mrf.mxu1 }
  0xf6   :  { %v187_v18 = vpop.f32.mrf.mxu0  ;;  %420 = vst [vmem:[%s877_s3 + $0x28] sm:$0xff] %v342_v23  ;;  %v337_v27 = vadd.f32 %v336_v25, %v693_v17 }
  0xf7   :  { %419 = vst [vmem:[%s877_s3 + $0x20] sm:$0xff] %v184_v16  ;;  %v188_v19 = vadd.f32 %v187_v18, %v676_v7  ;;  %v537_v29 = vpop.f32.mrf.mxu1 }
  0xf8   :  { %v189_v20 = vpop.f32.mrf.mxu0  ;;  %417 = vst [vmem:[%s877_s3 + $0x10] sm:$0xff] %v337_v27  ;;  %v352_v31 = vadd.f32 %v537_v29, %v693_v17 }
  0xf9   :  { %421 = vst [vmem:[%s877_s3 + $0x30] sm:$0xff] %v188_v19  ;;  %v190_v22 = vadd.f32 %v189_v20, %v678_v8  ;;  %v346_v33 = vpop.f32.mrf.mxu1 }
  0xfa   :  { %v193_v24 = vpop.f32.mrf.mxu0  ;;  %426 = vst [vmem:[%s877_s3 + $0x58] sm:$0xff] %v352_v31  ;;  %v347_v35 = vadd.f32 %v346_v33, %v693_v17 }
  0xfb   :  { %422 = vst [vmem:[%s877_s3 + $0x38] sm:$0xff] %v190_v22  ;;  %v194_v26 = vadd.f32 %v193_v24, %v676_v7  ;;  %v540_v37 = vpop.f32.mrf.mxu1 }
  0xfc   :  { %v195_v28 = vpop.f32.mrf.mxu0  ;;  %423 = vst [vmem:[%s877_s3 + $0x40] sm:$0xff] %v347_v35  ;;  %v362_v39 = vadd.f32 %v540_v37, %v693_v17 }
  0xfd   :  { %424 = vst [vmem:[%s877_s3 + $0x48] sm:$0xff] %v194_v26  ;;  %v196_v30 = vadd.f32 %v195_v28, %v678_v8  ;;  %v356_v41 = vpop.f32.mrf.mxu1 }
  0xfe   :  { %v199_v32 = vpop.f32.mrf.mxu0  ;;  %432 = vst [vmem:[%s877_s3 + $0x88] sm:$0xff] %v362_v39  ;;  %v357_v43 = vadd.f32 %v356_v41, %v693_v17 }
  0xff   :  { %425 = vst [vmem:[%s877_s3 + $0x50] sm:$0xff] %v196_v30  ;;  %v200_v34 = vadd.f32 %v199_v32, %v676_v7  ;;  %v543_v45 = vpop.f32.mrf.mxu1 }
 0x100   :  { %v201_v36 = vpop.f32.mrf.mxu0  ;;  %429 = vst [vmem:[%s877_s3 + $0x70] sm:$0xff] %v357_v43  ;;  %v372_v47 = vadd.f32 %v543_v45, %v693_v17 }
 0x101   :  { %427 = vst [vmem:[%s877_s3 + $0x60] sm:$0xff] %v200_v34  ;;  %v202_v38 = vadd.f32 %v201_v36, %v678_v8  ;;  %v366_v49 = vpop.f32.mrf.mxu1 }
 0x102   :  { %v205_v40 = vpop.f32.mrf.mxu0  ;;  %438 = vst [vmem:[%s877_s3 + $0xb8] sm:$0xff] %v372_v47  ;;  %v367_v51 = vadd.f32 %v366_v49, %v693_v17 }
 0x103   :  { %428 = vst [vmem:[%s877_s3 + $0x68] sm:$0xff] %v202_v38  ;;  %v206_v42 = vadd.f32 %v205_v40, %v676_v7  ;;  %v546_v53 = vpop.f32.mrf.mxu1 }
 0x104   :  { %v207_v44 = vpop.f32.mrf.mxu0  ;;  %435 = vst [vmem:[%s877_s3 + $0xa0] sm:$0xff] %v367_v51  ;;  %v382_v55 = vadd.f32 %v546_v53, %v693_v17 }
 0x105   :  { %430 = vst [vmem:[%s877_s3 + $0x78] sm:$0xff] %v206_v42  ;;  %v208_v46 = vadd.f32 %v207_v44, %v678_v8  ;;  %v376_v57 = vpop.f32.mrf.mxu1 }
 0x106   :  { %v211_v48 = vpop.f32.mrf.mxu0  ;;  %444 = vst [vmem:[%s877_s3 + $0xe8] sm:$0xff] %v382_v55  ;;  %v377_v59 = vadd.f32 %v376_v57, %v693_v17 }
 0x107   :  { %431 = vst [vmem:[%s877_s3 + $0x80] sm:$0xff] %v208_v46  ;;  %v212_v50 = vadd.f32 %v211_v48, %v676_v7  ;;  %v549_v61 = vpop.f32.mrf.mxu1 }
 0x108   :  { %v213_v52 = vpop.f32.mrf.mxu0  ;;  %441 = vst [vmem:[%s877_s3 + $0xd0] sm:$0xff] %v377_v59  ;;  %v392_v63 = vadd.f32 %v549_v61, %v693_v17 }
 0x109   :  { %433 = vst [vmem:[%s877_s3 + $0x90] sm:$0xff] %v212_v50  ;;  %v214_v54 = vadd.f32 %v213_v52, %v678_v8  ;;  %v386_v2 = vpop.f32.mrf.mxu1 }
 0x10a   :  { %v217_v56 = vpop.f32.mrf.mxu0  ;;  %450 = vst [vmem:[%s877_s3 + $0x118] sm:$0xff] %v392_v63  ;;  %v387_v4 = vadd.f32 %v386_v2, %v693_v17 }
 0x10b   :  { %434 = vst [vmem:[%s877_s3 + $0x98] sm:$0xff] %v214_v54  ;;  %v218_v58 = vadd.f32 %v217_v56, %v676_v7  ;;  %v552_v6 = vpop.f32.mrf.mxu1 }
 0x10c   :  { %v219_v60 = vpop.f32.mrf.mxu0  ;;  %447 = vst [vmem:[%s877_s3 + $0x100] sm:$0xff] %v387_v4  ;;  %v402_v10 = vadd.f32 %v552_v6, %v693_v17 }
 0x10d   :  { %436 = vst [vmem:[%s877_s3 + $0xa8] sm:$0xff] %v218_v58  ;;  %v220_v62 = vadd.f32 %v219_v60, %v678_v8  ;;  %v396_v0 = vpop.f32.mrf.mxu1 }
 0x10e   :  { %v223_v1 = vpop.f32.mrf.mxu0  ;;  %456 = vst [vmem:[%s877_s3 + $0x148] sm:$0xff] %v402_v10  ;;  %v397_v13 = vadd.f32 %v396_v0, %v693_v17 }
 0x10f   :  { %437 = vst [vmem:[%s877_s3 + $0xb0] sm:$0xff] %v220_v62  ;;  %v224_v3 = vadd.f32 %v223_v1, %v676_v7  ;;  %v555_v15 = vpop.f32.mrf.mxu1 }
 0x110   :  { %v225_v5 = vpop.f32.mrf.mxu0  ;;  %453 = vst [vmem:[%s877_s3 + $0x130] sm:$0xff] %v397_v13  ;;  %v412_v18 = vadd.f32 %v555_v15, %v693_v17 }
 0x111   :  { %439 = vst [vmem:[%s877_s3 + $0xc0] sm:$0xff] %v224_v3  ;;  %v226_v9 = vadd.f32 %v225_v5, %v678_v8  ;;  %v406_v20 = vpop.f32.mrf.mxu1 }
 0x112   :  { %v229_v11 = vpop.f32.mrf.mxu0  ;;  %462 = vst [vmem:[%s877_s3 + $0x178] sm:$0xff] %v412_v18  ;;  %v407_v22 = vadd.f32 %v406_v20, %v693_v17 }
 0x113   :  { %440 = vst [vmem:[%s877_s3 + $0xc8] sm:$0xff] %v226_v9  ;;  %v230_v12 = vadd.f32 %v229_v11, %v676_v7 }
 0x114   :  { %v231_v14 = vpop.f32.mrf.mxu0  ;;  %459 = vst [vmem:[%s877_s3 + $0x160] sm:$0xff] %v407_v22 }
 0x115   :  { %442 = vst [vmem:[%s877_s3 + $0xd8] sm:$0xff] %v230_v12  ;;  %v232_v16 = vadd.f32 %v231_v14, %v678_v8 }
 0x116   :  { %v235_v19 = vpop.f32.mrf.mxu0 }
 0x117   :  { %443 = vst [vmem:[%s877_s3 + $0xe0] sm:$0xff] %v232_v16  ;;  %v236_v21 = vadd.f32 %v235_v19, %v676_v7 }
 0x118   :  { %v237_v23 = vpop.f32.mrf.mxu0 }
 0x119   :  { %445 = vst [vmem:[%s877_s3 + $0xf0] sm:$0xff] %v236_v21  ;;  %v238_v24 = vadd.f32 %v237_v23, %v678_v8 }
 0x11a   :  { %v241_v25 = vpop.f32.mrf.mxu0 }
 0x11b   :  { %446 = vst [vmem:[%s877_s3 + $0xf8] sm:$0xff] %v238_v24  ;;  %v242_v26 = vadd.f32 %v241_v25, %v676_v7 }
 0x11c   :  { %v243_v27 = vpop.f32.mrf.mxu0 }
 0x11d   :  { %448 = vst [vmem:[%s877_s3 + $0x108] sm:$0xff] %v242_v26  ;;  %v244_v17 = vadd.f32 %v243_v27, %v678_v8 }
 0x11e   :  { %v247_v28 = vpop.f32.mrf.mxu0 }
 0x11f   :  { %449 = vst [vmem:[%s877_s3 + $0x110] sm:$0xff] %v244_v17  ;;  %v248_v29 = vadd.f32 %v247_v28, %v676_v7 }
 0x120   :  { %v249_v30 = vpop.f32.mrf.mxu0 }
 0x121   :  { %451 = vst [vmem:[%s877_s3 + $0x120] sm:$0xff] %v248_v29  ;;  %v250_v31 = vadd.f32 %v249_v30, %v678_v8 }
 0x122   :  { %v253_v32 = vpop.f32.mrf.mxu0 }
 0x123   :  { %452 = vst [vmem:[%s877_s3 + $0x128] sm:$0xff] %v250_v31  ;;  %v254_v33 = vadd.f32 %v253_v32, %v676_v7 }
 0x124   :  { %v255_v34 = vpop.f32.mrf.mxu0 }
 0x125   :  { %454 = vst [vmem:[%s877_s3 + $0x138] sm:$0xff] %v254_v33  ;;  %v256_v35 = vadd.f32 %v255_v34, %v678_v8 }
 0x126   :  { %v259_v36 = vpop.f32.mrf.mxu0 }
 0x127   :  { %455 = vst [vmem:[%s877_s3 + $0x140] sm:$0xff] %v256_v35  ;;  %v260_v37 = vadd.f32 %v259_v36, %v676_v7 }
 0x128   :  { %v261_v38 = vpop.f32.mrf.mxu0 }
 0x129   :  { %457 = vst [vmem:[%s877_s3 + $0x150] sm:$0xff] %v260_v37  ;;  %v262_v39 = vadd.f32 %v261_v38, %v678_v8 }
 0x12a   :  { %v265_v40 = vpop.f32.mrf.mxu0 }
 0x12b   :  { %458 = vst [vmem:[%s877_s3 + $0x158] sm:$0xff] %v262_v39  ;;  %v266_v41 = vadd.f32 %v265_v40, %v676_v7 }
 0x12c   :  { %v267_v42 = vpop.f32.mrf.mxu0 }
 0x12d   :  { %460 = vst [vmem:[%s877_s3 + $0x168] sm:$0xff] %v266_v41  ;;  %v268_v43 = vadd.f32 %v267_v42, %v678_v8 }
 0x12f   :  { %461 = vst [vmem:[%s877_s3 + $0x170] sm:$0xff] %v268_v43 }
 0x130   :  { %467 = vsyncpa [#allocation3], 1 }

// kernel: temporal_encoder_forward.3
= control target key start
LH: loop header
LB: loop body
LE: loop exit
PB: predicated region body
PF: predicated region fallthrough
CT: control target
= control target key end

     0   :  { %s7050_s12 = smov 0   ;;  %s7052_s13 = smov 0   ;;  %s9120_s0 = inlined_call_operand.vmem [shape: f32[8,16,384], index: 0, kind: input, shape index: {}]   ;;  %s9121_s1 = inlined_call_operand.vmem [shape: f32[128,384], index: 1, kind: input, shape index: {}]   ;;  %s9122_s2 = inlined_call_operand.vmem [shape: f32[1,128], index: 2, kind: input, shape index: {}]   ;;  %s9123_s3 = inlined_call_operand.vmem [shape: f32[8,16,128], index: 3, kind: output, shape index: {}]  }
   0x1   :  { %s7054_s14 = smov 0   ;;  %s7056_s15 = smov 0  }
   0x2   :  { %s7058_s16 = smov 0  }
   0x3 LB: > { %s22_s17 = sadd.s32 1, %s7020_s15  ;;  %s5524_s18 = sadd.s32 4294967295, %s7024_s16   ;;  %s7024_s16 = sphi %s7058_s16, %s13_s16   ;;  %s7020_s15 = sphi %s7056_s15, %s9380_s15   ;;  %s7016_s14 = sphi %s7054_s14, %s9379_s14   ;;  %s7012_s13 = sphi %s7052_s13, %s9378_s13   ;;  %s7008_s12 = sphi %s7050_s12, %s9377_s12  }
   0x4   : > { %p23_p0 = scmp.ge.s32.totalorder %s22_s17, 2  ;;  %p41_p1 = scmp.ne.s32.totalorder %s7012_s13, %s7008_s12 }
   0x5   : > { %p42_p2 = scmp.eq.s32.totalorder %s7024_s16, 0  ;;  %p73_p4 = scmp.eq.s32.totalorder %s5524_s18, 1 }
   0x6   : > { %s9382_s17 = smov (%p23_p0, %s22_s17), 0  ;;  %s34_s20 = sadd.s32 1, %s7012_s13 }
   0x7   : > { %p43_p3 = por %p42_p2, %p41_p1  ;;  %s30_s19 = ssub.s32 %s7020_s15, %s9382_s17 }
   0x8   : > { %p32_p5 = scmp.eq.s32.totalorder %s30_s19, 0  ;;  %p7085_p6 = por %p73_p4, %p41_p1 }
   0x9   : > { %p5527_p7 = scmp.ge.s32.totalorder %s7024_s16, 2 }
   0xa   : > { %s7090_s22 = scalar_select %p32_p5, %s7012_s13, %s34_s20  }
   0xb   : > { %95 = sbr.rel (%p5527_p7) target bundleno = 33 (0x21), region = 16 }
  0x10   : > { %98 = sbr.rel (!%p43_p3) target bundleno = 33 (0x21), region = 20  ;;  %s100_s23 = sand.u32 (%p43_p3), 1, %s7012_s13  }
  0x11   : > { %s6149_s24 = smul.u32 (%p43_p3), 24, %s7020_s15 }
  0x12   : > { %s6148_s25 = smul.u32 (%p43_p3), 192, %s100_s23 }
  0x13   : > { %s7098_s28 = scalar_lea.vmem (%p43_p3), %s9120_s0, %s6149_s24 }
  0x14   : > { %v121_v0 = vld [vmem:[%s7098_s28] sm:$0xff] (%p43_p3)  ;;  %v123_v1 = vld [vmem:[%s7098_s28 + $0x8] sm:$0xff] (%p43_p3)  ;;  %v125_v2 = vld [vmem:[%s7098_s28 + $0x10] sm:$0xff] (%p43_p3)  ;;  %s7103_s29 = scalar_lea.vmem (%p43_p3), [#allocation6], %s6148_s25 }
  0x15   : > { %122 = vst [vmem:[%s7103_s29] sm:$0xff] %v121_v0  ;;  %124 = vst [vmem:[%s7103_s29 + $0x8] sm:$0xff] %v123_v1  ;;  %v127_v3 = vld [vmem:[%s7098_s28 + $0x30] sm:$0xff]  ;;  %v129_v4 = vld [vmem:[%s7098_s28 + $0x38] sm:$0xff] }
  0x16   : > { %126 = vst [vmem:[%s7103_s29 + $0x10] sm:$0xff] %v125_v2  ;;  %v131_v5 = vld [vmem:[%s7098_s28 + $0x40] sm:$0xff]  ;;  %128 = vst [vmem:[%s7103_s29 + $0x18] sm:$0xff] %v127_v3  ;;  %v135_v7 = vld [vmem:[%s7098_s28 + $0x68] sm:$0xff] }
  0x17   : > { %130 = vst [vmem:[%s7103_s29 + $0x20] sm:$0xff] %v129_v4  ;;  %132 = vst [vmem:[%s7103_s29 + $0x28] sm:$0xff] %v131_v5  ;;  %v133_v6 = vld [vmem:[%s7098_s28 + $0x60] sm:$0xff]  ;;  %v137_v8 = vld [vmem:[%s7098_s28 + $0x70] sm:$0xff] }
  0x18   : > { %134 = vst [vmem:[%s7103_s29 + $0x30] sm:$0xff] %v133_v6  ;;  %136 = vst [vmem:[%s7103_s29 + $0x38] sm:$0xff] %v135_v7  ;;  %v139_v9 = vld [vmem:[%s7098_s28 + $0x90] sm:$0xff]  ;;  %v141_v10 = vld [vmem:[%s7098_s28 + $0x98] sm:$0xff] }
  0x19   : > { %138 = vst [vmem:[%s7103_s29 + $0x40] sm:$0xff] %v137_v8  ;;  %v143_v11 = vld [vmem:[%s7098_s28 + $0xa0] sm:$0xff]  ;;  %140 = vst [vmem:[%s7103_s29 + $0x48] sm:$0xff] %v139_v9  ;;  %v147_v13 = vld [vmem:[%s7098_s28 + $0xc8] sm:$0xff] }
  0x1a   : > { %142 = vst [vmem:[%s7103_s29 + $0x50] sm:$0xff] %v141_v10  ;;  %144 = vst [vmem:[%s7103_s29 + $0x58] sm:$0xff] %v143_v11  ;;  %v145_v12 = vld [vmem:[%s7098_s28 + $0xc0] sm:$0xff]  ;;  %v149_v14 = vld [vmem:[%s7098_s28 + $0xd0] sm:$0xff] }
  0x1b   : > { %146 = vst [vmem:[%s7103_s29 + $0x60] sm:$0xff] %v145_v12  ;;  %148 = vst [vmem:[%s7103_s29 + $0x68] sm:$0xff] %v147_v13  ;;  %v151_v15 = vld [vmem:[%s7098_s28 + $0xf0] sm:$0xff]  ;;  %v153_v16 = vld [vmem:[%s7098_s28 + $0xf8] sm:$0xff] }
  0x1c   : > { %150 = vst [vmem:[%s7103_s29 + $0x70] sm:$0xff] %v149_v14  ;;  %v155_v17 = vld [vmem:[%s7098_s28 + $0x100] sm:$0xff]  ;;  %152 = vst [vmem:[%s7103_s29 + $0x78] sm:$0xff] %v151_v15  ;;  %v159_v19 = vld [vmem:[%s7098_s28 + $0x128] sm:$0xff] }
  0x1d   : > { %154 = vst [vmem:[%s7103_s29 + $0x80] sm:$0xff] %v153_v16  ;;  %156 = vst [vmem:[%s7103_s29 + $0x88] sm:$0xff] %v155_v17  ;;  %v157_v18 = vld [vmem:[%s7098_s28 + $0x120] sm:$0xff]  ;;  %v161_v20 = vld [vmem:[%s7098_s28 + $0x130] sm:$0xff] }
  0x1e   : > { %158 = vst [vmem:[%s7103_s29 + $0x90] sm:$0xff] %v157_v18  ;;  %160 = vst [vmem:[%s7103_s29 + $0x98] sm:$0xff] %v159_v19  ;;  %v163_v21 = vld [vmem:[%s7098_s28 + $0x150] sm:$0xff]  ;;  %v165_v22 = vld [vmem:[%s7098_s28 + $0x158] sm:$0xff] }
  0x1f   : > { %162 = vst [vmem:[%s7103_s29 + $0xa0] sm:$0xff] %v161_v20  ;;  %v167_v23 = vld [vmem:[%s7098_s28 + $0x160] sm:$0xff]  ;;  %164 = vst [vmem:[%s7103_s29 + $0xa8] sm:$0xff] %v163_v21 }
  0x20   : > { %166 = vst [vmem:[%s7103_s29 + $0xb0] sm:$0xff] %v165_v22  ;;  %168 = vst [vmem:[%s7103_s29 + $0xb8] sm:$0xff] %v167_v23 }
  0x21 PF: > { %p5529_p8 = scmp.ge.s32.totalorder %s7024_s16, 1  ;;  %p173_p9 = scmp.lt.s32.totalorder %s7024_s16, 3 }
  0x23   : > { %p174_p10 = pnand %p5529_p8, %p173_p9 }
  0x25   : > { %177 = sbr.rel (%p174_p10) target bundleno = 2337 (0x921), region = 43 }
  0x2a   : > { %s180_s30 = sand.u32 1, %s7008_s12   ;;  %p201_p11 = scmp.eq.s32.totalorder %s7016_s14, 0 }
  0x2b   : > { %s6150_s4 = smul.u32 192, %s180_s30  ;;  %s5530_s5 = sshll.u32 %s180_s30, 6  ;;  %v239_v24 = vld [vmem:[%s9121_s1] sm:$0xff] (%p201_p11)  ;;  %v241_v25 = vld [vmem:[%s9121_s1 + $0x8] sm:$0xff] (%p201_p11)  ;;  %v243_v26 = vld [vmem:[%s9121_s1 + $0x10] sm:$0xff] (%p201_p11) }
  0x2c   : > { %s7156_s7 = scalar_lea.vmem [#allocation7], %s5530_s5  ;;  %205 = sbr.rel (!%p201_p11) target bundleno = 75 (0x4b), region = 51  ;;  %240 = vst [vmem:[#allocation3 + $0xb0] sm:$0xff] (%p201_p11), %v239_v24  ;;  %242 = vst [vmem:[#allocation3 + $0xd0] sm:$0xff] (%p201_p11), %v241_v25  ;;  %v245_v27 = vld [vmem:[%s9121_s1 + $0x18] sm:$0xff] (%p201_p11)  ;;  %v247_v28 = vld [vmem:[%s9121_s1 + $0x20] sm:$0xff] (%p201_p11) }
  0x2d   : > { %s7154_s6 = scalar_lea.vmem [#allocation6], %s6150_s4  ;;  %244 = vst [vmem:[#allocation3 + $0x10] sm:$0xff] (%p201_p11), %v243_v26  ;;  %v249_v29 = vld [vmem:[%s9121_s1 + $0x28] sm:$0xff] (%p201_p11)  ;;  %246 = vst [vmem:[#allocation3 + $0x48] sm:$0xff] (%p201_p11), %v245_v27  ;;  %v251_v30 = vld [vmem:[%s9121_s1 + $0x30] sm:$0xff] (%p201_p11) }
  0x2e   : > { %248 = vst [vmem:[#allocation3 + $0x160] sm:$0xff] (%p201_p11), %v247_v28  ;;  %250 = vst [vmem:[#allocation3 + $0x128] sm:$0xff] (%p201_p11), %v249_v29  ;;  %v253_v31 = vld [vmem:[%s9121_s1 + $0x38] sm:$0xff] (%p201_p11)  ;;  %v255_v32 = vld [vmem:[%s9121_s1 + $0x40] sm:$0xff] (%p201_p11) }
  0x2f   : > { %252 = vst [vmem:[#allocation3 + $0x40] sm:$0xff] (%p201_p11), %v251_v30  ;;  %254 = vst [vmem:[#allocation3 + $0x178] sm:$0xff] (%p201_p11), %v253_v31  ;;  %v257_v33 = vld [vmem:[%s9121_s1 + $0x48] sm:$0xff] (%p201_p11)  ;;  %v259_v34 = vld [vmem:[%s9121_s1 + $0x50] sm:$0xff] (%p201_p11) }
  0x30   : > { %256 = vst [vmem:[#allocation3 + $0x108] sm:$0xff] (%p201_p11), %v255_v32  ;;  %v261_v35 = vld [vmem:[%s9121_s1 + $0x58] sm:$0xff] (%p201_p11)  ;;  %258 = vst [vmem:[#allocation3 + $0x110] sm:$0xff] (%p201_p11), %v257_v33  ;;  %v263_v36 = vld [vmem:[%s9121_s1 + $0x60] sm:$0xff] (%p201_p11) }
  0x31   : > { %260 = vst [vmem:[#allocation3 + $0x90] sm:$0xff] %v259_v34  ;;  %262 = vst [vmem:[#allocation3 + $0x118] sm:$0xff] %v261_v35  ;;  %v265_v37 = vld [vmem:[%s9121_s1 + $0x68] sm:$0xff]  ;;  %v267_v38 = vld [vmem:[%s9121_s1 + $0x70] sm:$0xff] }
  0x32   : > { %264 = vst [vmem:[#allocation3 + $0x148] sm:$0xff] %v263_v36  ;;  %266 = vst [vmem:[#allocation3 + $0x100] sm:$0xff] %v265_v37  ;;  %v269_v39 = vld [vmem:[%s9121_s1 + $0x78] sm:$0xff]  ;;  %v271_v40 = vld [vmem:[%s9121_s1 + $0x80] sm:$0xff] }
  0x33   : > { %268 = vst [vmem:[#allocation3 + $0x58] sm:$0xff] %v267_v38  ;;  %v273_v41 = vld [vmem:[%s9121_s1 + $0x88] sm:$0xff]  ;;  %270 = vst [vmem:[#allocation3 + $0xd8] sm:$0xff] %v269_v39  ;;  %v275_v42 = vld [vmem:[%s9121_s1 + $0x90] sm:$0xff] }
  0x34   : > { %272 = vst [vmem:[#allocation3 + $0x80] sm:$0xff] %v271_v40  ;;  %274 = vst [vmem:[#allocation3 + $0x130] sm:$0xff] %v273_v41  ;;  %v277_v43 = vld [vmem:[%s9121_s1 + $0x98] sm:$0xff]  ;;  %v279_v44 = vld [vmem:[%s9121_s1 + $0xa0] sm:$0xff] }
  0x35   : > { %276 = vst [vmem:[#allocation3 + $0x138] sm:$0xff] %v275_v42  ;;  %278 = vst [vmem:[#allocation3 + $0x120] sm:$0xff] %v277_v43  ;;  %v281_v45 = vld [vmem:[%s9121_s1 + $0xa8] sm:$0xff]  ;;  %v283_v46 = vld [vmem:[%s9121_s1 + $0xb0] sm:$0xff] }
  0x36   : > { %280 = vst [vmem:[#allocation3 + $0xe0] sm:$0xff] %v279_v44  ;;  %v285_v47 = vld [vmem:[%s9121_s1 + $0xb8] sm:$0xff]  ;;  %282 = vst [vmem:[#allocation3 + $0xa8] sm:$0xff] %v281_v45  ;;  %v287_v48 = vld [vmem:[%s9121_s1 + $0xc0] sm:$0xff] }
  0x37   : > { %284 = vst [vmem:[#allocation3 + $0xb8] sm:$0xff] %v283_v46  ;;  %286 = vst [vmem:[#allocation3 + $0x168] sm:$0xff] %v285_v47  ;;  %v289_v49 = vld [vmem:[%s9121_s1 + $0xc8] sm:$0xff]  ;;  %v291_v50 = vld [vmem:[%s9121_s1 + $0xd0] sm:$0xff] }
  0x38   : > { %288 = vst [vmem:[#allocation3 + $0xe8] sm:$0xff] %v287_v48  ;;  %290 = vst [vmem:[#allocation3 + $0xf8] sm:$0xff] %v289_v49  ;;  %v293_v51 = vld [vmem:[%s9121_s1 + $0xd8] sm:$0xff]  ;;  %v295_v52 = vld [vmem:[%s9121_s1 + $0xe0] sm:$0xff] }
  0x39   : > { %292 = vst [vmem:[#allocation3 + $0x20] sm:$0xff] %v291_v50  ;;  %v297_v53 = vld [vmem:[%s9121_s1 + $0xe8] sm:$0xff]  ;;  %294 = vst [vmem:[#allocation3 + $0x88] sm:$0xff] %v293_v51  ;;  %v299_v54 = vld [vmem:[%s9121_s1 + $0xf0] sm:$0xff] }
  0x3a   : > { %296 = vst [vmem:[#allocation3 + $0xa0] sm:$0xff] %v295_v52  ;;  %298 = vst [vmem:[#allocation3 + $0x170] sm:$0xff] %v297_v53  ;;  %v301_v55 = vld [vmem:[%s9121_s1 + $0xf8] sm:$0xff]  ;;  %v303_v56 = vld [vmem:[%s9121_s1 + $0x100] sm:$0xff] }
  0x3b   : > { %300 = vst [vmem:[#allocation3 + $0xf0] sm:$0xff] %v299_v54  ;;  %302 = vst [vmem:[#allocation3 + $0x140] sm:$0xff] %v301_v55  ;;  %v305_v57 = vld [vmem:[%s9121_s1 + $0x108] sm:$0xff]  ;;  %v307_v58 = vld [vmem:[%s9121_s1 + $0x110] sm:$0xff] }
  0x3c   : > { %304 = vst [vmem:[#allocation3 + $0x60] sm:$0xff] %v303_v56  ;;  %v309_v59 = vld [vmem:[%s9121_s1 + $0x118] sm:$0xff]  ;;  %306 = vst [vmem:[#allocation3 + $0xc8] sm:$0xff] %v305_v57  ;;  %v311_v60 = vld [vmem:[%s9121_s1 + $0x120] sm:$0xff] }
  0x3d   : > { %308 = vst [vmem:[#allocation3 + $0x28] sm:$0xff] %v307_v58  ;;  %310 = vst [vmem:[#allocation3 + $0x38] sm:$0xff] %v309_v59  ;;  %v313_v61 = vld [vmem:[%s9121_s1 + $0x128] sm:$0xff]  ;;  %v315_v62 = vld [vmem:[%s9121_s1 + $0x130] sm:$0xff] }
  0x3e   : > { %312 = vst [vmem:[#allocation3 + $0xc0] sm:$0xff] %v311_v60  ;;  %314 = vst [vmem:[#allocation3 + $0x18] sm:$0xff] %v313_v61  ;;  %v317_v63 = vld [vmem:[%s9121_s1 + $0x138] sm:$0xff]  ;;  %v319_v0 = vld [vmem:[%s9121_s1 + $0x140] sm:$0xff] }
  0x3f   : > { %316 = vst [vmem:[#allocation3 + $0x98] sm:$0xff] %v315_v62  ;;  %v321_v1 = vld [vmem:[%s9121_s1 + $0x148] sm:$0xff]  ;;  %318 = vst [vmem:[#allocation3 + $0x8] sm:$0xff] %v317_v63  ;;  %v323_v2 = vld [vmem:[%s9121_s1 + $0x150] sm:$0xff] }
  0x40   : > { %320 = vst [vmem:[#allocation3] sm:$0xff] %v319_v0  ;;  %322 = vst [vmem:[#allocation3 + $0x78] sm:$0xff] %v321_v1  ;;  %v325_v3 = vld [vmem:[%s9121_s1 + $0x158] sm:$0xff]  ;;  %v327_v4 = vld [vmem:[%s9121_s1 + $0x160] sm:$0xff] }
  0x41   : > { %324 = vst [vmem:[#allocation3 + $0x50] sm:$0xff] %v323_v2  ;;  %326 = vst [vmem:[#allocation3 + $0x68] sm:$0xff] %v325_v3  ;;  %v329_v5 = vld [vmem:[%s9121_s1 + $0x168] sm:$0xff]  ;;  %v331_v6 = vld [vmem:[%s9121_s1 + $0x170] sm:$0xff] }
  0x42   : > { %328 = vst [vmem:[#allocation3 + $0x70] sm:$0xff] %v327_v4  ;;  %v333_v7 = vld [vmem:[%s9121_s1 + $0x178] sm:$0xff]  ;;  %330 = vst [vmem:[#allocation3 + $0x30] sm:$0xff] %v329_v5 }
  0x43   : > { %332 = vst [vmem:[#allocation3 + $0x158] sm:$0xff] %v331_v6  ;;  %334 = vst [vmem:[#allocation3 + $0x150] sm:$0xff] %v333_v7 }
  0x44   : > { %342 = vsyncadd [#allocation5], 6144  ;;  %v362_v8 = vld [vmem:[%s9122_s2] sm:$0x1] }
  0x45   : > { %363 = vst [vmem:[#allocation4] sm:$0x1] %v362_v8 }
  0x46   : > { %389 = vsyncadd [#allocation5 + $0x1], 16 }
  0x47   : > { %7002 = dma.done.wait [#allocation5], 6144 }
  0x48   : > { %7003 = vsyncadd [#allocation5], 4294961152 }
  0x49   : > { %7004 = dma.done.wait [#allocation5 + $0x1], 16 }
  0x4a   : > { %7005 = vsyncadd [#allocation5 + $0x1], 4294967280 }
  0x4b PF: > { %p5532_p12 = scmp.ne.s32.totalorder %s7016_s14, 0 }
  0x4d   : > { %399 = sbr.rel (%p5532_p12) target bundleno = 84 (0x54), region = 119 }
  0x52   : > { %v7026_v9 = vmov 0.0  }
  0x53   : > { %400 = vst [vmem:[#allocation2] sm:$0xff] %v7026_v9 }
  0x54 PF: > { %v7306_v10 = vld [vmem:[#allocation3 + $0x158] sm:$0xff]  ;;  %v7308_v11 = vld [vmem:[#allocation3 + $0x30] sm:$0xff]  ;;  %v7310_v12 = vld [vmem:[#allocation3 + $0x68] sm:$0xff]  ;;  %v9124_v14 = vmov 0.0   ;;  %vm7028_vm0 = vmmov 0   ;;  %v618_v62 = vlaneseq }
  0x55   : > { %472 = vmatprep.subr.mxu0 %v7306_v10  ;;  %v7313_v13 = vld [vmem:[#allocation3 + $0x50] sm:$0xff]  ;;  %5868 = vmatprep.subr.mxu1 %v9124_v14  ;;  %v7317_v15 = vld [vmem:[#allocation3] sm:$0xff]  ;;  %v7321_v16 = vld [vmem:[#allocation3 + $0x8] sm:$0xff]  ;;  %v7029_v60 = vmov 1966171168  }
  0x56   : > { %473 = vmatpush1.msra.mxu0 %v7308_v11  ;;  %536 = vmatprep.mubr.f32.mxu0 %v9124_v14  ;;  %v7326_v17 = vld [vmem:[#allocation3 + $0x18] sm:$0xff]  ;;  %v7329_v18 = vld [vmem:[#allocation3 + $0xc0] sm:$0xff]  ;;  %v7332_v19 = vld [vmem:[#allocation3 + $0x28] sm:$0xff]  ;;  %v616_v61 = vunpack.c.l.s4 %v7029_v60  ;;  %v619_v0 = vshrl.u32 %v618_v62, 7 }
  0x57   : > { %474 = vmatprep.subr.mxu0 %v7310_v12  ;;  %5900 = vmatprep.mubr.msk.f32.mxu1 %vm7028_vm0, %v9124_v14  ;;  %v7335_v20 = vld [vmem:[#allocation3 + $0xc8] sm:$0xff]  ;;  %v7338_v21 = vld [vmem:[#allocation3 + $0x140] sm:$0xff]  ;;  %v7341_v22 = vld [vmem:[#allocation3 + $0xf0] sm:$0xff] }
  0x58   : > { %475 = vmatpush1.msra.mxu0 %v7313_v13  ;;  %v7344_v23 = vld [vmem:[#allocation3 + $0xa0] sm:$0xff]  ;;  %v7346_v24 = vld [vmem:[#allocation3 + $0x150] sm:$0xff]  ;;  %v7349_v25 = vld [vmem:[#allocation3 + $0x88] sm:$0xff]  ;;  %v617_v63 = vunpack.c.0.s8 %v616_v61 }
  0x59   : > { %476 = vmatprep.subr.mxu0 %v7317_v15  ;;  %5869 = vmatpush3.msra.mxu1 %v7346_v24  ;;  %v7352_v26 = vld [vmem:[#allocation3 + $0x70] sm:$0xff]  ;;  %v7355_v27 = vld [vmem:[#allocation3 + $0xf8] sm:$0xff]  ;;  %v7361_v29 = vld [vmem:[#allocation3 + $0xe8] sm:$0xff] }
  0x5a   : > { %477 = vmatpush1.msra.mxu0 %v7321_v16  ;;  %5870 = vmatprep.subr.mxu1 %v9124_v14  ;;  %v7358_v28 = vld [vmem:[#allocation3 + $0x78] sm:$0xff]  ;;  %9210 = vst [vmem:[#allocation12_spill] sm:$0xff] %v7361_v29  ;;  %v7371_v32 = vld [vmem:[#allocation3 + $0xa8] sm:$0xff]  ;;  %v7375_v33 = vld [vmem:[#allocation3 + $0x120] sm:$0xff]  ;;  %v7542_v1 = vsub.s32 %v617_v63, %v619_v0 }
  0x5b   : > { %478 = vmatprep.subr.mxu0 %v7326_v17  ;;  %5871 = vmatpush3.msra.mxu1 %v7352_v26  ;;  %v7365_v30 = vld [vmem:[#allocation3 + $0xb8] sm:$0xff]  ;;  %9212 = vst [vmem:[#allocation14_spill] sm:$0xff] %v7371_v32  ;;  %9213 = vst [vmem:[#allocation15_spill] sm:$0xff] %v7375_v33  ;;  %v7385_v36 = vld [vmem:[#allocation3 + $0x80] sm:$0xff] }
  0x5c   : > { %479 = vmatpush1.msra.mxu0 %v7329_v18  ;;  %9211 = vst [vmem:[#allocation13_spill] sm:$0xff] %v7365_v30  ;;  %5872 = vmatprep.subr.mxu1 %v9124_v14  ;;  %v7368_v31 = vld [vmem:[#allocation3 + $0x98] sm:$0xff]  ;;  %9215 = vst [vmem:[#allocation17_spill] sm:$0xff] %v7385_v36  ;;  %v7388_v37 = vld [vmem:[#allocation3 + $0x60] sm:$0xff] }
  0x5d   : > { %480 = vmatprep.subr.mxu0 %v7332_v19  ;;  %5873 = vmatpush3.msra.mxu1 %v7358_v28  ;;  %v7378_v34 = vld [vmem:[#allocation3 + $0x38] sm:$0xff]  ;;  %v7395_v39 = vld [vmem:[#allocation3 + $0x100] sm:$0xff]  ;;  %v7398_v40 = vld [vmem:[#allocation3 + $0x170] sm:$0xff] }
  0x5e   : > { %481 = vmatpush1.msra.mxu0 %v7335_v20  ;;  %5874 = vmatprep.subr.mxu1 %v9124_v14  ;;  %v7381_v35 = vld [vmem:[#allocation3 + $0x138] sm:$0xff]  ;;  %9217 = vst [vmem:[#allocation19_spill] sm:$0xff] %v7395_v39  ;;  %v7401_v41 = vld [vmem:[#allocation3 + $0x148] sm:$0xff]  ;;  %v7405_v42 = vld [vmem:[#allocation3 + $0x90] sm:$0xff] }
  0x5f   : > { %482 = vmatprep.subr.mxu0 %v7338_v21  ;;  %9214 = vst [vmem:[#allocation16_spill] sm:$0xff] %v7381_v35  ;;  %5875 = vmatpush3.msra.mxu1 %v7368_v31  ;;  %v7391_v38 = vld [vmem:[#allocation3 + $0xd8] sm:$0xff]  ;;  %9218 = vst [vmem:[#allocation20_spill] sm:$0xff] %v7401_v41  ;;  %v7408_v43 = vld [vmem:[#allocation3 + $0x20] sm:$0xff] }
  0x60   : > { %483 = vmatpush1.msra.mxu0 %v7341_v22  ;;  %5876 = vmatprep.subr.mxu1 %v9124_v14  ;;  %9216 = vst [vmem:[#allocation18_spill] sm:$0xff] %v7391_v38  ;;  %9219 = vst [vmem:[#allocation21_spill] sm:$0xff] %v7405_v42  ;;  %v7411_v44 = vld [vmem:[#allocation3 + $0x110] sm:$0xff]  ;;  %v7415_v45 = vld [vmem:[#allocation3 + $0x178] sm:$0xff] }
  0x61   : > { %484 = vmatprep.subr.mxu0 %v7344_v23  ;;  %5877 = vmatpush3.msra.mxu1 %v7378_v34  ;;  %9220 = vst [vmem:[#allocation22_spill] sm:$0xff] %v7408_v43  ;;  %9221 = vst [vmem:[#allocation23_spill] sm:$0xff] %v7411_v44  ;;  %v7418_v46 = vld [vmem:[#allocation3 + $0x168] sm:$0xff]  ;;  %v7421_v47 = vld [vmem:[#allocation3 + $0x40] sm:$0xff] }
  0x62   : > { %485 = vmatpush1.msra.mxu0 %v7349_v25  ;;  %5878 = vmatprep.subr.mxu1 %v9124_v14  ;;  %9222 = vst [vmem:[#allocation24_spill] sm:$0xff] %v7415_v45  ;;  %9223 = vst [vmem:[#allocation25_spill] sm:$0xff] %v7418_v46  ;;  %v7425_v48 = vld [vmem:[#allocation3 + $0x160] sm:$0xff]  ;;  %v7431_v50 = vld [vmem:[#allocation3 + $0x48] sm:$0xff] }
  0x63   : > { %486 = vmatprep.subr.mxu0 %v7355_v27  ;;  %5879 = vmatpush3.msra.mxu1 %v7388_v37  ;;  %9224 = vst [vmem:[#allocation26_spill] sm:$0xff] %v7421_v47  ;;  %9225 = vst [vmem:[#allocation27_spill] sm:$0xff] %v7425_v48  ;;  %v7428_v49 = vld [vmem:[#allocation3 + $0xe0] sm:$0xff]  ;;  %v7435_v51 = vld [vmem:[#allocation3 + $0xd0] sm:$0xff] }
  0x64   : > { %487 = vmatpush1.msra.mxu0 %v7361_v29  ;;  %5880 = vmatprep.subr.mxu1 %v9124_v14  ;;  %9226 = vst [vmem:[#allocation28_spill] sm:$0xff] %v7428_v49  ;;  %9227 = vst [vmem:[#allocation29_spill] sm:$0xff] %v7431_v50  ;;  %v7438_v52 = vld [vmem:[#allocation3 + $0x130] sm:$0xff]  ;;  %v7445_v54 = vld [vmem:[#allocation2] sm:$0xff] }
  0x65   : > { %488 = vmatprep.subr.mxu0 %v7365_v30  ;;  %5881 = vmatpush3.msra.mxu1 %v7398_v40  ;;  %9228 = vst [vmem:[#allocation30_spill] sm:$0xff] %v7435_v51  ;;  %9229 = vst [vmem:[#allocation31_spill] sm:$0xff] %v7438_v52  ;;  %v7441_v53 = vld [vmem:[#allocation3 + $0xb0] sm:$0xff]  ;;  %v7448_v55 = vld [vmem:[#allocation3 + $0x58] sm:$0xff] }
  0x66   : > { %489 = vmatpush1.msra.mxu0 %v7371_v32  ;;  %5882 = vmatprep.subr.mxu1 %v9124_v14  ;;  %9230 = vst [vmem:[#allocation32_spill] sm:$0xff] %v7441_v53  ;;  %9231 = vst [vmem:[#allocation33_spill] sm:$0xff] %v7448_v55  ;;  %v7454_v56 = vld [vmem:[#allocation3 + $0x118] sm:$0xff]  ;;  %v7459_v57 = vld [vmem:[#allocation3 + $0x108] sm:$0xff] }
  0x67   : > { %490 = vmatprep.subr.mxu0 %v7375_v33  ;;  %5883 = vmatpush3.msra.mxu1 %v7408_v43  ;;  %9232 = vst [vmem:[#allocation34_spill] sm:$0xff] %v7454_v56  ;;  %9233 = vst [vmem:[#allocation35_spill] sm:$0xff] %v7459_v57  ;;  %v7465_v58 = vld [vmem:[#allocation3 + $0x128] sm:$0xff]  ;;  %v7471_v59 = vld [vmem:[#allocation3 + $0x10] sm:$0xff] }
  0x68   : > { %491 = vmatpush1.msra.mxu0 %v7381_v35  ;;  %5884 = vmatprep.subr.mxu1 %v9124_v14  ;;  %9234 = vst [vmem:[#allocation36_spill] sm:$0xff] %v7465_v58  ;;  %9235 = vst [vmem:[#allocation37_spill] sm:$0xff] %v7471_v59  ;;  %v7546_v5 = vld [vmem:[%s7154_s6] ss:$8 sm:$0x7] }
  0x69   : > { %492 = vmatprep.subr.mxu0 %v7385_v36  ;;  %5885 = vmatpush3.msra.mxu1 %v7418_v46  ;;  %v7551_v9 = vld [vmem:[%s7154_s6 + $0x18] ss:$8 sm:$0x7] }
  0x6a   : > { %493 = vmatpush1.msra.mxu0 %v7391_v38  ;;  %5886 = vmatprep.subr.mxu1 %v9124_v14  ;;  %v7557_v60 = vld [vmem:[%s7154_s6 + $0x48] ss:$8 sm:$0x7] }
  0x6b   : > { %494 = vmatprep.subr.mxu0 %v7395_v39  ;;  %5887 = vmatpush3.msra.mxu1 %v7428_v49  ;;  %v7560_v61 = vld [vmem:[%s7154_s6 + $0x60] ss:$8 sm:$0x7] }
  0x6c   : > { %495 = vmatpush1.msra.mxu0 %v7401_v41  ;;  %5888 = vmatprep.subr.mxu1 %v9124_v14 }
  0x6d   : > { %496 = vmatprep.subr.mxu0 %v7405_v42  ;;  %5889 = vmatpush3.msra.mxu1 %v7438_v52 }
  0x6e   : > { %497 = vmatpush1.msra.mxu0 %v7411_v44  ;;  %5890 = vmatprep.subr.mxu1 %v9124_v14 }
  0x6f   : > { %498 = vmatprep.subr.mxu0 %v7415_v45  ;;  %5891 = vmatpush3.msra.mxu1 %v7448_v55 }
  0x70   : > { %499 = vmatpush1.msra.mxu0 %v7421_v47  ;;  %5892 = vmatprep.subr.mxu1 %v9124_v14 }
  0x71   : > { %500 = vmatprep.subr.mxu0 %v7425_v48  ;;  %5893 = vmatpush3.msra.mxu1 %v7454_v56 }
  0x72   : > { %501 = vmatpush1.msra.mxu0 %v7431_v50  ;;  %5894 = vmatprep.subr.mxu1 %v9124_v14 }
  0x73   : > { %502 = vmatprep.subr.mxu0 %v7435_v51  ;;  %5895 = vmatpush3.msra.mxu1 %v7459_v57 }
  0x74   : > { %503 = vmatpush1.msra.mxu0 %v7441_v53  ;;  %5896 = vmatprep.subr.mxu1 %v9124_v14 }
  0x75   : > { %537 = vmatmul.mubr.f32.vlgmr.msra.gmra.mxu0 %v7445_v54  ;;  %1179 = vmatprep.subr.mxu0 %v7306_v10 }
  0x76   : > { %1180 = vmatpush1.msra.mxu0 %v7308_v11  ;;  %5897 = vmatpush3.msra.mxu1 %v7465_v58 }
  0x77   : > { %1181 = vmatprep.subr.mxu0 %v7310_v12  ;;  %5898 = vmatprep.subr.mxu1 %v9124_v14 }
  0x78   : > { %1182 = vmatpush1.msra.mxu0 %v7313_v13  ;;  %5899 = vmatpush3.msra.mxu1 %v7471_v59 }
  0x79   : > { %1183 = vmatprep.subr.mxu0 %v7317_v15  ;;  %5901 = vmatmul.mubr.f32.vlgmr.msra.gmra.mxu1 %v7445_v54 }
  0x7a   : > { %1184 = vmatpush1.msra.mxu0 %v7321_v16  ;;  %5903 = vmatprep.subr.mxu1 %v9124_v14 }
  0x7b   : > { %1185 = vmatprep.subr.mxu0 %v7326_v17  ;;  %5904 = vmatpush3.msra.mxu1 %v7346_v24 }
  0x7c   : > { %1186 = vmatpush1.msra.mxu0 %v7329_v18  ;;  %5905 = vmatprep.subr.mxu1 %v9124_v14 }
  0x7d   : > { %1187 = vmatprep.subr.mxu0 %v7332_v19  ;;  %5906 = vmatpush3.msra.mxu1 %v7352_v26 }
  0x7e   : > { %1188 = vmatpush1.msra.mxu0 %v7335_v20  ;;  %5907 = vmatprep.subr.mxu1 %v9124_v14 }
  0x7f   : > { %1189 = vmatprep.subr.mxu0 %v7338_v21  ;;  %5908 = vmatpush3.msra.mxu1 %v7358_v28 }
  0x80   : > { %1190 = vmatpush1.msra.mxu0 %v7341_v22  ;;  %5909 = vmatprep.subr.mxu1 %v9124_v14 }
  0x81   : > { %1191 = vmatprep.subr.mxu0 %v7344_v23  ;;  %5910 = vmatpush3.msra.mxu1 %v7368_v31 }
  0x82   : > { %1192 = vmatpush1.msra.mxu0 %v7349_v25  ;;  %5911 = vmatprep.subr.mxu1 %v9124_v14 }
  0x83   : > { %1193 = vmatprep.subr.mxu0 %v7355_v27  ;;  %5912 = vmatpush3.msra.mxu1 %v7378_v34 }
  0x84   : > { %1194 = vmatpush1.msra.mxu0 %v7361_v29  ;;  %5913 = vmatprep.subr.mxu1 %v9124_v14 }
  0x85   : > { %1195 = vmatprep.subr.mxu0 %v7365_v30  ;;  %5914 = vmatpush3.msra.mxu1 %v7388_v37 }
  0x86   : > { %1196 = vmatpush1.msra.mxu0 %v7371_v32  ;;  %5915 = vmatprep.subr.mxu1 %v9124_v14 }
  0x87   : > { %1197 = vmatprep.subr.mxu0 %v7375_v33  ;;  %5916 = vmatpush3.msra.mxu1 %v7398_v40 }
  0x88   : > { %1198 = vmatpush1.msra.mxu0 %v7381_v35  ;;  %5917 = vmatprep.subr.mxu1 %v9124_v14 }
  0x89   : > { %1199 = vmatprep.subr.mxu0 %v7385_v36  ;;  %5918 = vmatpush3.msra.mxu1 %v7408_v43 }
  0x8a   : > { %1200 = vmatpush1.msra.mxu0 %v7391_v38  ;;  %5919 = vmatprep.subr.mxu1 %v9124_v14 }
  0x8b   : > { %1201 = vmatprep.subr.mxu0 %v7395_v39  ;;  %5920 = vmatpush3.msra.mxu1 %v7418_v46 }
  0x8c   : > { %1202 = vmatpush1.msra.mxu0 %v7401_v41  ;;  %5921 = vmatprep.subr.mxu1 %v9124_v14 }
  0x8d   : > { %1203 = vmatprep.subr.mxu0 %v7405_v42  ;;  %5922 = vmatpush3.msra.mxu1 %v7428_v49 }
  0x8e   : > { %1204 = vmatpush1.msra.mxu0 %v7411_v44  ;;  %5923 = vmatprep.subr.mxu1 %v9124_v14 }
  0x8f   : > { %1205 = vmatprep.subr.mxu0 %v7415_v45  ;;  %5924 = vmatpush3.msra.mxu1 %v7438_v52 }
  0x90   : > { %1206 = vmatpush1.msra.mxu0 %v7421_v47  ;;  %5925 = vmatprep.subr.mxu1 %v9124_v14 }
  0x91   : > { %1207 = vmatprep.subr.mxu0 %v7425_v48  ;;  %5926 = vmatpush3.msra.mxu1 %v7448_v55 }
  0x92   : > { %1208 = vmatpush1.msra.mxu0 %v7431_v50  ;;  %5927 = vmatprep.subr.mxu1 %v9124_v14  ;;  %v7574_v50 = vld [vmem:[%s7154_s6 + $0xa8] ss:$8 sm:$0x7] }
  0x93   : > { %1209 = vmatprep.subr.mxu0 %v7435_v51  ;;  %5928 = vmatpush3.msra.mxu1 %v7454_v56 }
  0x94   : > { %1210 = vmatpush1.msra.mxu0 %v7441_v53  ;;  %1243 = vmatprep.mubr.f32.mxu0 %v9124_v14 }
  0x95   : > { %5929 = vmatprep.subr.mxu1 %v9124_v14  ;;  %5935 = vmatprep.mubr.msk.f32.mxu1 %vm7028_vm0, %v9124_v14 }
  0x96   : > { %5930 = vmatpush3.msra.mxu1 %v7459_v57  ;;  %1777 = vmatprep.subr.mxu0 %v7306_v10  ;;  %v7554_v10 = vld [vmem:[%s7154_s6 + $0x30] ss:$8 sm:$0x7] }
  0x97   : > { %5931 = vmatprep.subr.mxu1 %v9124_v14 }
  0x98   : > { %5932 = vmatpush3.msra.mxu1 %v7465_v58 }
  0x99   : > { %5933 = vmatprep.subr.mxu1 %v9124_v14 }
  0x9a   : > { %5934 = vmatpush3.msra.mxu1 %v7471_v59 }
  0x9b   : > { %5938 = vmatprep.subr.mxu1 %v9124_v14  ;;  %v7565_v14 = vld [vmem:[%s7154_s6 + $0x78] ss:$8 sm:$0x7] }
 0x135   : > { %v538_v2 = vpop.f32.mrf.mxu0 }
 0x136   : > { %v614_v3 = vcombine.high %v538_v2, %v538_v2  ;;  %v621_v4 = vrot.slane %v538_v2, %v7542_v1 }
 0x138   : > { %v628_v6 = vrot.slane %v614_v3, %v7542_v1  ;;  %v629_v7 = vcombine.high %v621_v4, %v621_v4  ;;  %v637_v8 = vrot.slane %v621_v4, %v7542_v1  ;;  %v7568_v3 = vld [vmem:[%s7154_s6 + $0x90] ss:$8 sm:$0x7] }
 0x139   : > { %v609_v56 = vpop.f32.mrf.mxu1 }
 0x13a   : > { %v630_v62 = vcombine.high %v628_v6, %v628_v6  ;;  %v644_v63 = vrot.slane %v628_v6, %v7542_v1  ;;  %v651_v0 = vrot.slane %v629_v7, %v7542_v1  ;;  %v659_v2 = vcombine.high %v637_v8, %v637_v8 }
 0x13b   : > { %v671_v4 = vadd.f32 %v637_v8, %v7546_v5  ;;  %v5902_v41 = vpop.f32.mrf.mxu1 }
 0x13c   : > { %v658_v59 = vrot.slane %v630_v62, %v7542_v1  ;;  %v660_v53 = vcombine.high %v644_v63, %v644_v63  ;;  %v661_v51 = vcombine.high %v651_v0, %v651_v0  ;;  %v672_v58 = vadd.f32 %v7551_v9, %v651_v0 }
 0x13d   : > { %v673_v48 = vadd.f32 %v7554_v10, %v659_v2  ;;  %v675_v6 = vadd.f32 %v7560_v61, %v644_v63  ;;  %v5541_v7 = vmul.f32 -1.442695, %v671_v4 }
 0x13e   : > { %v662_v57 = vcombine.high %v658_v59, %v658_v59  ;;  %v674_v47 = vadd.f32 %v7557_v60, %v661_v51  ;;  %v676_v45 = vadd.f32 %v7565_v14, %v658_v59  ;;  %v677_v8 = vadd.f32 %v7568_v3, %v660_v53  ;;  %v540_v51 = vpop.f32.mrf.mxu0 }
 0x13f   : > { %6195 = vpow2.f32 %v5541_v7  ;;  %v5542_v62 = vmul.f32 -1.442695, %v672_v58  ;;  %v5543_v44 = vmul.f32 -1.442695, %v673_v48  ;;  %v5545_v55 = vmul.f32 -1.442695, %v675_v6 }
 0x140   : > { %v678_v0 = vadd.f32 %v7574_v50, %v662_v57  ;;  %v5544_v42 = vmul.f32 -1.442695, %v674_v47  ;;  %v5546_v2 = vmul.f32 -1.442695, %v676_v45  ;;  %v5547_v63 = vmul.f32 -1.442695, %v677_v8 }
 0x141   : > { %6197 = vpow2.f32 %v5542_v62  ;;  %v752_v53 = vcombine.high %v540_v51, %v540_v51  ;;  %v759_v59 = vrot.slane %v540_v51, %v7542_v1  ;;  %v7584_v47 = vld [vmem:[#allocation4] ss:$0 sm:$0xff]  ;;  %v736_v58 = vrot.slane %v7551_v9, 1 }
 0x142   : > { %6199 = vpow2.f32 %v5543_v44  ;;  %v5548_v4 = vmul.f32 -1.442695, %v678_v0  ;;  %9236 = vst [vmem:[#allocation38_spill] sm:$0xff] %v7584_v47  ;;  %v737_v7 = vrot.slane %v7554_v10, 1  ;;  %v739_v8 = vrot.slane %v7560_v61, 1 }
 0x143   : > { %6201 = vpow2.f32 %v5544_v42  ;;  %v766_v48 = vrot.slane %v752_v53, %v7542_v1  ;;  %v767_v57 = vcombine.high %v759_v59, %v759_v59  ;;  %v775_v45 = vrot.slane %v759_v59, %v7542_v1 }
 0x144   : > { %6203 = vpow2.f32 %v5545_v55  ;;  %v735_v42 = vrot.slane %v7546_v5, 1  ;;  %v865_v55 = vadd.f32 %v7584_v47, %v609_v56  ;;  %v741_v56 = vrot.slane %v7568_v3, 1 }
 0x145   : > { %6205 = vpow2.f32 %v5546_v2  ;;  %v768_v62 = vcombine.high %v766_v48, %v766_v48  ;;  %v789_v0 = vrot.slane %v767_v57, %v7542_v1  ;;  %v782_v51 = vrot.slane %v766_v48, %v7542_v1 }
 0x146   : > { %6207 = vpow2.f32 %v5547_v63  ;;  %v797_v47 = vcombine.high %v775_v45, %v775_v45  ;;  %v867_v38 = vcombine.high %v865_v55, %v865_v55  ;;  %v874_v57 = vrot.slane %v865_v55, %v7542_v1 }
 0x147   : > { %6209 = vpow2.f32 %v5548_v4  ;;  %v738_v4 = vrot.slane %v7557_v60, 1  ;;  %v799_v48 = vcombine.high %v789_v0, %v789_v0  ;;  %v798_v35 = vcombine.high %v782_v51, %v782_v51 }
 0x148   : > { %v809_v33 = vadd.f32 %v775_v45, %v735_v42  ;;  %v881_v55 = vrot.slane %v867_v38, %v7542_v1  ;;  %v890_v45 = vrot.slane %v874_v57, %v7542_v1  ;;  %v933_v38 = vrot.slane %v7551_v9, 2 }
 0x14a   : > { %v883_v42 = vcombine.high %v881_v55, %v881_v55 }
 0x14c   : > { %v6196_v41 = vpop.eup %6195 }
 0x14d   : > { %v703_v44 = vadd.f32 1.0, %v6196_v41  ;;  %v740_v41 = vrot.slane %v7565_v14, 1 }
 0x14e   : > { %v6198_v6 = vpop.eup %6197 }
 0x14f   : > { %v6200_v2 = vpop.eup %6199  ;;  %v704_v63 = vadd.f32 1.0, %v6198_v6  ;;  %6211 = vrcp.f32 %v703_v44  ;;  %v7599_v44 = vrot.slane %v768_v62, %v7542_v1  ;;  %v813_v62 = vadd.f32 %v782_v51, %v739_v8 }
 0x150   : > { %v6202_v53 = vpop.eup %6201  ;;  %v705_v59 = vadd.f32 1.0, %v6200_v2  ;;  %v911_v51 = vrot.slane %v883_v42, %v7542_v1 }
 0x151   : > { %v6204_v39 = vpop.eup %6203  ;;  %v706_v52 = vadd.f32 1.0, %v6202_v53  ;;  %6213 = vrcp.f32 %v704_v63  ;;  %v810_v53 = vadd.f32 %v789_v0, %v736_v58  ;;  %v811_v63 = vadd.f32 %v797_v47, %v737_v7 }
 0x152   : > { %v6206_v36 = vpop.eup %6205  ;;  %v707_v6 = vadd.f32 1.0, %v6204_v39  ;;  %6215 = vrcp.f32 %v705_v59  ;;  %v882_v39 = vcombine.high %v874_v57, %v874_v57  ;;  %v812_v59 = vadd.f32 %v799_v48, %v738_v4 }
 0x153   : > { %v6208_v49 = vpop.eup %6207  ;;  %v708_v2 = vadd.f32 1.0, %v6206_v36  ;;  %6217 = vrcp.f32 %v706_v52  ;;  %v814_v43 = vadd.f32 %v7599_v44, %v740_v41  ;;  %v5549_v36 = vmul.f32 -1.442695, %v809_v33 }
 0x154   : > { %v6210_v46 = vpop.eup %6209  ;;  %v709_v32 = vadd.f32 1.0, %v6208_v49  ;;  %6219 = vrcp.f32 %v707_v6  ;;  %v815_v52 = vadd.f32 %v798_v35, %v741_v56  ;;  %v5550_v29 = vmul.f32 -1.442695, %v810_v53 }
 0x155   : > { %v710_v30 = vadd.f32 1.0, %v6210_v46  ;;  %6221 = vrcp.f32 %v708_v2  ;;  %v5551_v49 = vmul.f32 -1.442695, %v811_v63  ;;  %v904_v47 = vrot.slane %v882_v39, %v7542_v1 }
 0x156   : > { %6223 = vrcp.f32 %v709_v32  ;;  %v932_v46 = vrot.slane %v7546_v5, 2  ;;  %v742_v32 = vrot.slane %v7574_v50, 1  ;;  %v5552_v58 = vmul.f32 -1.442695, %v812_v59 }
 0x157   : > { %6225 = vrcp.f32 %v710_v30  ;;  %v934_v30 = vrot.slane %v7554_v10, 2  ;;  %v5553_v7 = vmul.f32 -1.442695, %v813_v62  ;;  %v5554_v33 = vmul.f32 -1.442695, %v814_v43 }
 0x158   : > { %6227 = vpow2.f32 %v5549_v36  ;;  %v5555_v8 = vmul.f32 -1.442695, %v815_v52  ;;  %v897_v0 = vrot.slane %v881_v55, %v7542_v1  ;;  %v912_v4 = vcombine.high %v890_v45, %v890_v45 }
 0x159   : > { %6229 = vpow2.f32 %v5550_v29  ;;  %v914_v5 = vcombine.high %v904_v47, %v904_v47  ;;  %v935_v56 = vrot.slane %v7557_v60, 2  ;;  %v936_v57 = vrot.slane %v7560_v61, 2 }
 0x15a   : > { %6231 = vpow2.f32 %v5551_v49  ;;  %v937_v10 = vrot.slane %v7565_v14, 2  ;;  %v800_v29 = vcombine.high %v7599_v44, %v7599_v44  ;;  %v938_v53 = vrot.slane %v7568_v3, 2 }
 0x15b   : > { %6233 = vpow2.f32 %v5552_v58  ;;  %v913_v63 = vcombine.high %v897_v0, %v897_v0  ;;  %v915_v60 = vcombine.high %v911_v51, %v911_v51  ;;  %v939_v62 = vrot.slane %v7574_v50, 2 }
 0x15c   : > { %v6212_v35 = vpop.eup %6211  ;;  %6235 = vpow2.f32 %v5553_v7 }
 0x15d   : > { %v924_v41 = vmul.f32 %v6212_v35, %v890_v45  ;;  %6237 = vpow2.f32 %v5554_v33  ;;  %v816_v45 = vadd.f32 %v800_v29, %v742_v32 }
 0x15e   : > { %v6214_v9 = vpop.eup %6213  ;;  %6239 = vpow2.f32 %v5555_v8 }
 0x15f   : > { %v6216_v43 = vpop.eup %6215  ;;  %v925_v6 = vmul.f32 %v6214_v9, %v904_v47  ;;  %v948_v48 = vadd.f32 %v932_v46, %v924_v41 }
 0x160   : > { %v6218_v2 = vpop.eup %6217  ;;  %v926_v55 = vmul.f32 %v6216_v43, %v912_v4 }
 0x161   : > { %v6220_v39 = vpop.eup %6219  ;;  %v927_v61 = vmul.f32 %v6218_v2, %v914_v5  ;;  %v949_v59 = vadd.f32 %v933_v38, %v925_v6  ;;  %6241 = vtanh.f32 %v948_v48  ;;  %v5556_v38 = vmul.f32 -1.442695, %v816_v45 }
 0x162   : > { %v6222_v14 = vpop.eup %6221  ;;  %v928_v36 = vmul.f32 %v6220_v39, %v897_v0  ;;  %v950_v52 = vadd.f32 %v934_v30, %v926_v55 }
 0x163   : > { %v6224_v44 = vpop.eup %6223  ;;  %v929_v49 = vmul.f32 %v6222_v14, %v911_v51  ;;  %v951_v42 = vadd.f32 %v935_v56, %v927_v61  ;;  %6243 = vtanh.f32 %v949_v59 }
 0x164   : > { %v6226_v3 = vpop.eup %6225  ;;  %v930_v47 = vmul.f32 %v6224_v44, %v913_v63  ;;  %v952_v46 = vadd.f32 %v936_v57, %v928_v36  ;;  %6245 = vtanh.f32 %v950_v52 }
 0x165   : > { %v931_v58 = vmul.f32 %v6226_v3, %v915_v60  ;;  %v953_v7 = vadd.f32 %v937_v10, %v929_v49  ;;  %6247 = vtanh.f32 %v951_v42  ;;  %v6228_v50 = vpop.eup %6227 }
 0x166   : > { %v954_v33 = vadd.f32 %v938_v53, %v930_v47  ;;  %6249 = vtanh.f32 %v952_v46  ;;  %v6230_v30 = vpop.eup %6229  ;;  %v841_v57 = vadd.f32 1.0, %v6228_v50 }
 0x167   : > { %v955_v35 = vadd.f32 %v939_v62, %v931_v58  ;;  %6251 = vtanh.f32 %v953_v7  ;;  %v6232_v32 = vpop.eup %6231  ;;  %v842_v43 = vadd.f32 1.0, %v6230_v30 }
 0x168   : > { %6253 = vtanh.f32 %v954_v33  ;;  %v6234_v8 = vpop.eup %6233  ;;  %v843_v2 = vadd.f32 1.0, %v6232_v32 }
 0x169   : > { %6255 = vtanh.f32 %v955_v35  ;;  %v6236_v0 = vpop.eup %6235  ;;  %v844_v60 = vadd.f32 1.0, %v6234_v8 }
 0x16a   : > { %6257 = vpow2.f32 %v5556_v38  ;;  %v6238_v4 = vpop.eup %6237  ;;  %v845_v61 = vadd.f32 1.0, %v6236_v0 }
 0x16b   : > { %v6240_v51 = vpop.eup %6239  ;;  %6259 = vrcp.f32 %v841_v57  ;;  %v846_v36 = vadd.f32 1.0, %v6238_v4 }
 0x16c   : > { %6261 = vrcp.f32 %v842_v43  ;;  %v847_v52 = vadd.f32 1.0, %v6240_v51 }
 0x16d   : > { %6263 = vrcp.f32 %v843_v2 }
 0x16e   : > { %v6242_v5 = vpop.eup %6241  ;;  %6265 = vrcp.f32 %v844_v60 }
 0x16f   : > { %6267 = vrcp.f32 %v845_v61 }
 0x170   : > { %v7618_v41 = vpop.eup %6243  ;;  %6269 = vrcp.f32 %v846_v36 }
 0x171   : > { %v7620_v9 = vpop.eup %6245  ;;  %v972_v29 = vcombine.low %v6242_v5, %v7618_v41  ;;  %6271 = vrcp.f32 %v847_v52 }
 0x172   : > { %v7622_v56 = vpop.eup %6247 }
 0x173   : > { %v7624_v10 = vpop.eup %6249  ;;  %v973_v6 = vcombine.low %v7620_v9, %v7622_v56  ;;  %v982_v14 = vrot.slane %v972_v29, %v7542_v1 }
 0x174   : > { %v7629_v48 = vpop.eup %6251 }
 0x175   : > { %v7631_v53 = vpop.eup %6253  ;;  %v974_v63 = vcombine.low %v7624_v10, %v7629_v48  ;;  %v989_v55 = vrot.slane %v973_v6, %v7542_v1 }
 0x176   : > { %v7636_v39 = vpop.eup %6255 }
 0x177   : > { %v975_v59 = vcombine.low %v7631_v53, %v7636_v39  ;;  %v6258_v62 = vpop.eup %6257  ;;  %v996_v44 = vrot.slane %v974_v63, %v7542_v1  ;;  %v1004_v49 = vcombine.low %v982_v14, %v989_v55 }
 0x178   : > { %v848_v42 = vadd.f32 1.0, %v6258_v62  ;;  %v6260_v33 = vpop.eup %6259 }
 0x179   : > { %v1003_v45 = vrot.slane %v975_v59, %v7542_v1  ;;  %v1012_v47 = vrot.slane %v1004_v49, %v7542_v1  ;;  %v6262_v50 = vpop.eup %6261 }
 0x17a   : > { %6273 = vrcp.f32 %v848_v42  ;;  %v6264_v30 = vpop.eup %6263 }
 0x17b   : > { %v1005_v3 = vcombine.low %v996_v44, %v1003_v45  ;;  %v6266_v4 = vpop.eup %6265 }
 0x17c   : > { %v6268_v6 = vpop.eup %6267 }
 0x17d   : > { %v1019_v46 = vrot.slane %v1005_v3, %v7542_v1  ;;  %v6270_v2 = vpop.eup %6269 }
 0x17e   : > { %v6272_v59 = vpop.eup %6271 }
 0x17f   : > { %v1020_v58 = vcombine.low %v1012_v47, %v1019_v46 }
 0x181   : > { %v1022_v7 = vsub.f32 %v7445_v54, %v1020_v58 }
 0x183   : > { %v1024_v38 = vcombine.high %v1022_v7, %v1022_v7  ;;  %v1031_v35 = vrot.slane %v1022_v7, %v7542_v1 }
 0x185   : > { %v1038_v32 = vrot.slane %v1024_v38, %v7542_v1  ;;  %v1039_v8 = vcombine.high %v1031_v35, %v1031_v35  ;;  %v1047_v0 = vrot.slane %v1031_v35, %v7542_v1 }
 0x187   : > { %v1040_v51 = vcombine.high %v1038_v32, %v1038_v32  ;;  %v1054_v57 = vrot.slane %v1038_v32, %v7542_v1  ;;  %v1061_v43 = vrot.slane %v1039_v8, %v7542_v1  ;;  %v1069_v29 = vcombine.high %v1047_v0, %v1047_v0  ;;  %v6274_v42 = vpop.eup %6273 }
 0x188   : > { %v1081_v54 = vmul.f32 %v6260_v33, %v1047_v0 }
 0x189   : > { %v1068_v63 = vrot.slane %v1040_v51, %v7542_v1  ;;  %v1070_v55 = vcombine.high %v1054_v57, %v1054_v57  ;;  %v1071_v60 = vcombine.high %v1061_v43, %v1061_v43  ;;  %v1082_v61 = vmul.f32 %v6262_v50, %v1061_v43  ;;  %v9259_v51 = vld [vmem:[#allocation29_spill] sm:$0xff]  ;;  %v9261_v43 = vld [vmem:[#allocation30_spill] sm:$0xff] }
 0x18a   : > { %v1083_v14 = vmul.f32 %v6264_v30, %v1069_v29  ;;  %v1085_v62 = vmul.f32 %v6268_v6, %v1054_v57  ;;  %v7652_v36 = vadd.f32 %v6242_v5, %v1081_v54  ;;  %v9260_v57 = vld [vmem:[#allocation36_spill] sm:$0xff]  ;;  %v9263_v6 = vld [vmem:[#allocation37_spill] sm:$0xff]  ;;  %v7770_v54 = vld [vmem:[#allocation3 + $0x158] sm:$0xff] }
 0x18b   : > { %v1072_v52 = vcombine.high %v1068_v63, %v1068_v63  ;;  %v1084_v44 = vmul.f32 %v6266_v4, %v1071_v60  ;;  %v1086_v45 = vmul.f32 %v6270_v2, %v1068_v63  ;;  %v1087_v49 = vmul.f32 %v6272_v59, %v1070_v55  ;;  %v9262_v29 = vld [vmem:[#allocation32_spill] sm:$0xff] }
 0x18c   : > { %v7655_v3 = vadd.f32 %v7618_v41, %v1082_v61  ;;  %v7658_v47 = vadd.f32 %v7620_v9, %v1083_v14  ;;  %v7661_v46 = vadd.f32 %v7624_v10, %v1085_v62  ;;  %1097 = vst [vmem:[%s7156_s7] sm:$0x1] %v7652_v36  ;;  %v9237_v4 = vmov 0.0   ;;  %v7778_v59 = vld [vmem:[%s7154_s6 + $0x1] ss:$8 sm:$0x7] }
 0x18d   : > { %v1088_v5 = vmul.f32 %v6274_v42, %v1072_v52  ;;  %v7666_v58 = vadd.f32 %v7622_v56, %v1084_v44  ;;  %v7669_v7 = vadd.f32 %v7629_v48, %v1086_v45  ;;  %v7672_v33 = vadd.f32 %v7631_v53, %v1087_v49  ;;  %v7783_v44 = vld [vmem:[%s7154_s6 + $0x19] ss:$8 sm:$0x7] }
 0x18e   : > { %1098 = vst [vmem:[%s7156_s7 + $0x8] sm:$0x1] %v7655_v3  ;;  %1099 = vst [vmem:[%s7156_s7 + $0x10] sm:$0x1] %v7658_v47  ;;  %v1129_v41 = vcombine.low %v7652_v36, %v7655_v3 }
 0x18f   : > { %1101 = vst [vmem:[%s7156_s7 + $0x20] sm:$0x1] %v7661_v46  ;;  %v7683_v9 = vadd.f32 %v7636_v39, %v1088_v5  ;;  %1100 = vst [vmem:[%s7156_s7 + $0x18] sm:$0x1] %v7666_v58  ;;  %v1130_v56 = vcombine.low %v7658_v47, %v7666_v58  ;;  %v1131_v10 = vcombine.low %v7661_v46, %v7669_v7 }
 0x190   : > { %1102 = vst [vmem:[%s7156_s7 + $0x28] sm:$0x1] %v7669_v7  ;;  %1103 = vst [vmem:[%s7156_s7 + $0x30] sm:$0x1] %v7672_v33  ;;  %v1139_v53 = vrot.slane %v1129_v41, %v7542_v1 }
 0x191   : > { %1104 = vst [vmem:[%s7156_s7 + $0x38] sm:$0x1] %v7683_v9  ;;  %v1132_v48 = vcombine.low %v7672_v33, %v7683_v9  ;;  %v1146_v39 = vrot.slane %v1130_v56, %v7542_v1  ;;  %v1153_v38 = vrot.slane %v1131_v10, %v7542_v1  ;;  %v7786_v45 = vld [vmem:[%s7154_s6 + $0x31] ss:$8 sm:$0x7] }
 0x192   : > { %v7789_v49 = vld [vmem:[%s7154_s6 + $0x49] ss:$8 sm:$0x7] }
 0x193   : > { %v1160_v35 = vrot.slane %v1132_v48, %v7542_v1  ;;  %v1161_v50 = vcombine.low %v1139_v53, %v1146_v39  ;;  %v7792_v42 = vld [vmem:[%s7154_s6 + $0x61] ss:$8 sm:$0x7] }
 0x194   : > { %v7797_v53 = vld [vmem:[%s7154_s6 + $0x79] ss:$8 sm:$0x7] }
 0x195   : > { %v1162_v30 = vcombine.low %v1153_v38, %v1160_v35  ;;  %v1169_v32 = vrot.slane %v1161_v50, %v7542_v1  ;;  %v7800_v39 = vld [vmem:[%s7154_s6 + $0x91] ss:$8 sm:$0x7] }
 0x197   : > { %v1176_v8 = vrot.slane %v1162_v30, %v7542_v1 }
 0x199   : > { %v1177_v0 = vcombine.low %v1169_v32, %v1176_v8  ;;  %v7806_v8 = vld [vmem:[%s7154_s6 + $0xa9] ss:$8 sm:$0x7] }
 0x19b   : > { %1244 = vmatmul.mubr.f32.vlgmr.msra.gmra.mxu0 %v1177_v0  ;;  %5936 = vmatmul.mubr.f32.vlgmr.msra.gmra.mxu1 %v1177_v0 }
 0x19c   : > { %1778 = vmatpush1.msra.mxu0 %v7308_v11  ;;  %5939 = vmatpush3.msra.mxu1 %v7346_v24  ;;  %v9238_v11 = vld [vmem:[#allocation12_spill] sm:$0xff] }
 0x19d   : > { %1779 = vmatprep.subr.mxu0 %v7310_v12  ;;  %5940 = vmatprep.subr.mxu1 %v9237_v4  ;;  %v9239_v12 = vld [vmem:[#allocation22_spill] sm:$0xff]  ;;  %v9250_v24 = vld [vmem:[#allocation20_spill] sm:$0xff] }
 0x19e   : > { %1780 = vmatpush1.msra.mxu0 %v7313_v13  ;;  %5941 = vmatpush3.msra.mxu1 %v7352_v26  ;;  %v9240_v13 = vld [vmem:[#allocation13_spill] sm:$0xff] }
 0x19f   : > { %1781 = vmatprep.subr.mxu0 %v7317_v15  ;;  %5942 = vmatprep.subr.mxu1 %v9237_v4  ;;  %v9241_v15 = vld [vmem:[#allocation14_spill] sm:$0xff]  ;;  %v9252_v26 = vld [vmem:[#allocation21_spill] sm:$0xff] }
 0x1a0   : > { %1782 = vmatpush1.msra.mxu0 %v7321_v16  ;;  %5943 = vmatpush3.msra.mxu1 %v7358_v28  ;;  %v9242_v16 = vld [vmem:[#allocation25_spill] sm:$0xff]  ;;  %v9254_v28 = vld [vmem:[#allocation34_spill] sm:$0xff] }
 0x1a1   : > { %1783 = vmatprep.subr.mxu0 %v7326_v17  ;;  %5944 = vmatprep.subr.mxu1 %v9237_v4  ;;  %v9243_v17 = vld [vmem:[#allocation15_spill] sm:$0xff] }
 0x1a2   : > { %1784 = vmatpush1.msra.mxu0 %v7329_v18  ;;  %5945 = vmatpush3.msra.mxu1 %v7368_v31  ;;  %v9244_v18 = vld [vmem:[#allocation16_spill] sm:$0xff] }
 0x1a3   : > { %1785 = vmatprep.subr.mxu0 %v7332_v19  ;;  %5946 = vmatprep.subr.mxu1 %v9237_v4  ;;  %v9245_v19 = vld [vmem:[#allocation28_spill] sm:$0xff] }
 0x1a4   : > { %1786 = vmatpush1.msra.mxu0 %v7335_v20  ;;  %5947 = vmatpush3.msra.mxu1 %v7378_v34  ;;  %v9246_v20 = vld [vmem:[#allocation17_spill] sm:$0xff]  ;;  %v9255_v31 = vld [vmem:[#allocation24_spill] sm:$0xff]  ;;  %v9256_v34 = vld [vmem:[#allocation26_spill] sm:$0xff] }
 0x1a5   : > { %1787 = vmatprep.subr.mxu0 %v7338_v21  ;;  %5948 = vmatprep.subr.mxu1 %v9237_v4  ;;  %v9247_v21 = vld [vmem:[#allocation18_spill] sm:$0xff] }
 0x1a6   : > { %1788 = vmatpush1.msra.mxu0 %v7341_v22  ;;  %5949 = vmatpush3.msra.mxu1 %v7388_v37  ;;  %v9248_v22 = vld [vmem:[#allocation31_spill] sm:$0xff] }
 0x1a7   : > { %1789 = vmatprep.subr.mxu0 %v7344_v23  ;;  %5950 = vmatprep.subr.mxu1 %v9237_v4  ;;  %v9249_v23 = vld [vmem:[#allocation19_spill] sm:$0xff] }
 0x1a8   : > { %1790 = vmatpush1.msra.mxu0 %v7349_v25  ;;  %5951 = vmatpush3.msra.mxu1 %v7398_v40  ;;  %v9251_v25 = vld [vmem:[#allocation33_spill] sm:$0xff]  ;;  %v9257_v37 = vld [vmem:[#allocation35_spill] sm:$0xff] }
 0x1a9   : > { %1791 = vmatprep.subr.mxu0 %v7355_v27  ;;  %5952 = vmatprep.subr.mxu1 %v9237_v4  ;;  %v9253_v27 = vld [vmem:[#allocation23_spill] sm:$0xff] }
 0x1aa   : > { %1792 = vmatpush1.msra.mxu0 %v9238_v11  ;;  %5953 = vmatpush3.msra.mxu1 %v9239_v12  ;;  %v9258_v40 = vld [vmem:[#allocation27_spill] sm:$0xff] }
 0x1ab   : > { %1793 = vmatprep.subr.mxu0 %v9240_v13  ;;  %5954 = vmatprep.subr.mxu1 %v9237_v4 }
 0x1ac   : > { %1794 = vmatpush1.msra.mxu0 %v9241_v15  ;;  %5955 = vmatpush3.msra.mxu1 %v9242_v16 }
 0x1ad   : > { %1795 = vmatprep.subr.mxu0 %v9243_v17  ;;  %5956 = vmatprep.subr.mxu1 %v9237_v4 }
 0x1ae   : > { %1796 = vmatpush1.msra.mxu0 %v9244_v18  ;;  %5957 = vmatpush3.msra.mxu1 %v9245_v19 }
 0x1af   : > { %1797 = vmatprep.subr.mxu0 %v9246_v20  ;;  %5958 = vmatprep.subr.mxu1 %v9237_v4 }
 0x1b0   : > { %1798 = vmatpush1.msra.mxu0 %v9247_v21  ;;  %5959 = vmatpush3.msra.mxu1 %v9248_v22 }
 0x1b1   : > { %1799 = vmatprep.subr.mxu0 %v9249_v23  ;;  %5960 = vmatprep.subr.mxu1 %v9237_v4 }
 0x1b2   : > { %1800 = vmatpush1.msra.mxu0 %v9250_v24  ;;  %5961 = vmatpush3.msra.mxu1 %v9251_v25 }
 0x1b3   : > { %1801 = vmatprep.subr.mxu0 %v9252_v26  ;;  %5962 = vmatprep.subr.mxu1 %v9237_v4 }
 0x1b4   : > { %1802 = vmatpush1.msra.mxu0 %v9253_v27  ;;  %5963 = vmatpush3.msra.mxu1 %v9254_v28  ;;  %v1442_v27 = vrot.slane %v7778_v59, 1 }
 0x1b5   : > { %1803 = vmatprep.subr.mxu0 %v9255_v31  ;;  %5964 = vmatprep.subr.mxu1 %v9237_v4 }
 0x1b6   : > { %1804 = vmatpush1.msra.mxu0 %v9256_v34  ;;  %5965 = vmatpush3.msra.mxu1 %v9257_v37  ;;  %v1443_v34 = vrot.slane %v7783_v44, 1  ;;  %v1444_v37 = vrot.slane %v7786_v45, 1 }
 0x1b7   : > { %1805 = vmatprep.subr.mxu0 %v9258_v40  ;;  %5966 = vmatprep.subr.mxu1 %v9237_v4  ;;  %v1446_v40 = vrot.slane %v7792_v42, 1 }
 0x1b8   : > { %1806 = vmatpush1.msra.mxu0 %v9259_v51  ;;  %5967 = vmatpush3.msra.mxu1 %v9260_v57 }
 0x1b9   : > { %1807 = vmatprep.subr.mxu0 %v9261_v43  ;;  %5968 = vmatprep.subr.mxu1 %v9237_v4  ;;  %v1445_v43 = vrot.slane %v7789_v49, 1 }
 0x1ba   : > { %1808 = vmatpush1.msra.mxu0 %v9262_v29  ;;  %1841 = vmatprep.mubr.f32.mxu0 %v9237_v4 }
 0x1bb   : > { %5969 = vmatpush3.msra.mxu1 %v9263_v6  ;;  %5970 = vmatprep.mubr.msk.f32.mxu1 %vm7028_vm0, %v9237_v4 }
 0x1bc   : > { %2375 = vmatprep.subr.mxu0 %v7770_v54  ;;  %5973 = vmatprep.subr.mxu1 %v9237_v4 }
 0x25b   : > { %v1245_v2 = vpop.f32.mrf.mxu0  ;;  %v7774_v63 = vpop.f32.mrf.mxu1 }
 0x25c   : > { %v1321_v55 = vcombine.high %v1245_v2, %v1245_v2  ;;  %v1328_v60 = vrot.slane %v1245_v2, %v7542_v1 }
 0x25d   : > { %v5937_v61 = vpop.f32.mrf.mxu1  ;;  %v1247_v48 = vpop.f32.mrf.mxu0 }
 0x25e   : > { %v1335_v14 = vrot.slane %v1321_v55, %v7542_v1  ;;  %v1336_v62 = vcombine.high %v1328_v60, %v1328_v60  ;;  %v1344_v52 = vrot.slane %v1328_v60, %v7542_v1  ;;  %v1459_v13 = vcombine.high %v1247_v48, %v1247_v48 }
 0x25f   : > { %v1466_v24 = vrot.slane %v1247_v48, %v7542_v1 }
 0x260   : > { %v1337_v5 = vcombine.high %v1335_v14, %v1335_v14  ;;  %v1351_v41 = vrot.slane %v1335_v14, %v7542_v1  ;;  %v1358_v56 = vrot.slane %v1336_v62, %v7542_v1  ;;  %v1366_v10 = vcombine.high %v1344_v52, %v1344_v52 }
 0x261   : > { %v1378_v38 = vadd.f32 %v7778_v59, %v1344_v52  ;;  %v1473_v28 = vrot.slane %v1459_v13, %v7542_v1  ;;  %v1474_v51 = vcombine.high %v1466_v24, %v1466_v24  ;;  %v1482_v57 = vrot.slane %v1466_v24, %v7542_v1  ;;  %v9264_v13 = vld [vmem:[#allocation38_spill] sm:$0xff] }
 0x262   : > { %v1365_v35 = vrot.slane %v1337_v5, %v7542_v1  ;;  %v1367_v50 = vcombine.high %v1351_v41, %v1351_v41  ;;  %v1368_v30 = vcombine.high %v1358_v56, %v1358_v56  ;;  %v1379_v32 = vadd.f32 %v7783_v44, %v1358_v56 }
 0x263   : > { %v1380_v0 = vadd.f32 %v7786_v45, %v1366_v10  ;;  %v1382_v11 = vadd.f32 %v7792_v42, %v1351_v41  ;;  %v5565_v12 = vmul.f32 -1.442695, %v1378_v38  ;;  %v1489_v29 = vrot.slane %v1473_v28, %v7542_v1 }
 0x264   : > { %v1369_v15 = vcombine.high %v1365_v35, %v1365_v35  ;;  %v1381_v16 = vadd.f32 %v7789_v49, %v1368_v30  ;;  %v1383_v17 = vadd.f32 %v7797_v53, %v1365_v35  ;;  %v1384_v18 = vadd.f32 %v7800_v39, %v1367_v50 }
 0x265   : > { %6275 = vpow2.f32 %v5565_v12  ;;  %v5566_v19 = vmul.f32 -1.442695, %v1379_v32  ;;  %v5567_v20 = vmul.f32 -1.442695, %v1380_v0  ;;  %v5569_v23 = vmul.f32 -1.442695, %v1382_v11 }
 0x266   : > { %v1385_v21 = vadd.f32 %v7806_v8, %v1369_v15  ;;  %v5568_v22 = vmul.f32 -1.442695, %v1381_v16  ;;  %v5570_v25 = vmul.f32 -1.442695, %v1383_v17  ;;  %v5571_v26 = vmul.f32 -1.442695, %v1384_v18 }
 0x267   : > { %6277 = vpow2.f32 %v5566_v19  ;;  %v1475_v6 = vcombine.high %v1473_v28, %v1473_v28  ;;  %v1496_v2 = vrot.slane %v1474_v51, %v7542_v1  ;;  %v1504_v55 = vcombine.high %v1482_v57, %v1482_v57 }
 0x268   : > { %6279 = vpow2.f32 %v5567_v20  ;;  %v5572_v31 = vmul.f32 -1.442695, %v1385_v21  ;;  %v1516_v60 = vadd.f32 %v1482_v57, %v1442_v27  ;;  %v1520_v52 = vadd.f32 %v1489_v29, %v1446_v40 }
 0x269   : > { %6281 = vpow2.f32 %v5568_v22  ;;  %v1506_v61 = vcombine.high %v1496_v2, %v1496_v2  ;;  %v1517_v14 = vadd.f32 %v1496_v2, %v1443_v34  ;;  %v1518_v62 = vadd.f32 %v1504_v55, %v1444_v37 }
 0x26a   : > { %6283 = vpow2.f32 %v5569_v23  ;;  %v5573_v5 = vmul.f32 -1.442695, %v1516_v60  ;;  %v1503_v41 = vrot.slane %v1475_v6, %v7542_v1  ;;  %v1447_v35 = vrot.slane %v7797_v53, 1 }
 0x26b   : > { %6285 = vpow2.f32 %v5570_v25  ;;  %v1519_v56 = vadd.f32 %v1506_v61, %v1445_v43  ;;  %v5574_v10 = vmul.f32 -1.442695, %v1517_v14  ;;  %v5575_v48 = vmul.f32 -1.442695, %v1518_v62 }
 0x26c   : > { %6287 = vpow2.f32 %v5571_v26  ;;  %v5577_v30 = vmul.f32 -1.442695, %v1520_v52  ;;  %v1448_v0 = vrot.slane %v7800_v39, 1  ;;  %v1505_v11 = vcombine.high %v1489_v29, %v1489_v29 }
 0x26d   : > { %6289 = vpow2.f32 %v5572_v31  ;;  %v5576_v50 = vmul.f32 -1.442695, %v1519_v56  ;;  %v1572_v15 = vadd.f32 %v9264_v13, %v7774_v63  ;;  %v1449_v16 = vrot.slane %v7806_v8, 1 }
 0x26e   : > { %6291 = vpow2.f32 %v5573_v5  ;;  %v1507_v17 = vcombine.high %v1503_v41, %v1503_v41  ;;  %v1521_v22 = vadd.f32 %v1503_v41, %v1447_v35  ;;  %v1522_v25 = vadd.f32 %v1505_v11, %v1448_v0 }
 0x26f   : > { %6293 = vpow2.f32 %v5574_v10  ;;  %v1574_v28 = vcombine.high %v1572_v15, %v1572_v15  ;;  %v1581_v37 = vrot.slane %v1572_v15, %v7542_v1  ;;  %v1639_v10 = vrot.slane %v7778_v59, 2 }
 0x270   : > { %6295 = vpow2.f32 %v5575_v48  ;;  %v1523_v63 = vadd.f32 %v1507_v17, %v1449_v16  ;;  %v5578_v57 = vmul.f32 -1.442695, %v1521_v22  ;;  %v5579_v29 = vmul.f32 -1.442695, %v1522_v25 }
 0x271   : > { %6297 = vpow2.f32 %v5576_v50  ;;  %v1588_v6 = vrot.slane %v1574_v28, %v7542_v1  ;;  %v1589_v55 = vcombine.high %v1581_v37, %v1581_v37  ;;  %v1597_v5 = vrot.slane %v1581_v37, %v7542_v1 }
 0x272   : > { %v6276_v38 = vpop.eup %6275  ;;  %v5580_v2 = vmul.f32 -1.442695, %v1523_v63  ;;  %v1640_v50 = vrot.slane %v7783_v44, 2 }
 0x273   : > { %v1410_v32 = vadd.f32 1.0, %v6276_v38  ;;  %v1590_v52 = vcombine.high %v1588_v6, %v1588_v6  ;;  %v1611_v48 = vrot.slane %v1589_v55, %v7542_v1  ;;  %v1604_v13 = vrot.slane %v1588_v6, %v7542_v1 }
 0x274   : > { %v6278_v12 = vpop.eup %6277  ;;  %v1619_v17 = vcombine.high %v1597_v5, %v1597_v5 }
 0x275   : > { %v6280_v18 = vpop.eup %6279  ;;  %v1411_v19 = vadd.f32 1.0, %v6278_v12  ;;  %6299 = vrcp.f32 %v1410_v32  ;;  %v1642_v32 = vrot.slane %v7789_v49, 2  ;;  %v1643_v12 = vrot.slane %v7792_v42, 2 }
 0x276   : > { %v6282_v20 = vpop.eup %6281  ;;  %v1412_v21 = vadd.f32 1.0, %v6280_v18  ;;  %6301 = vpow2.f32 %v5577_v30  ;;  %v1641_v30 = vrot.slane %v7786_v45, 2  ;;  %v1618_v59 = vrot.slane %v1590_v52, %v7542_v1 }
 0x277   : > { %v6284_v23 = vpop.eup %6283  ;;  %v1413_v24 = vadd.f32 1.0, %v6282_v20  ;;  %6303 = vrcp.f32 %v1411_v19  ;;  %v1621_v44 = vcombine.high %v1611_v48, %v1611_v48  ;;  %v1645_v42 = vrot.slane %v7800_v39, 2 }
 0x278   : > { %v6286_v26 = vpop.eup %6285  ;;  %v1414_v27 = vadd.f32 1.0, %v6284_v23  ;;  %6305 = vrcp.f32 %v1412_v21  ;;  %v1644_v21 = vrot.slane %v7797_v53, 2  ;;  %v1620_v28 = vcombine.high %v1604_v13, %v1604_v13 }
 0x279   : > { %v6288_v31 = vpop.eup %6287  ;;  %v1415_v34 = vadd.f32 1.0, %v6286_v26  ;;  %6307 = vrcp.f32 %v1413_v24  ;;  %v1646_v24 = vrot.slane %v7806_v8, 2  ;;  %v1622_v37 = vcombine.high %v1618_v59, %v1618_v59 }
 0x27a   : > { %v6290_v40 = vpop.eup %6289  ;;  %v1416_v51 = vadd.f32 1.0, %v6288_v31  ;;  %6309 = vrcp.f32 %v1414_v27 }
 0x27b   : > { %v1417_v43 = vadd.f32 1.0, %v6290_v40  ;;  %6311 = vrcp.f32 %v1415_v34  ;;  %v6292_v60 = vpop.eup %6291 }
 0x27c   : > { %6313 = vrcp.f32 %v1416_v51  ;;  %v6294_v61 = vpop.eup %6293  ;;  %v1548_v14 = vadd.f32 1.0, %v6292_v60 }
 0x27d   : > { %6315 = vrcp.f32 %v1417_v43  ;;  %v6296_v62 = vpop.eup %6295  ;;  %v1549_v41 = vadd.f32 1.0, %v6294_v61 }
 0x27e   : > { %6317 = vpow2.f32 %v5578_v57  ;;  %v6298_v56 = vpop.eup %6297  ;;  %v1550_v38 = vadd.f32 1.0, %v6296_v62 }
 0x27f   : > { %6319 = vpow2.f32 %v5579_v29  ;;  %v1551_v0 = vadd.f32 1.0, %v6298_v56 }
 0x280   : > { %6321 = vpow2.f32 %v5580_v2 }
 0x281   : > { %6323 = vrcp.f32 %v1548_v14 }
 0x282   : > { %v6300_v35 = vpop.eup %6299  ;;  %6325 = vrcp.f32 %v1549_v41 }
 0x283   : > { %v6302_v11 = vpop.eup %6301  ;;  %v1631_v15 = vmul.f32 %v6300_v35, %v1597_v5  ;;  %6327 = vrcp.f32 %v1550_v38 }
 0x284   : > { %v6304_v16 = vpop.eup %6303  ;;  %v1552_v18 = vadd.f32 1.0, %v6302_v11  ;;  %6329 = vrcp.f32 %v1551_v0 }
 0x285   : > { %v6306_v19 = vpop.eup %6305  ;;  %v1632_v20 = vmul.f32 %v6304_v16, %v1611_v48  ;;  %v1655_v45 = vadd.f32 %v1639_v10, %v1631_v15 }
 0x286   : > { %v6308_v49 = vpop.eup %6307  ;;  %v1633_v22 = vmul.f32 %v6306_v19, %v1619_v17 }
 0x287   : > { %v6310_v23 = vpop.eup %6309  ;;  %v1634_v25 = vmul.f32 %v6308_v49, %v1621_v44  ;;  %v1656_v26 = vadd.f32 %v1640_v50, %v1632_v20  ;;  %6331 = vtanh.f32 %v1655_v45 }
 0x288   : > { %v6312_v27 = vpop.eup %6311  ;;  %v1635_v63 = vmul.f32 %v6310_v23, %v1604_v13  ;;  %v1657_v31 = vadd.f32 %v1641_v30, %v1633_v22  ;;  %6333 = vrcp.f32 %v1552_v18 }
 0x289   : > { %v6314_v34 = vpop.eup %6313  ;;  %v1636_v40 = vmul.f32 %v6312_v27, %v1618_v59  ;;  %v1658_v51 = vadd.f32 %v1642_v32, %v1634_v25  ;;  %6335 = vtanh.f32 %v1656_v26 }
 0x28a   : > { %v6316_v53 = vpop.eup %6315  ;;  %v1637_v39 = vmul.f32 %v6314_v34, %v1620_v28  ;;  %v1659_v57 = vadd.f32 %v1643_v12, %v1635_v63  ;;  %6337 = vtanh.f32 %v1657_v31 }
 0x28b   : > { %v6318_v43 = vpop.eup %6317  ;;  %v1638_v29 = vmul.f32 %v6316_v53, %v1622_v37  ;;  %v1660_v8 = vadd.f32 %v1644_v21, %v1636_v40  ;;  %6339 = vtanh.f32 %v1658_v51 }
 0x28c   : > { %v6320_v6 = vpop.eup %6319  ;;  %v1661_v2 = vadd.f32 %v1645_v42, %v1637_v39  ;;  %6341 = vtanh.f32 %v1659_v57  ;;  %v1553_v55 = vadd.f32 1.0, %v6318_v43 }
 0x28d   : > { %v6322_v60 = vpop.eup %6321  ;;  %v1662_v61 = vadd.f32 %v1646_v24, %v1638_v29  ;;  %6343 = vtanh.f32 %v1660_v8  ;;  %v1554_v14 = vadd.f32 1.0, %v6320_v6  ;;  %v7898_v8 = vld [vmem:[#allocation3 + $0x30] sm:$0xff] }
 0x28e   : > { %6345 = vtanh.f32 %v1661_v2  ;;  %v1555_v62 = vadd.f32 1.0, %v6322_v60  ;;  %v6324_v52 = vpop.eup %6323  ;;  %v7901_v6 = vld [vmem:[#allocation3 + $0x150] sm:$0xff]  ;;  %v7904_v2 = vld [vmem:[#allocation3 + $0x68] sm:$0xff] }
 0x28f   : > { %6347 = vtanh.f32 %v1662_v61  ;;  %v6326_v5 = vpop.eup %6325  ;;  %v7911_v60 = vld [vmem:[#allocation3 + $0x70] sm:$0xff]  ;;  %v7914_v61 = vld [vmem:[#allocation3] sm:$0xff] }
 0x290   : > { %6349 = vrcp.f32 %v1553_v55  ;;  %v6328_v41 = vpop.eup %6327  ;;  %v7908_v55 = vld [vmem:[#allocation3 + $0x50] sm:$0xff] }
 0x291   : > { %6351 = vrcp.f32 %v1554_v14  ;;  %v6330_v56 = vpop.eup %6329  ;;  %v7918_v14 = vld [vmem:[#allocation3 + $0x8] sm:$0xff] }
 0x292   : > { %6353 = vrcp.f32 %v1555_v62  ;;  %v7921_v62 = vld [vmem:[#allocation3 + $0x78] sm:$0xff] }
 0x294   : > { %v6332_v10 = vpop.eup %6331 }
 0x295   : > { %v6334_v48 = vpop.eup %6333  ;;  %v1671_v38 = vsub.f32 %v7652_v36, %v6332_v10 }
 0x296   : > { %v6336_v35 = vpop.eup %6335 }
 0x297   : > { %v6338_v50 = vpop.eup %6337  ;;  %v1672_v30 = vsub.f32 %v7655_v3, %v6336_v35  ;;  %v1679_v32 = vmul.f32 %v6324_v52, %v1671_v38  ;;  %v7924_v52 = vld [vmem:[#allocation3 + $0x18] sm:$0xff]  ;;  %v7944_v38 = vld [vmem:[#allocation3 + $0x140] sm:$0xff] }
 0x298   : > { %v6340_v0 = vpop.eup %6339  ;;  %v1673_v11 = vsub.f32 %v7658_v47, %v6338_v50 }
 0x299   : > { %v6342_v12 = vpop.eup %6341  ;;  %v1674_v13 = vsub.f32 %v7666_v58, %v6340_v0  ;;  %v1680_v15 = vmul.f32 %v6326_v5, %v1672_v30  ;;  %v7848_v16 = vadd.f32 %v6332_v10, %v1679_v32  ;;  %v7928_v5 = vld [vmem:[#allocation3 + $0xc0] sm:$0xff]  ;;  %v7938_v10 = vld [vmem:[#allocation3 + $0xc8] sm:$0xff] }
 0x29a   : > { %v6344_v59 = vpop.eup %6343  ;;  %v1675_v17 = vsub.f32 %v7661_v46, %v6342_v12  ;;  %v1681_v36 = vmul.f32 %v6328_v41, %v1673_v11  ;;  %v7931_v41 = vld [vmem:[#allocation3 + $0x98] sm:$0xff]  ;;  %v7954_v30 = vld [vmem:[#allocation3 + $0xa0] sm:$0xff]  ;;  %v7958_v32 = vld [vmem:[#allocation3 + $0x88] sm:$0xff] }
 0x29b   : > { %v6346_v18 = vpop.eup %6345  ;;  %v1676_v19 = vsub.f32 %v7669_v7, %v6344_v59  ;;  %v1682_v3 = vmul.f32 %v6330_v56, %v1674_v13  ;;  %v7852_v44 = vadd.f32 %v6336_v35, %v1680_v15  ;;  %1695 = vst [vmem:[%s7156_s7 + $0x1] sm:$0x1] %v7848_v16  ;;  %v7934_v56 = vld [vmem:[#allocation3 + $0x28] sm:$0xff]  ;;  %v7948_v35 = vld [vmem:[#allocation3 + $0xf0] sm:$0xff]  ;;  %v7964_v11 = vld [vmem:[#allocation3 + $0xf8] sm:$0xff] }
 0x29c   : > { %v6348_v47 = vpop.eup %6347  ;;  %v1677_v58 = vsub.f32 %v7672_v33, %v6346_v18  ;;  %v1683_v20 = vmul.f32 %v6334_v48, %v1675_v17  ;;  %v7857_v45 = vadd.f32 %v6338_v50, %v1681_v36  ;;  %v7941_v48 = vld [vmem:[#allocation3 + $0x38] sm:$0xff]  ;;  %v7951_v50 = vld [vmem:[#allocation3 + $0x60] sm:$0xff]  ;;  %9266 = vst [vmem:[#allocation22_spill] sm:$0xff] %v7964_v11  ;;  %v7981_v17 = vld [vmem:[#allocation3 + $0x168] sm:$0xff] }
 0x29d   : > { %v6350_v49 = vpop.eup %6349  ;;  %v1678_v46 = vsub.f32 %v7683_v9, %v6348_v47  ;;  %v7860_v21 = vadd.f32 %v6340_v0, %v1682_v3  ;;  %1696 = vst [vmem:[%s7156_s7 + $0x9] sm:$0x1] %v7852_v44  ;;  %v1727_v26 = vcombine.low %v7848_v16, %v7852_v44  ;;  %v7961_v0 = vld [vmem:[#allocation3 + $0x170] sm:$0xff]  ;;  %v7971_v13 = vld [vmem:[#allocation3 + $0x20] sm:$0xff]  ;;  %v7974_v15 = vld [vmem:[#allocation3 + $0xb8] sm:$0xff] }
 0x29e   : > { %v6352_v7 = vpop.eup %6351  ;;  %v1684_v42 = vmul.f32 %v6350_v49, %v1676_v19  ;;  %v7864_v22 = vadd.f32 %v6342_v12, %v1683_v20  ;;  %1697 = vst [vmem:[%s7156_s7 + $0x11] sm:$0x1] %v7857_v45  ;;  %9265 = vst [vmem:[#allocation12_spill] sm:$0xff] %v7961_v0  ;;  %v7968_v12 = vld [vmem:[#allocation3 + $0xe8] sm:$0xff]  ;;  %v7984_v36 = vld [vmem:[#allocation3 + $0x120] sm:$0xff] }
 0x29f   : > { %v6354_v33 = vpop.eup %6353  ;;  %v1685_v23 = vmul.f32 %v6352_v7, %v1677_v58  ;;  %1698 = vst [vmem:[%s7156_s7 + $0x19] sm:$0x1] %v7860_v21  ;;  %v1728_v9 = vcombine.low %v7857_v45, %v7860_v21  ;;  %v1737_v37 = vrot.slane %v1727_v26, %v7542_v1  ;;  %9267 = vst [vmem:[#allocation13_spill] sm:$0xff] %v7968_v12  ;;  %v7991_v19 = vld [vmem:[#allocation3 + $0xe0] sm:$0xff]  ;;  %v8001_v58 = vld [vmem:[#allocation3 + $0x130] sm:$0xff] }
 0x2a0   : > { %v1686_v24 = vmul.f32 %v6354_v33, %v1678_v46  ;;  %v7872_v25 = vadd.f32 %v6344_v59, %v1684_v42  ;;  %1699 = vst [vmem:[%s7156_s7 + $0x21] sm:$0x1] %v7864_v22  ;;  %9268 = vst [vmem:[#allocation14_spill] sm:$0xff] %v7971_v13  ;;  %v7978_v59 = vld [vmem:[#allocation3 + $0xa8] sm:$0xff]  ;;  %v7994_v3 = vld [vmem:[#allocation3 + $0x80] sm:$0xff] }
 0x2a1   : > { %v7878_v27 = vadd.f32 %v6346_v18, %v1685_v23  ;;  %v1744_v31 = vrot.slane %v1728_v9, %v7542_v1  ;;  %9269 = vst [vmem:[#allocation25_spill] sm:$0xff] %v7974_v15  ;;  %9270 = vst [vmem:[#allocation15_spill] sm:$0xff] %v7978_v59  ;;  %v7988_v18 = vld [vmem:[#allocation3 + $0x138] sm:$0xff]  ;;  %v8004_v20 = vld [vmem:[#allocation3 + $0x100] sm:$0xff] }
 0x2a2   : > { %v7880_v28 = vadd.f32 %v6348_v47, %v1686_v24  ;;  %1700 = vst [vmem:[%s7156_s7 + $0x29] sm:$0x1] %v7872_v25  ;;  %v1729_v63 = vcombine.low %v7864_v22, %v7872_v25  ;;  %9271 = vst [vmem:[#allocation16_spill] sm:$0xff] %v7981_v17  ;;  %v7998_v47 = vld [vmem:[#allocation3 + $0xd8] sm:$0xff]  ;;  %v8008_v49 = vld [vmem:[#allocation3 + $0x148] sm:$0xff] }
 0x2a3   : > { %1701 = vst [vmem:[%s7156_s7 + $0x31] sm:$0x1] %v7878_v27  ;;  %v1759_v53 = vcombine.low %v1737_v37, %v1744_v31  ;;  %9272 = vst [vmem:[#allocation28_spill] sm:$0xff] %v7984_v36  ;;  %v8011_v46 = vld [vmem:[#allocation3 + $0x58] sm:$0xff]  ;;  %v8014_v7 = vld [vmem:[#allocation3 + $0x90] sm:$0xff] }
 0x2a4   : > { %1702 = vst [vmem:[%s7156_s7 + $0x39] sm:$0x1] %v7880_v28  ;;  %v1730_v34 = vcombine.low %v7878_v27, %v7880_v28  ;;  %v1751_v40 = vrot.slane %v1729_v63, %v7542_v1  ;;  %9273 = vst [vmem:[#allocation17_spill] sm:$0xff] %v7988_v18  ;;  %v8018_v42 = vld [vmem:[#allocation3 + $0x110] sm:$0xff]  ;;  %v8021_v33 = vld [vmem:[#allocation3 + $0x118] sm:$0xff] }
 0x2a5   : > { %v1767_v57 = vrot.slane %v1759_v53, %v7542_v1  ;;  %9274 = vst [vmem:[#allocation18_spill] sm:$0xff] %v7991_v19  ;;  %9275 = vst [vmem:[#allocation31_spill] sm:$0xff] %v7994_v3  ;;  %v8024_v23 = vld [vmem:[#allocation3 + $0x178] sm:$0xff]  ;;  %v8028_v9 = vld [vmem:[#allocation3 + $0x40] sm:$0xff] }
 0x2a6   : > { %v1758_v51 = vrot.slane %v1730_v34, %v7542_v1  ;;  %9276 = vst [vmem:[#allocation19_spill] sm:$0xff] %v7998_v47  ;;  %9277 = vst [vmem:[#allocation20_spill] sm:$0xff] %v8001_v58  ;;  %v8031_v24 = vld [vmem:[#allocation3 + $0x108] sm:$0xff]  ;;  %v8034_v26 = vld [vmem:[#allocation3 + $0x160] sm:$0xff] }
 0x2a7   : > { %9278 = vst [vmem:[#allocation33_spill] sm:$0xff] %v8004_v20  ;;  %9279 = vst [vmem:[#allocation21_spill] sm:$0xff] %v8008_v49  ;;  %v8038_v63 = vld [vmem:[#allocation3 + $0x48] sm:$0xff]  ;;  %v8044_v34 = vld [vmem:[#allocation3 + $0xd0] sm:$0xff] }
 0x2a8   : > { %v1760_v39 = vcombine.low %v1751_v40, %v1758_v51  ;;  %9280 = vst [vmem:[#allocation23_spill] sm:$0xff] %v8011_v46  ;;  %9281 = vst [vmem:[#allocation34_spill] sm:$0xff] %v8014_v7  ;;  %v8041_v31 = vld [vmem:[#allocation3 + $0x128] sm:$0xff]  ;;  %v8048_v37 = vld [vmem:[#allocation3 + $0xb0] sm:$0xff] }
 0x2a9   : > { %9282 = vst [vmem:[#allocation24_spill] sm:$0xff] %v8018_v42  ;;  %9283 = vst [vmem:[#allocation26_spill] sm:$0xff] %v8021_v33  ;;  %v8052_v40 = vld [vmem:[#allocation3 + $0x10] sm:$0xff] }
 0x2aa   : > { %v1774_v43 = vrot.slane %v1760_v39, %v7542_v1  ;;  %9284 = vst [vmem:[#allocation35_spill] sm:$0xff] %v8024_v23  ;;  %9285 = vst [vmem:[#allocation27_spill] sm:$0xff] %v8028_v9 }
 0x2ab   : > { %9286 = vst [vmem:[#allocation29_spill] sm:$0xff] %v8031_v24  ;;  %9287 = vst [vmem:[#allocation36_spill] sm:$0xff] %v8034_v26 }
 0x2ac   : > { %v1775_v29 = vcombine.low %v1767_v57, %v1774_v43  ;;  %9288 = vst [vmem:[#allocation30_spill] sm:$0xff] %v8038_v63  ;;  %9289 = vst [vmem:[#allocation32_spill] sm:$0xff] %v8041_v31 }
 0x2ad   : > { %9290 = vst [vmem:[#allocation37_spill] sm:$0xff] %v8044_v34  ;;  %9291 = vst [vmem:[#allocation38_spill] sm:$0xff] %v8048_v37 }
 0x2ae   : > { %1842 = vmatmul.mubr.f32.vlgmr.msra.gmra.mxu0 %v1775_v29  ;;  %5971 = vmatmul.mubr.f32.vlgmr.msra.gmra.mxu1 %v1775_v29  ;;  %9292 = vst [vmem:[#allocation39_spill] sm:$0xff] %v8052_v40  ;;  %v8063_v29 = vld [vmem:[%s7154_s6 + $0x2] ss:$8 sm:$0x7] }
 0x2af   : > { %2376 = vmatpush1.msra.mxu0 %v7898_v8  ;;  %5974 = vmatpush3.msra.mxu1 %v7901_v6 }
 0x2b0   : > { %2377 = vmatprep.subr.mxu0 %v7904_v2  ;;  %5975 = vmatprep.subr.mxu1 %v9237_v4 }
 0x2b1   : > { %2378 = vmatpush1.msra.mxu0 %v7908_v55  ;;  %5976 = vmatpush3.msra.mxu1 %v7911_v60 }
 0x2b2   : > { %2379 = vmatprep.subr.mxu0 %v7914_v61  ;;  %5977 = vmatprep.subr.mxu1 %v9237_v4 }
 0x2b3   : > { %2380 = vmatpush1.msra.mxu0 %v7918_v14  ;;  %5978 = vmatpush3.msra.mxu1 %v7921_v62 }
 0x2b4   : > { %2381 = vmatprep.subr.mxu0 %v7924_v52  ;;  %5979 = vmatprep.subr.mxu1 %v9237_v4 }
 0x2b5   : > { %2382 = vmatpush1.msra.mxu0 %v7928_v5  ;;  %5980 = vmatpush3.msra.mxu1 %v7931_v41 }
 0x2b6   : > { %2383 = vmatprep.subr.mxu0 %v7934_v56  ;;  %5981 = vmatprep.subr.mxu1 %v9237_v4 }
 0x2b7   : > { %2384 = vmatpush1.msra.mxu0 %v7938_v10  ;;  %5982 = vmatpush3.msra.mxu1 %v7941_v48 }
 0x2b8   : > { %2385 = vmatprep.subr.mxu0 %v7944_v38  ;;  %5983 = vmatprep.subr.mxu1 %v9237_v4 }
 0x2b9   : > { %2386 = vmatpush1.msra.mxu0 %v7948_v35  ;;  %5984 = vmatpush3.msra.mxu1 %v7951_v50 }
 0x2ba   : > { %2387 = vmatprep.subr.mxu0 %v7954_v30  ;;  %5985 = vmatprep.subr.mxu1 %v9237_v4 }
 0x2bb   : > { %2388 = vmatpush1.msra.mxu0 %v7958_v32  ;;  %5986 = vmatpush3.msra.mxu1 %v7961_v0 }
 0x2bc   : > { %2389 = vmatprep.subr.mxu0 %v7964_v11  ;;  %5987 = vmatprep.subr.mxu1 %v9237_v4 }
 0x2bd   : > { %2390 = vmatpush1.msra.mxu0 %v7968_v12  ;;  %5988 = vmatpush3.msra.mxu1 %v7971_v13 }
 0x2be   : > { %2391 = vmatprep.subr.mxu0 %v7974_v15  ;;  %5989 = vmatprep.subr.mxu1 %v9237_v4  ;;  %v2040_v15 = vrot.slane %v8063_v29, 1 }
 0x2bf   : > { %2392 = vmatpush1.msra.mxu0 %v7978_v59  ;;  %5990 = vmatpush3.msra.mxu1 %v7981_v17 }
 0x2c0   : > { %2393 = vmatprep.subr.mxu0 %v7984_v36  ;;  %5991 = vmatprep.subr.mxu1 %v9237_v4 }
 0x2c1   : > { %2394 = vmatpush1.msra.mxu0 %v7988_v18  ;;  %5992 = vmatpush3.msra.mxu1 %v7991_v19 }
 0x2c2   : > { %2395 = vmatprep.subr.mxu0 %v7994_v3  ;;  %5993 = vmatprep.subr.mxu1 %v9237_v4 }
 0x2c3   : > { %2396 = vmatpush1.msra.mxu0 %v7998_v47  ;;  %5994 = vmatpush3.msra.mxu1 %v8001_v58 }
 0x2c4   : > { %2397 = vmatprep.subr.mxu0 %v8004_v20  ;;  %5995 = vmatprep.subr.mxu1 %v9237_v4  ;;  %v8091_v20 = vld [vmem:[%s7154_s6 + $0xaa] ss:$8 sm:$0x7] }
 0x2c5   : > { %2398 = vmatpush1.msra.mxu0 %v8008_v49  ;;  %5996 = vmatpush3.msra.mxu1 %v8011_v46 }
 0x2c6   : > { %2399 = vmatprep.subr.mxu0 %v8014_v7  ;;  %5997 = vmatprep.subr.mxu1 %v9237_v4 }
 0x2c7   : > { %2400 = vmatpush1.msra.mxu0 %v8018_v42  ;;  %5998 = vmatpush3.msra.mxu1 %v8021_v33  ;;  %v8085_v33 = vld [vmem:[%s7154_s6 + $0x92] ss:$8 sm:$0x7] }
 0x2c8   : > { %2401 = vmatprep.subr.mxu0 %v8024_v23  ;;  %5999 = vmatprep.subr.mxu1 %v9237_v4 }
 0x2c9   : > { %2402 = vmatpush1.msra.mxu0 %v8028_v9  ;;  %6000 = vmatpush3.msra.mxu1 %v8031_v24 }
 0x2ca   : > { %2403 = vmatprep.subr.mxu0 %v8034_v26  ;;  %6001 = vmatprep.subr.mxu1 %v9237_v4  ;;  %v8077_v26 = vld [vmem:[%s7154_s6 + $0x62] ss:$8 sm:$0x7] }
 0x2cb   : > { %2404 = vmatpush1.msra.mxu0 %v8038_v63  ;;  %6002 = vmatpush3.msra.mxu1 %v8041_v31  ;;  %v8068_v31 = vld [vmem:[%s7154_s6 + $0x1a] ss:$8 sm:$0x7] }
 0x2cc   : > { %2405 = vmatprep.subr.mxu0 %v8044_v34  ;;  %6003 = vmatprep.subr.mxu1 %v9237_v4  ;;  %v8074_v63 = vld [vmem:[%s7154_s6 + $0x4a] ss:$8 sm:$0x7] }
 0x2cd   : > { %2406 = vmatpush1.msra.mxu0 %v8048_v37  ;;  %2439 = vmatprep.mubr.f32.mxu0 %v9237_v4 }
 0x2ce   : > { %6004 = vmatpush3.msra.mxu1 %v8052_v40  ;;  %6005 = vmatprep.mubr.msk.f32.mxu1 %vm7028_vm0, %v9237_v4 }
 0x2cf   : > { %2973 = vmatprep.subr.mxu0 %v7770_v54  ;;  %6008 = vmatprep.subr.mxu1 %v9237_v4  ;;  %v8071_v54 = vld [vmem:[%s7154_s6 + $0x32] ss:$8 sm:$0x7] }
 0x36e   : > { %v1843_v51 = vpop.f32.mrf.mxu0  ;;  %v8059_v53 = vpop.f32.mrf.mxu1 }
 0x36f   : > { %v1919_v39 = vcombine.high %v1843_v51, %v1843_v51  ;;  %v1926_v57 = vrot.slane %v1843_v51, %v7542_v1 }
 0x370   : > { %v5972_v43 = vpop.f32.mrf.mxu1  ;;  %v1845_v23 = vpop.f32.mrf.mxu0 }
 0x371   : > { %v1933_v40 = vrot.slane %v1919_v39, %v7542_v1  ;;  %v1934_v37 = vcombine.high %v1926_v57, %v1926_v57  ;;  %v1942_v34 = vrot.slane %v1926_v57, %v7542_v1  ;;  %v8082_v39 = vld [vmem:[%s7154_s6 + $0x7a] ss:$8 sm:$0x7]  ;;  %v2057_v47 = vcombine.high %v1845_v23, %v1845_v23 }
 0x373   : > { %v1935_v24 = vcombine.high %v1933_v40, %v1933_v40  ;;  %v1949_v51 = vrot.slane %v1933_v40, %v7542_v1  ;;  %v1956_v43 = vrot.slane %v1934_v37, %v7542_v1  ;;  %v1964_v9 = vcombine.high %v1942_v34, %v1942_v34 }
 0x374   : > { %v1976_v57 = vadd.f32 %v8063_v29, %v1942_v34 }
 0x375   : > { %v1963_v42 = vrot.slane %v1935_v24, %v7542_v1  ;;  %v1965_v7 = vcombine.high %v1949_v51, %v1949_v51  ;;  %v1966_v46 = vcombine.high %v1956_v43, %v1956_v43  ;;  %v1977_v49 = vadd.f32 %v8068_v31, %v1956_v43 }
 0x376   : > { %v1978_v40 = vadd.f32 %v8071_v54, %v1964_v9  ;;  %v1980_v37 = vadd.f32 %v8077_v26, %v1949_v51  ;;  %v5589_v58 = vmul.f32 -1.442695, %v1976_v57  ;;  %v2064_v9 = vrot.slane %v1845_v23, %v7542_v1 }
 0x377   : > { %v1967_v3 = vcombine.high %v1963_v42, %v1963_v42  ;;  %v1979_v19 = vadd.f32 %v8074_v63, %v1966_v46  ;;  %v1981_v18 = vadd.f32 %v8082_v39, %v1963_v42  ;;  %v1982_v34 = vadd.f32 %v8085_v33, %v1965_v7 }
 0x378   : > { %6355 = vpow2.f32 %v5589_v58  ;;  %v5590_v24 = vmul.f32 -1.442695, %v1977_v49  ;;  %v5591_v36 = vmul.f32 -1.442695, %v1978_v40  ;;  %v5593_v59 = vmul.f32 -1.442695, %v1980_v37 }
 0x379   : > { %v1983_v43 = vadd.f32 %v8091_v20, %v1967_v3  ;;  %v5592_v17 = vmul.f32 -1.442695, %v1979_v19  ;;  %v5594_v51 = vmul.f32 -1.442695, %v1981_v18  ;;  %v5595_v57 = vmul.f32 -1.442695, %v1982_v34 }
 0x37a   : > { %6357 = vpow2.f32 %v5590_v24  ;;  %v2071_v46 = vrot.slane %v2057_v47, %v7542_v1  ;;  %v2041_v58 = vrot.slane %v8068_v31, 1  ;;  %v2042_v49 = vrot.slane %v8071_v54, 1 }
 0x37b   : > { %6359 = vpow2.f32 %v5591_v36  ;;  %v5596_v42 = vmul.f32 -1.442695, %v1983_v43  ;;  %v2044_v19 = vrot.slane %v8077_v26, 1  ;;  %v2072_v3 = vcombine.high %v2064_v9, %v2064_v9 }
 0x37c   : > { %6361 = vpow2.f32 %v5592_v17  ;;  %v2080_v7 = vrot.slane %v2064_v9, %v7542_v1  ;;  %v2043_v36 = vrot.slane %v8074_v63, 1  ;;  %v2087_v18 = vrot.slane %v2071_v46, %v7542_v1 }
 0x37d   : > { %6363 = vpow2.f32 %v5593_v59  ;;  %v2073_v23 = vcombine.high %v2071_v46, %v2071_v46  ;;  %v2094_v17 = vrot.slane %v2072_v3, %v7542_v1 }
 0x37e   : > { %6365 = vpow2.f32 %v5594_v51  ;;  %v2102_v47 = vcombine.high %v2080_v7, %v2080_v7  ;;  %v2114_v40 = vadd.f32 %v2080_v7, %v2040_v15  ;;  %v2118_v24 = vadd.f32 %v2087_v18, %v2044_v19 }
 0x37f   : > { %6367 = vpow2.f32 %v5595_v57  ;;  %v2104_v37 = vcombine.high %v2094_v17, %v2094_v17  ;;  %v2115_v34 = vadd.f32 %v2094_v17, %v2041_v58  ;;  %v2101_v13 = vrot.slane %v2073_v23, %v7542_v1 }
 0x380   : > { %6369 = vpow2.f32 %v5596_v42  ;;  %v2116_v59 = vadd.f32 %v2102_v47, %v2042_v49  ;;  %v5597_v43 = vmul.f32 -1.442695, %v2114_v40  ;;  %v2045_v57 = vrot.slane %v8082_v39, 1  ;;  %v8112_v49 = vld [vmem:[#allocation4] ss:$0 sm:$0xff] }
 0x381   : > { %v2117_v9 = vadd.f32 %v2104_v37, %v2043_v36  ;;  %v5598_v51 = vmul.f32 -1.442695, %v2115_v34  ;;  %v5601_v3 = vmul.f32 -1.442695, %v2118_v24  ;;  %v2046_v15 = vrot.slane %v8085_v33, 1 }
 0x382   : > { %v5599_v12 = vmul.f32 -1.442695, %v2116_v59  ;;  %6371 = vpow2.f32 %v5597_v43  ;;  %v2103_v42 = vcombine.high %v2087_v18, %v2087_v18  ;;  %v2170_v19 = vadd.f32 %v8112_v49, %v8059_v53 }
 0x383   : > { %6373 = vpow2.f32 %v5598_v51  ;;  %v5600_v46 = vmul.f32 -1.442695, %v2117_v9  ;;  %v2047_v7 = vrot.slane %v8091_v20, 1  ;;  %v2105_v36 = vcombine.high %v2101_v13, %v2101_v13 }
 0x384   : > { %6375 = vpow2.f32 %v5599_v12  ;;  %v2120_v12 = vadd.f32 %v2103_v42, %v2046_v15  ;;  %v2172_v24 = vcombine.high %v2170_v19, %v2170_v19  ;;  %v2179_v51 = vrot.slane %v2170_v19, %v7542_v1 }
 0x385   : > { %v6356_v11 = vpop.eup %6355  ;;  %6377 = vpow2.f32 %v5600_v46  ;;  %v2121_v53 = vadd.f32 %v2105_v36, %v2047_v7 }
 0x386   : > { %v2008_v0 = vadd.f32 1.0, %v6356_v11  ;;  %v2119_v11 = vadd.f32 %v2101_v13, %v2045_v57  ;;  %v5603_v57 = vmul.f32 -1.442695, %v2120_v12  ;;  %v2187_v42 = vcombine.high %v2179_v51, %v2179_v51 }
 0x387   : > { %v6358_v58 = vpop.eup %6357  ;;  %v5604_v15 = vmul.f32 -1.442695, %v2121_v53  ;;  %v2240_v53 = vrot.slane %v8074_v63, 2 }
 0x388   : > { %v6360_v23 = vpop.eup %6359  ;;  %v2009_v17 = vadd.f32 1.0, %v6358_v58  ;;  %6379 = vrcp.f32 %v2008_v0  ;;  %v5602_v58 = vmul.f32 -1.442695, %v2119_v11 }
 0x389   : > { %v6362_v47 = vpop.eup %6361  ;;  %v2010_v40 = vadd.f32 1.0, %v6360_v23  ;;  %6381 = vpow2.f32 %v5601_v3  ;;  %v2186_v3 = vrot.slane %v2172_v24, %v7542_v1  ;;  %v2239_v24 = vrot.slane %v8071_v54, 2 }
 0x38a   : > { %v6364_v37 = vpop.eup %6363  ;;  %v2011_v18 = vadd.f32 1.0, %v6362_v47  ;;  %6383 = vrcp.f32 %v2009_v17  ;;  %v2195_v47 = vrot.slane %v2179_v51, %v7542_v1 }
 0x38b   : > { %v6366_v34 = vpop.eup %6365  ;;  %v2012_v59 = vadd.f32 1.0, %v6364_v37  ;;  %6385 = vrcp.f32 %v2010_v40  ;;  %v2188_v19 = vcombine.high %v2186_v3, %v2186_v3  ;;  %v2237_v37 = vrot.slane %v8063_v29, 2 }
 0x38c   : > { %v6368_v43 = vpop.eup %6367  ;;  %v2013_v9 = vadd.f32 1.0, %v6366_v34  ;;  %6387 = vrcp.f32 %v2011_v18  ;;  %v2209_v18 = vrot.slane %v2187_v42, %v7542_v1  ;;  %v2202_v51 = vrot.slane %v2186_v3, %v7542_v1 }
 0x38d   : > { %v6370_v46 = vpop.eup %6369  ;;  %v2014_v0 = vadd.f32 1.0, %v6368_v43  ;;  %6389 = vrcp.f32 %v2012_v59  ;;  %v2238_v59 = vrot.slane %v8068_v31, 2  ;;  %v2216_v29 = vrot.slane %v2188_v19, %v7542_v1 }
 0x38e   : > { %v2015_v13 = vadd.f32 1.0, %v6370_v46  ;;  %6391 = vrcp.f32 %v2013_v9  ;;  %v2241_v46 = vrot.slane %v8077_v26, 2  ;;  %v2219_v31 = vcombine.high %v2209_v18, %v2209_v18 }
 0x38f   : > { %6393 = vrcp.f32 %v2014_v0  ;;  %v6372_v23 = vpop.eup %6371  ;;  %v2243_v26 = vrot.slane %v8085_v33, 2 }
 0x390   : > { %6395 = vrcp.f32 %v2015_v13  ;;  %v6374_v7 = vpop.eup %6373  ;;  %v2146_v36 = vadd.f32 1.0, %v6372_v23  ;;  %v2217_v13 = vcombine.high %v2195_v47, %v2195_v47  ;;  %v2242_v23 = vrot.slane %v8082_v39, 2 }
 0x391   : > { %6397 = vpow2.f32 %v5602_v58  ;;  %v6376_v17 = vpop.eup %6375  ;;  %v2147_v40 = vadd.f32 1.0, %v6374_v7 }
 0x392   : > { %6399 = vpow2.f32 %v5603_v57  ;;  %v6378_v11 = vpop.eup %6377  ;;  %v2148_v12 = vadd.f32 1.0, %v6376_v17 }
 0x393   : > { %6401 = vpow2.f32 %v5604_v15  ;;  %v2149_v43 = vadd.f32 1.0, %v6378_v11 }
 0x394   : > { %6403 = vrcp.f32 %v2146_v36  ;;  %v2244_v36 = vrot.slane %v8091_v20, 2 }
 0x395   : > { %v6380_v34 = vpop.eup %6379  ;;  %6405 = vrcp.f32 %v2147_v40  ;;  %v2218_v40 = vcombine.high %v2202_v51, %v2202_v51 }
 0x396   : > { %v6382_v9 = vpop.eup %6381  ;;  %v2229_v0 = vmul.f32 %v6380_v34, %v2195_v47  ;;  %6407 = vrcp.f32 %v2148_v12 }
 0x397   : > { %v6384_v58 = vpop.eup %6383  ;;  %v2150_v57 = vadd.f32 1.0, %v6382_v9  ;;  %6409 = vrcp.f32 %v2149_v43 }
 0x398   : > { %v6386_v15 = vpop.eup %6385  ;;  %v2230_v42 = vmul.f32 %v6384_v58, %v2209_v18  ;;  %v2253_v54 = vadd.f32 %v2237_v37, %v2229_v0  ;;  %v2220_v18 = vcombine.high %v2216_v29, %v2216_v29 }
 0x399   : > { %v6388_v63 = vpop.eup %6387  ;;  %v2231_v7 = vmul.f32 %v6386_v15, %v2217_v13 }
 0x39a   : > { %v6390_v3 = vpop.eup %6389  ;;  %v2232_v17 = vmul.f32 %v6388_v63, %v2219_v31  ;;  %v2254_v19 = vadd.f32 %v2238_v59, %v2230_v42  ;;  %6411 = vtanh.f32 %v2253_v54 }
 0x39b   : > { %v6392_v47 = vpop.eup %6391  ;;  %v2233_v11 = vmul.f32 %v6390_v3, %v2202_v51  ;;  %v2255_v34 = vadd.f32 %v2239_v24, %v2231_v7  ;;  %6413 = vrcp.f32 %v2150_v57 }
 0x39c   : > { %v6394_v37 = vpop.eup %6393  ;;  %v2234_v12 = vmul.f32 %v6392_v47, %v2216_v29  ;;  %v2256_v9 = vadd.f32 %v2240_v53, %v2232_v17  ;;  %6415 = vtanh.f32 %v2254_v19 }
 0x39d   : > { %v6396_v39 = vpop.eup %6395  ;;  %v2235_v33 = vmul.f32 %v6394_v37, %v2218_v40  ;;  %v2257_v0 = vadd.f32 %v2241_v46, %v2233_v11  ;;  %6417 = vtanh.f32 %v2255_v34 }
 0x39e   : > { %v6398_v43 = vpop.eup %6397  ;;  %v2236_v58 = vmul.f32 %v6396_v39, %v2220_v18  ;;  %v2258_v20 = vadd.f32 %v2242_v23, %v2234_v12  ;;  %6419 = vtanh.f32 %v2256_v9 }
 0x39f   : > { %v6400_v59 = vpop.eup %6399  ;;  %v2259_v13 = vadd.f32 %v2243_v26, %v2235_v33  ;;  %6421 = vtanh.f32 %v2257_v0  ;;  %v2151_v15 = vadd.f32 1.0, %v6398_v43 }
 0x3a0   : > { %v6402_v51 = vpop.eup %6401  ;;  %v2260_v24 = vadd.f32 %v2244_v36, %v2236_v58  ;;  %6423 = vtanh.f32 %v2258_v20  ;;  %v2152_v57 = vadd.f32 1.0, %v6400_v59 }
 0x3a1   : > { %6425 = vtanh.f32 %v2259_v13  ;;  %v2153_v29 = vadd.f32 1.0, %v6402_v51  ;;  %v6404_v53 = vpop.eup %6403 }
 0x3a2   : > { %6427 = vtanh.f32 %v2260_v24  ;;  %v6406_v31 = vpop.eup %6405 }
 0x3a3   : > { %6429 = vrcp.f32 %v2151_v15  ;;  %v6408_v46 = vpop.eup %6407 }
 0x3a4   : > { %6431 = vrcp.f32 %v2152_v57  ;;  %v6410_v42 = vpop.eup %6409 }
 0x3a5   : > { %6433 = vrcp.f32 %v2153_v29 }
 0x3a7   : > { %v6412_v54 = vpop.eup %6411 }
 0x3a8   : > { %v6414_v63 = vpop.eup %6413  ;;  %v2269_v23 = vsub.f32 %v7848_v16, %v6412_v54 }
 0x3a9   : > { %v6416_v26 = vpop.eup %6415 }
 0x3aa   : > { %v6418_v7 = vpop.eup %6417  ;;  %v2270_v3 = vsub.f32 %v7852_v44, %v6416_v26  ;;  %v2277_v36 = vmul.f32 %v6404_v53, %v2269_v23 }
 0x3ab   : > { %v6420_v17 = vpop.eup %6419  ;;  %v2271_v19 = vsub.f32 %v7857_v45, %v6418_v7 }
 0x3ac   : > { %v6422_v47 = vpop.eup %6421  ;;  %v2272_v40 = vsub.f32 %v7860_v21, %v6420_v17  ;;  %v2278_v11 = vmul.f32 %v6406_v31, %v2270_v3  ;;  %v8135_v34 = vadd.f32 %v6412_v54, %v2277_v36 }
 0x3ad   : > { %v6424_v37 = vpop.eup %6423  ;;  %v2273_v18 = vsub.f32 %v7864_v22, %v6422_v47  ;;  %v2279_v16 = vmul.f32 %v6408_v46, %v2271_v19  ;;  %v9313_v19 = vld [vmem:[#allocation27_spill] sm:$0xff] }
 0x3ae   : > { %v6426_v12 = vpop.eup %6425  ;;  %v2274_v9 = vsub.f32 %v7872_v25, %v6424_v37  ;;  %v2280_v44 = vmul.f32 %v6410_v42, %v2272_v40  ;;  %v8139_v39 = vadd.f32 %v6416_v26, %v2278_v11  ;;  %2293 = vst [vmem:[%s7156_s7 + $0x2] sm:$0x1] %v8135_v34  ;;  %v9315_v40 = vld [vmem:[#allocation36_spill] sm:$0xff]  ;;  %v9316_v11 = vld [vmem:[#allocation30_spill] sm:$0xff] }
 0x3af   : > { %v6428_v45 = vpop.eup %6427  ;;  %v2275_v21 = vsub.f32 %v7878_v27, %v6426_v12  ;;  %v2281_v33 = vmul.f32 %v6414_v63, %v2273_v18  ;;  %v8144_v0 = vadd.f32 %v6418_v7, %v2279_v16  ;;  %v9318_v18 = vld [vmem:[#allocation37_spill] sm:$0xff]  ;;  %v9319_v16 = vld [vmem:[#allocation38_spill] sm:$0xff] }
 0x3b0   : > { %v6430_v43 = vpop.eup %6429  ;;  %v2276_v22 = vsub.f32 %v7880_v28, %v6428_v45  ;;  %v8147_v58 = vadd.f32 %v6420_v17, %v2280_v44  ;;  %2294 = vst [vmem:[%s7156_s7 + $0xa] sm:$0x1] %v8139_v39  ;;  %v2325_v24 = vcombine.low %v8135_v34, %v8139_v39  ;;  %v9312_v17 = vld [vmem:[#allocation35_spill] sm:$0xff] }
 0x3b1   : > { %v6432_v25 = vpop.eup %6431  ;;  %v2282_v20 = vmul.f32 %v6430_v43, %v2274_v9  ;;  %v8151_v59 = vadd.f32 %v6422_v47, %v2281_v33  ;;  %2295 = vst [vmem:[%s7156_s7 + $0x12] sm:$0x1] %v8144_v0  ;;  %v9314_v47 = vld [vmem:[#allocation29_spill] sm:$0xff]  ;;  %v8250_v9 = vld [vmem:[#allocation3 + $0x158] sm:$0xff] }
 0x3b2   : > { %v6434_v27 = vpop.eup %6433  ;;  %v2283_v13 = vmul.f32 %v6432_v25, %v2275_v21  ;;  %2296 = vst [vmem:[%s7156_s7 + $0x1a] sm:$0x1] %v8147_v58  ;;  %v2326_v28 = vcombine.low %v8144_v0, %v8147_v58  ;;  %v2335_v42 = vrot.slane %v2325_v24, %v7542_v1  ;;  %v8272_v24 = vld [vmem:[%s7154_s6 + $0x63] ss:$8 sm:$0x7] }
 0x3b3   : > { %v2284_v15 = vmul.f32 %v6434_v27, %v2276_v22  ;;  %v8159_v51 = vadd.f32 %v6424_v37, %v2282_v20  ;;  %2297 = vst [vmem:[%s7156_s7 + $0x22] sm:$0x1] %v8151_v59  ;;  %v9317_v37 = vld [vmem:[#allocation32_spill] sm:$0xff] }
 0x3b4   : > { %v8165_v57 = vadd.f32 %v6426_v12, %v2283_v13  ;;  %v2342_v31 = vrot.slane %v2326_v28, %v7542_v1  ;;  %v9320_v12 = vld [vmem:[#allocation39_spill] sm:$0xff]  ;;  %v8258_v22 = vld [vmem:[%s7154_s6 + $0x3] ss:$8 sm:$0x7] }
 0x3b5   : > { %v8167_v29 = vadd.f32 %v6428_v45, %v2284_v15  ;;  %2298 = vst [vmem:[%s7156_s7 + $0x2a] sm:$0x1] %v8159_v51  ;;  %v2327_v53 = vcombine.low %v8151_v59, %v8159_v51  ;;  %v8263_v13 = vld [vmem:[%s7154_s6 + $0x1b] ss:$8 sm:$0x7] }
 0x3b6   : > { %2299 = vst [vmem:[%s7156_s7 + $0x32] sm:$0x1] %v8165_v57  ;;  %v2357_v23 = vcombine.low %v2335_v42, %v2342_v31  ;;  %v8266_v28 = vld [vmem:[%s7154_s6 + $0x33] ss:$8 sm:$0x7] }
 0x3b7   : > { %2300 = vst [vmem:[%s7156_s7 + $0x3a] sm:$0x1] %v8167_v29  ;;  %v2328_v46 = vcombine.low %v8165_v57, %v8167_v29  ;;  %v2349_v54 = vrot.slane %v2327_v53, %v7542_v1  ;;  %v8269_v15 = vld [vmem:[%s7154_s6 + $0x4b] ss:$8 sm:$0x7] }
 0x3b8   : > { %v2365_v7 = vrot.slane %v2357_v23, %v7542_v1  ;;  %v8280_v23 = vld [vmem:[%s7154_s6 + $0x93] ss:$8 sm:$0x7] }
 0x3b9   : > { %v2356_v63 = vrot.slane %v2328_v46, %v7542_v1 }
 0x3bb   : > { %v2358_v26 = vcombine.low %v2349_v54, %v2356_v63  ;;  %v8277_v63 = vld [vmem:[%s7154_s6 + $0x7b] ss:$8 sm:$0x7] }
 0x3bd   : > { %v2372_v3 = vrot.slane %v2358_v26, %v7542_v1 }
 0x3bf   : > { %v2373_v36 = vcombine.low %v2365_v7, %v2372_v3 }
 0x3c1   : > { %2440 = vmatmul.mubr.f32.vlgmr.msra.gmra.mxu0 %v2373_v36  ;;  %6006 = vmatmul.mubr.f32.vlgmr.msra.gmra.mxu1 %v2373_v36 }
 0x3c2   : > { %2974 = vmatpush1.msra.mxu0 %v7898_v8  ;;  %6009 = vmatpush3.msra.mxu1 %v7901_v6  ;;  %v9293_v8 = vld [vmem:[#allocation12_spill] sm:$0xff]  ;;  %v9294_v6 = vld [vmem:[#allocation22_spill] sm:$0xff] }
 0x3c3   : > { %2975 = vmatprep.subr.mxu0 %v7904_v2  ;;  %6010 = vmatprep.subr.mxu1 %v9237_v4  ;;  %v9295_v2 = vld [vmem:[#allocation13_spill] sm:$0xff] }
 0x3c4   : > { %2976 = vmatpush1.msra.mxu0 %v7908_v55  ;;  %6011 = vmatpush3.msra.mxu1 %v7911_v60  ;;  %v9296_v55 = vld [vmem:[#allocation14_spill] sm:$0xff]  ;;  %v9297_v60 = vld [vmem:[#allocation25_spill] sm:$0xff] }
 0x3c5   : > { %2977 = vmatprep.subr.mxu0 %v7914_v61  ;;  %6012 = vmatprep.subr.mxu1 %v9237_v4  ;;  %v9298_v61 = vld [vmem:[#allocation15_spill] sm:$0xff] }
 0x3c6   : > { %2978 = vmatpush1.msra.mxu0 %v7918_v14  ;;  %6013 = vmatpush3.msra.mxu1 %v7921_v62  ;;  %v9299_v14 = vld [vmem:[#allocation16_spill] sm:$0xff] }
 0x3c7   : > { %2979 = vmatprep.subr.mxu0 %v7924_v52  ;;  %6014 = vmatprep.subr.mxu1 %v9237_v4  ;;  %v9300_v62 = vld [vmem:[#allocation28_spill] sm:$0xff]  ;;  %v9301_v52 = vld [vmem:[#allocation17_spill] sm:$0xff] }
 0x3c8   : > { %2980 = vmatpush1.msra.mxu0 %v7928_v5  ;;  %6015 = vmatpush3.msra.mxu1 %v7931_v41  ;;  %v9302_v5 = vld [vmem:[#allocation18_spill] sm:$0xff]  ;;  %v9303_v41 = vld [vmem:[#allocation31_spill] sm:$0xff] }
 0x3c9   : > { %2981 = vmatprep.subr.mxu0 %v7934_v56  ;;  %6016 = vmatprep.subr.mxu1 %v9237_v4  ;;  %v9304_v56 = vld [vmem:[#allocation19_spill] sm:$0xff] }
 0x3ca   : > { %2982 = vmatpush1.msra.mxu0 %v7938_v10  ;;  %6017 = vmatpush3.msra.mxu1 %v7941_v48  ;;  %v9305_v10 = vld [vmem:[#allocation20_spill] sm:$0xff]  ;;  %v9306_v48 = vld [vmem:[#allocation33_spill] sm:$0xff] }
 0x3cb   : > { %2983 = vmatprep.subr.mxu0 %v7944_v38  ;;  %6018 = vmatprep.subr.mxu1 %v9237_v4  ;;  %v9307_v38 = vld [vmem:[#allocation21_spill] sm:$0xff] }
 0x3cc   : > { %2984 = vmatpush1.msra.mxu0 %v7948_v35  ;;  %6019 = vmatpush3.msra.mxu1 %v7951_v50  ;;  %v9308_v35 = vld [vmem:[#allocation23_spill] sm:$0xff]  ;;  %v9309_v50 = vld [vmem:[#allocation34_spill] sm:$0xff] }
 0x3cd   : > { %2985 = vmatprep.subr.mxu0 %v7954_v30  ;;  %6020 = vmatprep.subr.mxu1 %v9237_v4  ;;  %v9310_v30 = vld [vmem:[#allocation24_spill] sm:$0xff] }
 0x3ce   : > { %2986 = vmatpush1.msra.mxu0 %v7958_v32  ;;  %6021 = vmatpush3.msra.mxu1 %v9293_v8  ;;  %v9311_v32 = vld [vmem:[#allocation26_spill] sm:$0xff] }
 0x3cf   : > { %2987 = vmatprep.subr.mxu0 %v9294_v6  ;;  %6022 = vmatprep.subr.mxu1 %v9237_v4  ;;  %v8286_v6 = vld [vmem:[%s7154_s6 + $0xab] ss:$8 sm:$0x7] }
 0x3d0   : > { %2988 = vmatpush1.msra.mxu0 %v9295_v2  ;;  %6023 = vmatpush3.msra.mxu1 %v9296_v55 }
 0x3d1   : > { %2989 = vmatprep.subr.mxu0 %v9297_v60  ;;  %6024 = vmatprep.subr.mxu1 %v9237_v4 }
 0x3d2   : > { %2990 = vmatpush1.msra.mxu0 %v9298_v61  ;;  %6025 = vmatpush3.msra.mxu1 %v9299_v14 }
 0x3d3   : > { %2991 = vmatprep.subr.mxu0 %v9300_v62  ;;  %6026 = vmatprep.subr.mxu1 %v9237_v4 }
 0x3d4   : > { %2992 = vmatpush1.msra.mxu0 %v9301_v52  ;;  %6027 = vmatpush3.msra.mxu1 %v9302_v5 }
 0x3d5   : > { %2993 = vmatprep.subr.mxu0 %v9303_v41  ;;  %6028 = vmatprep.subr.mxu1 %v9237_v4 }
 0x3d6   : > { %2994 = vmatpush1.msra.mxu0 %v9304_v56  ;;  %6029 = vmatpush3.msra.mxu1 %v9305_v10 }
 0x3d7   : > { %2995 = vmatprep.subr.mxu0 %v9306_v48  ;;  %6030 = vmatprep.subr.mxu1 %v9237_v4 }
 0x3d8   : > { %2996 = vmatpush1.msra.mxu0 %v9307_v38  ;;  %6031 = vmatpush3.msra.mxu1 %v9308_v35 }
 0x3d9   : > { %2997 = vmatprep.subr.mxu0 %v9309_v50  ;;  %6032 = vmatprep.subr.mxu1 %v9237_v4 }
 0x3da   : > { %2998 = vmatpush1.msra.mxu0 %v9310_v30  ;;  %6033 = vmatpush3.msra.mxu1 %v9311_v32  ;;  %v2638_v32 = vrot.slane %v8258_v22, 1 }
 0x3db   : > { %2999 = vmatprep.subr.mxu0 %v9312_v17  ;;  %6034 = vmatprep.subr.mxu1 %v9237_v4 }
 0x3dc   : > { %3000 = vmatpush1.msra.mxu0 %v9313_v19  ;;  %6035 = vmatpush3.msra.mxu1 %v9314_v47  ;;  %v2639_v47 = vrot.slane %v8263_v13, 1 }
 0x3dd   : > { %3001 = vmatprep.subr.mxu0 %v9315_v40  ;;  %6036 = vmatprep.subr.mxu1 %v9237_v4  ;;  %v2640_v40 = vrot.slane %v8266_v28, 1 }
 0x3de   : > { %3002 = vmatpush1.msra.mxu0 %v9316_v11  ;;  %6037 = vmatpush3.msra.mxu1 %v9317_v37  ;;  %v2642_v11 = vrot.slane %v8272_v24, 1 }
 0x3df   : > { %3003 = vmatprep.subr.mxu0 %v9318_v18  ;;  %6038 = vmatprep.subr.mxu1 %v9237_v4 }
 0x3e0   : > { %3004 = vmatpush1.msra.mxu0 %v9319_v16  ;;  %3037 = vmatprep.mubr.f32.mxu0 %v9237_v4  ;;  %v2641_v16 = vrot.slane %v8269_v15, 1 }
 0x3e1   : > { %6039 = vmatpush3.msra.mxu1 %v9320_v12  ;;  %6040 = vmatprep.mubr.msk.f32.mxu1 %vm7028_vm0, %v9237_v4 }
 0x3e2   : > { %3571 = vmatprep.subr.mxu0 %v8250_v9  ;;  %6043 = vmatprep.subr.mxu1 %v9237_v4 }
 0x481   : > { %v2441_v44 = vpop.f32.mrf.mxu0  ;;  %v8254_v45 = vpop.f32.mrf.mxu1 }
 0x482   : > { %v2517_v21 = vcombine.high %v2441_v44, %v2441_v44  ;;  %v2524_v33 = vrot.slane %v2441_v44, %v7542_v1 }
 0x483   : > { %v6007_v43 = vpop.f32.mrf.mxu1  ;;  %v2443_v54 = vpop.f32.mrf.mxu0 }
 0x484   : > { %v2531_v25 = vrot.slane %v2517_v21, %v7542_v1  ;;  %v2532_v20 = vcombine.high %v2524_v33, %v2524_v33  ;;  %v2540_v27 = vrot.slane %v2524_v33, %v7542_v1  ;;  %v2655_v61 = vcombine.high %v2443_v54, %v2443_v54 }
 0x485   : > { %v2662_v35 = vrot.slane %v2443_v54, %v7542_v1 }
 0x486   : > { %v2533_v53 = vcombine.high %v2531_v25, %v2531_v25  ;;  %v2547_v31 = vrot.slane %v2531_v25, %v7542_v1  ;;  %v2554_v46 = vrot.slane %v2532_v20, %v7542_v1  ;;  %v2562_v42 = vcombine.high %v2540_v27, %v2540_v27 }
 0x487   : > { %v2574_v26 = vadd.f32 %v8258_v22, %v2540_v27  ;;  %v2669_v17 = vrot.slane %v2655_v61, %v7542_v1  ;;  %v2670_v37 = vcombine.high %v2662_v35, %v2662_v35  ;;  %v2678_v18 = vrot.slane %v2662_v35, %v7542_v1 }
 0x488   : > { %v2561_v7 = vrot.slane %v2533_v53, %v7542_v1  ;;  %v2563_v3 = vcombine.high %v2547_v31, %v2547_v31  ;;  %v2564_v36 = vcombine.high %v2554_v46, %v2554_v46  ;;  %v2575_v8 = vadd.f32 %v8263_v13, %v2554_v46 }
 0x489   : > { %v2576_v2 = vadd.f32 %v8266_v28, %v2562_v42  ;;  %v2578_v55 = vadd.f32 %v8272_v24, %v2547_v31  ;;  %v5613_v60 = vmul.f32 -1.442695, %v2574_v26  ;;  %v2685_v12 = vrot.slane %v2669_v17, %v7542_v1 }
 0x48a   : > { %v2565_v14 = vcombine.high %v2561_v7, %v2561_v7  ;;  %v2577_v62 = vadd.f32 %v8269_v15, %v2564_v36  ;;  %v2579_v52 = vadd.f32 %v8277_v63, %v2561_v7  ;;  %v2580_v5 = vadd.f32 %v8280_v23, %v2563_v3 }
 0x48b   : > { %6435 = vpow2.f32 %v5613_v60  ;;  %v5614_v41 = vmul.f32 -1.442695, %v2575_v8  ;;  %v5615_v56 = vmul.f32 -1.442695, %v2576_v2  ;;  %v5617_v38 = vmul.f32 -1.442695, %v2578_v55 }
 0x48c   : > { %v2581_v10 = vadd.f32 %v8286_v6, %v2565_v14  ;;  %v5616_v48 = vmul.f32 -1.442695, %v2577_v62  ;;  %v5618_v50 = vmul.f32 -1.442695, %v2579_v52  ;;  %v5619_v30 = vmul.f32 -1.442695, %v2580_v5 }
 0x48d   : > { %6437 = vpow2.f32 %v5614_v41  ;;  %v2671_v44 = vcombine.high %v2669_v17, %v2669_v17  ;;  %v2692_v21 = vrot.slane %v2670_v37, %v7542_v1  ;;  %v2700_v33 = vcombine.high %v2678_v18, %v2678_v18 }
 0x48e   : > { %6439 = vpow2.f32 %v5615_v56  ;;  %v5620_v19 = vmul.f32 -1.442695, %v2581_v10  ;;  %v2712_v43 = vadd.f32 %v2678_v18, %v2638_v32  ;;  %v2716_v53 = vadd.f32 %v2685_v12, %v2642_v11 }
 0x48f   : > { %6441 = vpow2.f32 %v5616_v48  ;;  %v2702_v25 = vcombine.high %v2692_v21, %v2692_v21  ;;  %v2713_v20 = vadd.f32 %v2692_v21, %v2639_v47  ;;  %v2714_v27 = vadd.f32 %v2700_v33, %v2640_v40 }
 0x490   : > { %6443 = vpow2.f32 %v5617_v38  ;;  %v5621_v31 = vmul.f32 -1.442695, %v2712_v43  ;;  %v2699_v46 = vrot.slane %v2671_v44, %v7542_v1  ;;  %v2643_v3 = vrot.slane %v8277_v63, 1 }
 0x491   : > { %6445 = vpow2.f32 %v5618_v50  ;;  %v2715_v42 = vadd.f32 %v2702_v25, %v2641_v16  ;;  %v5622_v54 = vmul.f32 -1.442695, %v2713_v20  ;;  %v5623_v26 = vmul.f32 -1.442695, %v2714_v27 }
 0x492   : > { %6447 = vpow2.f32 %v5619_v30  ;;  %v5625_v8 = vmul.f32 -1.442695, %v2716_v53  ;;  %v2644_v55 = vrot.slane %v8280_v23, 1  ;;  %v2701_v60 = vcombine.high %v2685_v12, %v2685_v12 }
 0x493   : > { %6449 = vpow2.f32 %v5620_v19  ;;  %v5624_v36 = vmul.f32 -1.442695, %v2715_v42  ;;  %v2768_v14 = vadd.f32 %v8112_v49, %v8254_v45  ;;  %v2645_v62 = vrot.slane %v8286_v6, 1 }
 0x494   : > { %6451 = vpow2.f32 %v5621_v31  ;;  %v2703_v52 = vcombine.high %v2699_v46, %v2699_v46  ;;  %v2717_v48 = vadd.f32 %v2699_v46, %v2643_v3  ;;  %v2718_v50 = vadd.f32 %v2701_v60, %v2644_v55 }
 0x495   : > { %6453 = vpow2.f32 %v5622_v54  ;;  %v2770_v17 = vcombine.high %v2768_v14, %v2768_v14  ;;  %v2777_v47 = vrot.slane %v2768_v14, %v7542_v1  ;;  %v2835_v42 = vrot.slane %v8258_v22, 2 }
 0x496   : > { %6455 = vpow2.f32 %v5623_v26  ;;  %v2719_v49 = vadd.f32 %v2703_v52, %v2645_v62  ;;  %v5626_v37 = vmul.f32 -1.442695, %v2717_v48  ;;  %v5627_v16 = vmul.f32 -1.442695, %v2718_v50 }
 0x497   : > { %6457 = vpow2.f32 %v5624_v36  ;;  %v2784_v12 = vrot.slane %v2770_v17, %v7542_v1  ;;  %v2785_v21 = vcombine.high %v2777_v47, %v2777_v47  ;;  %v2793_v53 = vrot.slane %v2777_v47, %v7542_v1 }
 0x498   : > { %v6436_v7 = vpop.eup %6435  ;;  %v5628_v44 = vmul.f32 -1.442695, %v2719_v49  ;;  %v2836_v3 = vrot.slane %v8263_v13, 2  ;;  %v2837_v36 = vrot.slane %v8266_v28, 2  ;;  %v2839_v60 = vrot.slane %v8272_v24, 2 }
 0x499   : > { %v2606_v2 = vadd.f32 1.0, %v6436_v7  ;;  %v2786_v27 = vcombine.high %v2784_v12, %v2784_v12  ;;  %v2807_v54 = vrot.slane %v2785_v21, %v7542_v1  ;;  %v2815_v52 = vcombine.high %v2793_v53, %v2793_v53 }
 0x49a   : > { %v6438_v61 = vpop.eup %6437  ;;  %v2841_v24 = vrot.slane %v8280_v23, 2 }
 0x49b   : > { %v6440_v5 = vpop.eup %6439  ;;  %v2607_v41 = vadd.f32 1.0, %v6438_v61  ;;  %6459 = vrcp.f32 %v2606_v2  ;;  %v2800_v61 = vrot.slane %v2784_v12, %v7542_v1  ;;  %v2814_v22 = vrot.slane %v2786_v27, %v7542_v1 }
 0x49c   : > { %v6442_v56 = vpop.eup %6441  ;;  %v2608_v10 = vadd.f32 1.0, %v6440_v5  ;;  %6461 = vpow2.f32 %v5625_v8  ;;  %v2838_v8 = vrot.slane %v8269_v15, 2  ;;  %v2817_v13 = vcombine.high %v2807_v54, %v2807_v54 }
 0x49d   : > { %v6444_v38 = vpop.eup %6443  ;;  %v2609_v35 = vadd.f32 1.0, %v6442_v56  ;;  %6463 = vrcp.f32 %v2607_v41  ;;  %v2816_v17 = vcombine.high %v2800_v61, %v2800_v61  ;;  %v2818_v47 = vcombine.high %v2814_v22, %v2814_v22 }
 0x49e   : > { %v6446_v30 = vpop.eup %6445  ;;  %v2610_v32 = vadd.f32 1.0, %v6444_v38  ;;  %6465 = vrcp.f32 %v2608_v10  ;;  %v2840_v10 = vrot.slane %v8277_v63, 2 }
 0x49f   : > { %v6448_v45 = vpop.eup %6447  ;;  %v2611_v19 = vadd.f32 1.0, %v6446_v30  ;;  %6467 = vrcp.f32 %v2609_v35  ;;  %v2842_v35 = vrot.slane %v8286_v6, 2 }
 0x4a0   : > { %v6450_v40 = vpop.eup %6449  ;;  %v2612_v11 = vadd.f32 1.0, %v6448_v45  ;;  %6469 = vrcp.f32 %v2610_v32 }
 0x4a1   : > { %v2613_v18 = vadd.f32 1.0, %v6450_v40  ;;  %6471 = vrcp.f32 %v2611_v19  ;;  %v6452_v33 = vpop.eup %6451 }
 0x4a2   : > { %6473 = vrcp.f32 %v2612_v11  ;;  %v6454_v43 = vpop.eup %6453  ;;  %v2744_v25 = vadd.f32 1.0, %v6452_v33 }
 0x4a3   : > { %6475 = vrcp.f32 %v2613_v18  ;;  %v6456_v20 = vpop.eup %6455  ;;  %v2745_v31 = vadd.f32 1.0, %v6454_v43 }
 0x4a4   : > { %6477 = vpow2.f32 %v5626_v37  ;;  %v6458_v46 = vpop.eup %6457  ;;  %v2746_v26 = vadd.f32 1.0, %v6456_v20 }
 0x4a5   : > { %6479 = vpow2.f32 %v5627_v16  ;;  %v2747_v2 = vadd.f32 1.0, %v6458_v46 }
 0x4a6   : > { %6481 = vpow2.f32 %v5628_v44 }
 0x4a7   : > { %6483 = vrcp.f32 %v2744_v25 }
 0x4a8   : > { %v6460_v7 = vpop.eup %6459  ;;  %6485 = vrcp.f32 %v2745_v31 }
 0x4a9   : > { %v6462_v55 = vpop.eup %6461  ;;  %v2827_v14 = vmul.f32 %v6460_v7, %v2793_v53  ;;  %6487 = vrcp.f32 %v2746_v26 }
 0x4aa   : > { %v6464_v62 = vpop.eup %6463  ;;  %v2748_v5 = vadd.f32 1.0, %v6462_v55  ;;  %6489 = vrcp.f32 %v2747_v2 }
 0x4ab   : > { %v6466_v41 = vpop.eup %6465  ;;  %v2828_v56 = vmul.f32 %v6464_v62, %v2807_v54  ;;  %v2851_v28 = vadd.f32 %v2835_v42, %v2827_v14 }
 0x4ac   : > { %v6468_v15 = vpop.eup %6467  ;;  %v2829_v48 = vmul.f32 %v6466_v41, %v2815_v52 }
 0x4ad   : > { %v6470_v38 = vpop.eup %6469  ;;  %v2830_v50 = vmul.f32 %v6468_v15, %v2817_v13  ;;  %v2852_v30 = vadd.f32 %v2836_v3, %v2828_v56  ;;  %6491 = vtanh.f32 %v2851_v28 }
 0x4ae   : > { %v6472_v32 = vpop.eup %6471  ;;  %v2831_v49 = vmul.f32 %v6470_v38, %v2800_v61  ;;  %v2853_v45 = vadd.f32 %v2837_v36, %v2829_v48  ;;  %6493 = vrcp.f32 %v2748_v5 }
 0x4af   : > { %v6474_v19 = vpop.eup %6473  ;;  %v2832_v40 = vmul.f32 %v6472_v32, %v2814_v22  ;;  %v2854_v11 = vadd.f32 %v2838_v8, %v2830_v50  ;;  %6495 = vtanh.f32 %v2852_v30 }
 0x4b0   : > { %v6476_v63 = vpop.eup %6475  ;;  %v2833_v23 = vmul.f32 %v6474_v19, %v2816_v17  ;;  %v2855_v37 = vadd.f32 %v2839_v60, %v2831_v49  ;;  %6497 = vtanh.f32 %v2853_v45 }
 0x4b1   : > { %v6478_v18 = vpop.eup %6477  ;;  %v2834_v16 = vmul.f32 %v6476_v63, %v2818_v47  ;;  %v2856_v6 = vadd.f32 %v2840_v10, %v2832_v40  ;;  %6499 = vtanh.f32 %v2854_v11 }
 0x4b2   : > { %v6480_v12 = vpop.eup %6479  ;;  %v2857_v44 = vadd.f32 %v2841_v24, %v2833_v23  ;;  %6501 = vtanh.f32 %v2855_v37  ;;  %v2749_v21 = vadd.f32 1.0, %v6478_v18 }
 0x4b3   : > { %v6482_v33 = vpop.eup %6481  ;;  %v2858_v43 = vadd.f32 %v2842_v35, %v2834_v16  ;;  %6503 = vtanh.f32 %v2856_v6  ;;  %v2750_v25 = vadd.f32 1.0, %v6480_v12  ;;  %v8378_v6 = vld [vmem:[#allocation3 + $0x30] sm:$0xff] }
 0x4b4   : > { %6505 = vtanh.f32 %v2857_v44  ;;  %v2751_v20 = vadd.f32 1.0, %v6482_v33  ;;  %v6484_v27 = vpop.eup %6483  ;;  %v8381_v12 = vld [vmem:[#allocation3 + $0x150] sm:$0xff]  ;;  %v8384_v44 = vld [vmem:[#allocation3 + $0x68] sm:$0xff] }
 0x4b5   : > { %6507 = vtanh.f32 %v2858_v43  ;;  %v6486_v53 = vpop.eup %6485  ;;  %v8391_v33 = vld [vmem:[#allocation3 + $0x70] sm:$0xff]  ;;  %v8394_v43 = vld [vmem:[#allocation3] sm:$0xff] }
 0x4b6   : > { %6509 = vrcp.f32 %v2749_v21  ;;  %v6488_v31 = vpop.eup %6487  ;;  %v8388_v21 = vld [vmem:[#allocation3 + $0x50] sm:$0xff] }
 0x4b7   : > { %6511 = vrcp.f32 %v2750_v25  ;;  %v6490_v46 = vpop.eup %6489  ;;  %v8398_v25 = vld [vmem:[#allocation3 + $0x8] sm:$0xff] }
 0x4b8   : > { %6513 = vrcp.f32 %v2751_v20  ;;  %v8401_v20 = vld [vmem:[#allocation3 + $0x78] sm:$0xff] }
 0x4ba   : > { %v6492_v42 = vpop.eup %6491 }
 0x4bb   : > { %v6494_v54 = vpop.eup %6493  ;;  %v2867_v26 = vsub.f32 %v8135_v34, %v6492_v42 }
 0x4bc   : > { %v6496_v7 = vpop.eup %6495 }
 0x4bd   : > { %v6498_v3 = vpop.eup %6497  ;;  %v2868_v36 = vsub.f32 %v8139_v39, %v6496_v7  ;;  %v2875_v8 = vmul.f32 %v6484_v27, %v2867_v26  ;;  %v8404_v27 = vld [vmem:[#allocation3 + $0x18] sm:$0xff]  ;;  %v8424_v26 = vld [vmem:[#allocation3 + $0x140] sm:$0xff] }
 0x4be   : > { %v6500_v2 = vpop.eup %6499  ;;  %v2869_v55 = vsub.f32 %v8144_v0, %v6498_v3 }
 0x4bf   : > { %v6502_v60 = vpop.eup %6501  ;;  %v2870_v61 = vsub.f32 %v8147_v58, %v6500_v2  ;;  %v2876_v14 = vmul.f32 %v6486_v53, %v2868_v36  ;;  %v8328_v62 = vadd.f32 %v6492_v42, %v2875_v8  ;;  %v8408_v53 = vld [vmem:[#allocation3 + $0xc0] sm:$0xff]  ;;  %v8418_v42 = vld [vmem:[#allocation3 + $0xc8] sm:$0xff] }
 0x4c0   : > { %v6504_v22 = vpop.eup %6503  ;;  %v2871_v52 = vsub.f32 %v8151_v59, %v6502_v60  ;;  %v2877_v34 = vmul.f32 %v6488_v31, %v2869_v55  ;;  %v8411_v31 = vld [vmem:[#allocation3 + $0x98] sm:$0xff]  ;;  %v8434_v36 = vld [vmem:[#allocation3 + $0xa0] sm:$0xff]  ;;  %v8438_v8 = vld [vmem:[#allocation3 + $0x88] sm:$0xff] }
 0x4c1   : > { %v6506_v5 = vpop.eup %6505  ;;  %v2872_v41 = vsub.f32 %v8159_v51, %v6504_v22  ;;  %v2878_v39 = vmul.f32 %v6490_v46, %v2870_v61  ;;  %v8332_v13 = vadd.f32 %v6496_v7, %v2876_v14  ;;  %2891 = vst [vmem:[%s7156_s7 + $0x3] sm:$0x1] %v8328_v62  ;;  %v8414_v46 = vld [vmem:[#allocation3 + $0x28] sm:$0xff]  ;;  %v8428_v7 = vld [vmem:[#allocation3 + $0xf0] sm:$0xff]  ;;  %v8444_v55 = vld [vmem:[#allocation3 + $0xf8] sm:$0xff] }
 0x4c2   : > { %v6508_v0 = vpop.eup %6507  ;;  %v2873_v58 = vsub.f32 %v8165_v57, %v6506_v5  ;;  %v2879_v56 = vmul.f32 %v6494_v54, %v2871_v52  ;;  %v8337_v28 = vadd.f32 %v6498_v3, %v2877_v34  ;;  %v8421_v54 = vld [vmem:[#allocation3 + $0x38] sm:$0xff]  ;;  %v8431_v3 = vld [vmem:[#allocation3 + $0x60] sm:$0xff]  ;;  %9322 = vst [vmem:[#allocation22_spill] sm:$0xff] %v8444_v55  ;;  %v8461_v52 = vld [vmem:[#allocation3 + $0x168] sm:$0xff] }
 0x4c3   : > { %v6510_v15 = vpop.eup %6509  ;;  %v2874_v59 = vsub.f32 %v8167_v29, %v6508_v0  ;;  %v8340_v10 = vadd.f32 %v6500_v2, %v2878_v39  ;;  %2892 = vst [vmem:[%s7156_s7 + $0xb] sm:$0x1] %v8332_v13  ;;  %v2923_v30 = vcombine.low %v8328_v62, %v8332_v13  ;;  %v8441_v2 = vld [vmem:[#allocation3 + $0x170] sm:$0xff]  ;;  %v8451_v61 = vld [vmem:[#allocation3 + $0x20] sm:$0xff]  ;;  %v8454_v14 = vld [vmem:[#allocation3 + $0xb8] sm:$0xff] }
 0x4c4   : > { %v6512_v51 = vpop.eup %6511  ;;  %v2880_v24 = vmul.f32 %v6510_v15, %v2872_v41  ;;  %v8344_v48 = vadd.f32 %v6502_v60, %v2879_v56  ;;  %2893 = vst [vmem:[%s7156_s7 + $0x13] sm:$0x1] %v8337_v28  ;;  %9321 = vst [vmem:[#allocation12_spill] sm:$0xff] %v8441_v2  ;;  %v8448_v60 = vld [vmem:[#allocation3 + $0xe8] sm:$0xff]  ;;  %v8464_v34 = vld [vmem:[#allocation3 + $0x120] sm:$0xff] }
 0x4c5   : > { %v6514_v57 = vpop.eup %6513  ;;  %v2881_v38 = vmul.f32 %v6512_v51, %v2873_v58  ;;  %2894 = vst [vmem:[%s7156_s7 + $0x1b] sm:$0x1] %v8340_v10  ;;  %v2924_v29 = vcombine.low %v8337_v28, %v8340_v10  ;;  %v2933_v47 = vrot.slane %v2923_v30, %v7542_v1  ;;  %9323 = vst [vmem:[#allocation13_spill] sm:$0xff] %v8448_v60  ;;  %v8471_v41 = vld [vmem:[#allocation3 + $0xe0] sm:$0xff]  ;;  %v8481_v58 = vld [vmem:[#allocation3 + $0x130] sm:$0xff] }
 0x4c6   : > { %v2882_v35 = vmul.f32 %v6514_v57, %v2874_v59  ;;  %v8352_v50 = vadd.f32 %v6504_v22, %v2880_v24  ;;  %2895 = vst [vmem:[%s7156_s7 + $0x23] sm:$0x1] %v8344_v48  ;;  %9324 = vst [vmem:[#allocation14_spill] sm:$0xff] %v8451_v61  ;;  %v8458_v22 = vld [vmem:[#allocation3 + $0xa8] sm:$0xff]  ;;  %v8474_v39 = vld [vmem:[#allocation3 + $0x80] sm:$0xff] }
 0x4c7   : > { %v8358_v32 = vadd.f32 %v6506_v5, %v2881_v38  ;;  %v2940_v45 = vrot.slane %v2924_v29, %v7542_v1  ;;  %9325 = vst [vmem:[#allocation25_spill] sm:$0xff] %v8454_v14  ;;  %9326 = vst [vmem:[#allocation15_spill] sm:$0xff] %v8458_v22  ;;  %v8468_v5 = vld [vmem:[#allocation3 + $0x138] sm:$0xff]  ;;  %v8484_v56 = vld [vmem:[#allocation3 + $0x100] sm:$0xff] }
 0x4c8   : > { %v8360_v17 = vadd.f32 %v6508_v0, %v2882_v35  ;;  %2896 = vst [vmem:[%s7156_s7 + $0x2b] sm:$0x1] %v8352_v50  ;;  %v2925_v49 = vcombine.low %v8344_v48, %v8352_v50  ;;  %9327 = vst [vmem:[#allocation16_spill] sm:$0xff] %v8461_v52  ;;  %v8478_v0 = vld [vmem:[#allocation3 + $0xd8] sm:$0xff]  ;;  %v8488_v15 = vld [vmem:[#allocation3 + $0x148] sm:$0xff] }
 0x4c9   : > { %2897 = vst [vmem:[%s7156_s7 + $0x33] sm:$0x1] %v8358_v32  ;;  %v2955_v63 = vcombine.low %v2933_v47, %v2940_v45  ;;  %9328 = vst [vmem:[#allocation28_spill] sm:$0xff] %v8464_v34  ;;  %v8491_v59 = vld [vmem:[#allocation3 + $0x58] sm:$0xff]  ;;  %v8494_v51 = vld [vmem:[#allocation3 + $0x90] sm:$0xff] }
 0x4ca   : > { %2898 = vst [vmem:[%s7156_s7 + $0x3b] sm:$0x1] %v8360_v17  ;;  %v2926_v19 = vcombine.low %v8358_v32, %v8360_v17  ;;  %v2947_v40 = vrot.slane %v2925_v49, %v7542_v1  ;;  %9329 = vst [vmem:[#allocation17_spill] sm:$0xff] %v8468_v5  ;;  %v8498_v24 = vld [vmem:[#allocation3 + $0x110] sm:$0xff]  ;;  %v8501_v57 = vld [vmem:[#allocation3 + $0x118] sm:$0xff] }
 0x4cb   : > { %v2963_v37 = vrot.slane %v2955_v63, %v7542_v1  ;;  %9330 = vst [vmem:[#allocation18_spill] sm:$0xff] %v8471_v41  ;;  %9331 = vst [vmem:[#allocation31_spill] sm:$0xff] %v8474_v39  ;;  %v8504_v38 = vld [vmem:[#allocation3 + $0x178] sm:$0xff]  ;;  %v8508_v29 = vld [vmem:[#allocation3 + $0x40] sm:$0xff] }
 0x4cc   : > { %v2954_v11 = vrot.slane %v2926_v19, %v7542_v1  ;;  %9332 = vst [vmem:[#allocation19_spill] sm:$0xff] %v8478_v0  ;;  %9333 = vst [vmem:[#allocation20_spill] sm:$0xff] %v8481_v58  ;;  %v8511_v35 = vld [vmem:[#allocation3 + $0x108] sm:$0xff]  ;;  %v8514_v30 = vld [vmem:[#allocation3 + $0x160] sm:$0xff] }
 0x4cd   : > { %9334 = vst [vmem:[#allocation33_spill] sm:$0xff] %v8484_v56  ;;  %9335 = vst [vmem:[#allocation21_spill] sm:$0xff] %v8488_v15  ;;  %v8518_v49 = vld [vmem:[#allocation3 + $0x48] sm:$0xff]  ;;  %v8524_v19 = vld [vmem:[#allocation3 + $0xd0] sm:$0xff] }
 0x4ce   : > { %v2956_v23 = vcombine.low %v2947_v40, %v2954_v11  ;;  %9336 = vst [vmem:[#allocation23_spill] sm:$0xff] %v8491_v59  ;;  %9337 = vst [vmem:[#allocation34_spill] sm:$0xff] %v8494_v51  ;;  %v8521_v45 = vld [vmem:[#allocation3 + $0x128] sm:$0xff]  ;;  %v8528_v47 = vld [vmem:[#allocation3 + $0xb0] sm:$0xff] }
 0x4cf   : > { %9338 = vst [vmem:[#allocation24_spill] sm:$0xff] %v8498_v24  ;;  %9339 = vst [vmem:[#allocation26_spill] sm:$0xff] %v8501_v57  ;;  %v8532_v40 = vld [vmem:[#allocation3 + $0x10] sm:$0xff] }
 0x4d0   : > { %v2970_v18 = vrot.slane %v2956_v23, %v7542_v1  ;;  %9340 = vst [vmem:[#allocation35_spill] sm:$0xff] %v8504_v38  ;;  %9341 = vst [vmem:[#allocation27_spill] sm:$0xff] %v8508_v29 }
 0x4d1   : > { %9342 = vst [vmem:[#allocation29_spill] sm:$0xff] %v8511_v35  ;;  %9343 = vst [vmem:[#allocation36_spill] sm:$0xff] %v8514_v30 }
 0x4d2   : > { %v2971_v16 = vcombine.low %v2963_v37, %v2970_v18  ;;  %9344 = vst [vmem:[#allocation30_spill] sm:$0xff] %v8518_v49  ;;  %9345 = vst [vmem:[#allocation32_spill] sm:$0xff] %v8521_v45 }
 0x4d3   : > { %9346 = vst [vmem:[#allocation37_spill] sm:$0xff] %v8524_v19  ;;  %9347 = vst [vmem:[#allocation38_spill] sm:$0xff] %v8528_v47 }
 0x4d4   : > { %3038 = vmatmul.mubr.f32.vlgmr.msra.gmra.mxu0 %v2971_v16  ;;  %6041 = vmatmul.mubr.f32.vlgmr.msra.gmra.mxu1 %v2971_v16  ;;  %9348 = vst [vmem:[#allocation39_spill] sm:$0xff] %v8532_v40  ;;  %v8543_v16 = vld [vmem:[%s7154_s6 + $0x4] ss:$8 sm:$0x7] }
 0x4d5   : > { %3572 = vmatpush1.msra.mxu0 %v8378_v6  ;;  %6044 = vmatpush3.msra.mxu1 %v8381_v12 }
 0x4d6   : > { %3573 = vmatprep.subr.mxu0 %v8384_v44  ;;  %6045 = vmatprep.subr.mxu1 %v9237_v4 }
 0x4d7   : > { %3574 = vmatpush1.msra.mxu0 %v8388_v21  ;;  %6046 = vmatpush3.msra.mxu1 %v8391_v33 }
 0x4d8   : > { %3575 = vmatprep.subr.mxu0 %v8394_v43  ;;  %6047 = vmatprep.subr.mxu1 %v9237_v4 }
 0x4d9   : > { %3576 = vmatpush1.msra.mxu0 %v8398_v25  ;;  %6048 = vmatpush3.msra.mxu1 %v8401_v20 }
 0x4da   : > { %3577 = vmatprep.subr.mxu0 %v8404_v27  ;;  %6049 = vmatprep.subr.mxu1 %v9237_v4 }
 0x4db   : > { %3578 = vmatpush1.msra.mxu0 %v8408_v53  ;;  %6050 = vmatpush3.msra.mxu1 %v8411_v31 }
 0x4dc   : > { %3579 = vmatprep.subr.mxu0 %v8414_v46  ;;  %6051 = vmatprep.subr.mxu1 %v9237_v4 }
 0x4dd   : > { %3580 = vmatpush1.msra.mxu0 %v8418_v42  ;;  %6052 = vmatpush3.msra.mxu1 %v8421_v54 }
 0x4de   : > { %3581 = vmatprep.subr.mxu0 %v8424_v26  ;;  %6053 = vmatprep.subr.mxu1 %v9237_v4 }
 0x4df   : > { %3582 = vmatpush1.msra.mxu0 %v8428_v7  ;;  %6054 = vmatpush3.msra.mxu1 %v8431_v3 }
 0x4e0   : > { %3583 = vmatprep.subr.mxu0 %v8434_v36  ;;  %6055 = vmatprep.subr.mxu1 %v9237_v4 }
 0x4e1   : > { %3584 = vmatpush1.msra.mxu0 %v8438_v8  ;;  %6056 = vmatpush3.msra.mxu1 %v8441_v2 }
 0x4e2   : > { %3585 = vmatprep.subr.mxu0 %v8444_v55  ;;  %6057 = vmatprep.subr.mxu1 %v9237_v4 }
 0x4e3   : > { %3586 = vmatpush1.msra.mxu0 %v8448_v60  ;;  %6058 = vmatpush3.msra.mxu1 %v8451_v61 }
 0x4e4   : > { %3587 = vmatprep.subr.mxu0 %v8454_v14  ;;  %6059 = vmatprep.subr.mxu1 %v9237_v4  ;;  %v3236_v14 = vrot.slane %v8543_v16, 1 }
 0x4e5   : > { %3588 = vmatpush1.msra.mxu0 %v8458_v22  ;;  %6060 = vmatpush3.msra.mxu1 %v8461_v52 }
 0x4e6   : > { %3589 = vmatprep.subr.mxu0 %v8464_v34  ;;  %6061 = vmatprep.subr.mxu1 %v9237_v4 }
 0x4e7   : > { %3590 = vmatpush1.msra.mxu0 %v8468_v5  ;;  %6062 = vmatpush3.msra.mxu1 %v8471_v41 }
 0x4e8   : > { %3591 = vmatprep.subr.mxu0 %v8474_v39  ;;  %6063 = vmatprep.subr.mxu1 %v9237_v4 }
 0x4e9   : > { %3592 = vmatpush1.msra.mxu0 %v8478_v0  ;;  %6064 = vmatpush3.msra.mxu1 %v8481_v58 }
 0x4ea   : > { %3593 = vmatprep.subr.mxu0 %v8484_v56  ;;  %6065 = vmatprep.subr.mxu1 %v9237_v4  ;;  %v8571_v56 = vld [vmem:[%s7154_s6 + $0xac] ss:$8 sm:$0x7] }
 0x4eb   : > { %3594 = vmatpush1.msra.mxu0 %v8488_v15  ;;  %6066 = vmatpush3.msra.mxu1 %v8491_v59 }
 0x4ec   : > { %3595 = vmatprep.subr.mxu0 %v8494_v51  ;;  %6067 = vmatprep.subr.mxu1 %v9237_v4 }
 0x4ed   : > { %3596 = vmatpush1.msra.mxu0 %v8498_v24  ;;  %6068 = vmatpush3.msra.mxu1 %v8501_v57  ;;  %v8565_v57 = vld [vmem:[%s7154_s6 + $0x94] ss:$8 sm:$0x7] }
 0x4ee   : > { %3597 = vmatprep.subr.mxu0 %v8504_v38  ;;  %6069 = vmatprep.subr.mxu1 %v9237_v4 }
 0x4ef   : > { %3598 = vmatpush1.msra.mxu0 %v8508_v29  ;;  %6070 = vmatpush3.msra.mxu1 %v8511_v35 }
 0x4f0   : > { %3599 = vmatprep.subr.mxu0 %v8514_v30  ;;  %6071 = vmatprep.subr.mxu1 %v9237_v4  ;;  %v8557_v30 = vld [vmem:[%s7154_s6 + $0x64] ss:$8 sm:$0x7] }
 0x4f1   : > { %3600 = vmatpush1.msra.mxu0 %v8518_v49  ;;  %6072 = vmatpush3.msra.mxu1 %v8521_v45  ;;  %v8548_v45 = vld [vmem:[%s7154_s6 + $0x1c] ss:$8 sm:$0x7] }
 0x4f2   : > { %3601 = vmatprep.subr.mxu0 %v8524_v19  ;;  %6073 = vmatprep.subr.mxu1 %v9237_v4  ;;  %v8554_v49 = vld [vmem:[%s7154_s6 + $0x4c] ss:$8 sm:$0x7] }
 0x4f3   : > { %3602 = vmatpush1.msra.mxu0 %v8528_v47  ;;  %3635 = vmatprep.mubr.f32.mxu0 %v9237_v4 }
 0x4f4   : > { %6074 = vmatpush3.msra.mxu1 %v8532_v40  ;;  %6075 = vmatprep.mubr.msk.f32.mxu1 %vm7028_vm0, %v9237_v4 }
 0x4f5   : > { %4169 = vmatprep.subr.mxu0 %v8250_v9  ;;  %6078 = vmatprep.subr.mxu1 %v9237_v4  ;;  %v8551_v9 = vld [vmem:[%s7154_s6 + $0x34] ss:$8 sm:$0x7] }
 0x594   : > { %v3039_v11 = vpop.f32.mrf.mxu0  ;;  %v8539_v63 = vpop.f32.mrf.mxu1 }
 0x595   : > { %v3115_v23 = vcombine.high %v3039_v11, %v3039_v11  ;;  %v3122_v37 = vrot.slane %v3039_v11, %v7542_v1 }
 0x596   : > { %v6042_v18 = vpop.f32.mrf.mxu1  ;;  %v3041_v38 = vpop.f32.mrf.mxu0 }
 0x597   : > { %v3129_v40 = vrot.slane %v3115_v23, %v7542_v1  ;;  %v3130_v47 = vcombine.high %v3122_v37, %v3122_v37  ;;  %v3138_v19 = vrot.slane %v3122_v37, %v7542_v1  ;;  %v8562_v23 = vld [vmem:[%s7154_s6 + $0x7c] ss:$8 sm:$0x7]  ;;  %v3253_v0 = vcombine.high %v3041_v38, %v3041_v38 }
 0x599   : > { %v3131_v35 = vcombine.high %v3129_v40, %v3129_v40  ;;  %v3145_v11 = vrot.slane %v3129_v40, %v7542_v1  ;;  %v3152_v18 = vrot.slane %v3130_v47, %v7542_v1  ;;  %v3160_v29 = vcombine.high %v3138_v19, %v3138_v19 }
 0x59a   : > { %v3172_v37 = vadd.f32 %v8543_v16, %v3138_v19 }
 0x59b   : > { %v3159_v24 = vrot.slane %v3131_v35, %v7542_v1  ;;  %v3161_v51 = vcombine.high %v3145_v11, %v3145_v11  ;;  %v3162_v59 = vcombine.high %v3152_v18, %v3152_v18  ;;  %v3173_v15 = vadd.f32 %v8548_v45, %v3152_v18 }
 0x59c   : > { %v3174_v40 = vadd.f32 %v8551_v9, %v3160_v29  ;;  %v3176_v47 = vadd.f32 %v8557_v30, %v3145_v11  ;;  %v5637_v58 = vmul.f32 -1.442695, %v3172_v37  ;;  %v3260_v29 = vrot.slane %v3041_v38, %v7542_v1 }
 0x59d   : > { %v3163_v39 = vcombine.high %v3159_v24, %v3159_v24  ;;  %v3175_v41 = vadd.f32 %v8554_v49, %v3162_v59  ;;  %v3177_v5 = vadd.f32 %v8562_v23, %v3159_v24  ;;  %v3178_v19 = vadd.f32 %v8565_v57, %v3161_v51 }
 0x59e   : > { %6515 = vpow2.f32 %v5637_v58  ;;  %v5638_v35 = vmul.f32 -1.442695, %v3173_v15  ;;  %v5639_v34 = vmul.f32 -1.442695, %v3174_v40  ;;  %v5641_v22 = vmul.f32 -1.442695, %v3176_v47 }
 0x59f   : > { %v3179_v18 = vadd.f32 %v8571_v56, %v3163_v39  ;;  %v5640_v52 = vmul.f32 -1.442695, %v3175_v41  ;;  %v5642_v11 = vmul.f32 -1.442695, %v3177_v5  ;;  %v5643_v37 = vmul.f32 -1.442695, %v3178_v19 }
 0x5a0   : > { %6517 = vpow2.f32 %v5638_v35  ;;  %v3267_v59 = vrot.slane %v3253_v0, %v7542_v1  ;;  %v3237_v58 = vrot.slane %v8548_v45, 1  ;;  %v3238_v15 = vrot.slane %v8551_v9, 1 }
 0x5a1   : > { %6519 = vpow2.f32 %v5639_v34  ;;  %v5644_v24 = vmul.f32 -1.442695, %v3179_v18  ;;  %v3240_v41 = vrot.slane %v8557_v30, 1  ;;  %v3268_v39 = vcombine.high %v3260_v29, %v3260_v29 }
 0x5a2   : > { %6521 = vpow2.f32 %v5640_v52  ;;  %v3276_v51 = vrot.slane %v3260_v29, %v7542_v1  ;;  %v3239_v34 = vrot.slane %v8554_v49, 1  ;;  %v3283_v5 = vrot.slane %v3267_v59, %v7542_v1 }
 0x5a3   : > { %6523 = vpow2.f32 %v5641_v22  ;;  %v3269_v38 = vcombine.high %v3267_v59, %v3267_v59  ;;  %v3290_v52 = vrot.slane %v3268_v39, %v7542_v1 }
 0x5a4   : > { %6525 = vpow2.f32 %v5642_v11  ;;  %v3298_v0 = vcombine.high %v3276_v51, %v3276_v51  ;;  %v3310_v40 = vadd.f32 %v3276_v51, %v3236_v14  ;;  %v3314_v35 = vadd.f32 %v3283_v5, %v3240_v41 }
 0x5a5   : > { %6527 = vpow2.f32 %v5643_v37  ;;  %v3300_v47 = vcombine.high %v3290_v52, %v3290_v52  ;;  %v3311_v19 = vadd.f32 %v3290_v52, %v3237_v58  ;;  %v3297_v61 = vrot.slane %v3269_v38, %v7542_v1 }
 0x5a6   : > { %6529 = vpow2.f32 %v5644_v24  ;;  %v3312_v22 = vadd.f32 %v3298_v0, %v3238_v15  ;;  %v5645_v18 = vmul.f32 -1.442695, %v3310_v40  ;;  %v3241_v37 = vrot.slane %v8562_v23, 1  ;;  %v8592_v15 = vld [vmem:[#allocation4] ss:$0 sm:$0xff] }
 0x5a7   : > { %v3313_v29 = vadd.f32 %v3300_v47, %v3239_v34  ;;  %v5646_v11 = vmul.f32 -1.442695, %v3311_v19  ;;  %v5649_v39 = vmul.f32 -1.442695, %v3314_v35  ;;  %v3242_v14 = vrot.slane %v8565_v57, 1 }
 0x5a8   : > { %v5647_v60 = vmul.f32 -1.442695, %v3312_v22  ;;  %6531 = vpow2.f32 %v5645_v18  ;;  %v3299_v24 = vcombine.high %v3283_v5, %v3283_v5  ;;  %v3366_v41 = vadd.f32 %v8592_v15, %v8539_v63 }
 0x5a9   : > { %6533 = vpow2.f32 %v5646_v11  ;;  %v5648_v59 = vmul.f32 -1.442695, %v3313_v29  ;;  %v3243_v51 = vrot.slane %v8571_v56, 1  ;;  %v3301_v34 = vcombine.high %v3297_v61, %v3297_v61 }
 0x5aa   : > { %6535 = vpow2.f32 %v5647_v60  ;;  %v3316_v60 = vadd.f32 %v3299_v24, %v3242_v14  ;;  %v3368_v35 = vcombine.high %v3366_v41, %v3366_v41  ;;  %v3375_v11 = vrot.slane %v3366_v41, %v7542_v1 }
 0x5ab   : > { %v6516_v55 = vpop.eup %6515  ;;  %6537 = vpow2.f32 %v5648_v59  ;;  %v3317_v63 = vadd.f32 %v3301_v34, %v3243_v51 }
 0x5ac   : > { %v3204_v2 = vadd.f32 1.0, %v6516_v55  ;;  %v3315_v55 = vadd.f32 %v3297_v61, %v3241_v37  ;;  %v5651_v37 = vmul.f32 -1.442695, %v3316_v60  ;;  %v3383_v24 = vcombine.high %v3375_v11, %v3375_v11 }
 0x5ad   : > { %v6518_v58 = vpop.eup %6517  ;;  %v5652_v14 = vmul.f32 -1.442695, %v3317_v63  ;;  %v3436_v63 = vrot.slane %v8554_v49, 2 }
 0x5ae   : > { %v6520_v38 = vpop.eup %6519  ;;  %v3205_v52 = vadd.f32 1.0, %v6518_v58  ;;  %6539 = vrcp.f32 %v3204_v2  ;;  %v5650_v58 = vmul.f32 -1.442695, %v3315_v55 }
 0x5af   : > { %v6522_v0 = vpop.eup %6521  ;;  %v3206_v40 = vadd.f32 1.0, %v6520_v38  ;;  %6541 = vpow2.f32 %v5649_v39  ;;  %v3382_v39 = vrot.slane %v3368_v35, %v7542_v1  ;;  %v3435_v35 = vrot.slane %v8551_v9, 2 }
 0x5b0   : > { %v6524_v47 = vpop.eup %6523  ;;  %v3207_v5 = vadd.f32 1.0, %v6522_v0  ;;  %6543 = vrcp.f32 %v3205_v52  ;;  %v3391_v0 = vrot.slane %v3375_v11, %v7542_v1 }
 0x5b1   : > { %v6526_v19 = vpop.eup %6525  ;;  %v3208_v22 = vadd.f32 1.0, %v6524_v47  ;;  %6545 = vrcp.f32 %v3206_v40  ;;  %v3384_v41 = vcombine.high %v3382_v39, %v3382_v39  ;;  %v3433_v47 = vrot.slane %v8543_v16, 2 }
 0x5b2   : > { %v6528_v18 = vpop.eup %6527  ;;  %v3209_v29 = vadd.f32 1.0, %v6526_v19  ;;  %6547 = vrcp.f32 %v3207_v5  ;;  %v3405_v5 = vrot.slane %v3383_v24, %v7542_v1  ;;  %v3398_v11 = vrot.slane %v3382_v39, %v7542_v1 }
 0x5b3   : > { %v6530_v59 = vpop.eup %6529  ;;  %v3210_v2 = vadd.f32 1.0, %v6528_v18  ;;  %6549 = vrcp.f32 %v3208_v22  ;;  %v3434_v22 = vrot.slane %v8548_v45, 2  ;;  %v3412_v16 = vrot.slane %v3384_v41, %v7542_v1 }
 0x5b4   : > { %v3211_v61 = vadd.f32 1.0, %v6530_v59  ;;  %6551 = vrcp.f32 %v3209_v29  ;;  %v3437_v59 = vrot.slane %v8557_v30, 2  ;;  %v3415_v45 = vcombine.high %v3405_v5, %v3405_v5 }
 0x5b5   : > { %6553 = vrcp.f32 %v3210_v2  ;;  %v6532_v38 = vpop.eup %6531  ;;  %v3439_v30 = vrot.slane %v8565_v57, 2 }
 0x5b6   : > { %6555 = vrcp.f32 %v3211_v61  ;;  %v6534_v51 = vpop.eup %6533  ;;  %v3342_v34 = vadd.f32 1.0, %v6532_v38  ;;  %v3413_v61 = vcombine.high %v3391_v0, %v3391_v0  ;;  %v3438_v38 = vrot.slane %v8562_v23, 2 }
 0x5b7   : > { %6557 = vpow2.f32 %v5650_v58  ;;  %v6536_v52 = vpop.eup %6535  ;;  %v3343_v40 = vadd.f32 1.0, %v6534_v51 }
 0x5b8   : > { %6559 = vpow2.f32 %v5651_v37  ;;  %v6538_v55 = vpop.eup %6537  ;;  %v3344_v60 = vadd.f32 1.0, %v6536_v52 }
 0x5b9   : > { %6561 = vpow2.f32 %v5652_v14  ;;  %v3345_v18 = vadd.f32 1.0, %v6538_v55 }
 0x5ba   : > { %6563 = vrcp.f32 %v3342_v34  ;;  %v3440_v34 = vrot.slane %v8571_v56, 2 }
 0x5bb   : > { %v6540_v19 = vpop.eup %6539  ;;  %6565 = vrcp.f32 %v3343_v40  ;;  %v3414_v40 = vcombine.high %v3398_v11, %v3398_v11 }
 0x5bc   : > { %v6542_v29 = vpop.eup %6541  ;;  %v3425_v2 = vmul.f32 %v6540_v19, %v3391_v0  ;;  %6567 = vrcp.f32 %v3344_v60 }
 0x5bd   : > { %v6544_v58 = vpop.eup %6543  ;;  %v3346_v37 = vadd.f32 1.0, %v6542_v29  ;;  %6569 = vrcp.f32 %v3345_v18 }
 0x5be   : > { %v6546_v14 = vpop.eup %6545  ;;  %v3426_v24 = vmul.f32 %v6544_v58, %v3405_v5  ;;  %v3449_v9 = vadd.f32 %v3433_v47, %v3425_v2  ;;  %v3416_v5 = vcombine.high %v3412_v16, %v3412_v16 }
 0x5bf   : > { %v6548_v49 = vpop.eup %6547  ;;  %v3427_v51 = vmul.f32 %v6546_v14, %v3413_v61 }
 0x5c0   : > { %v6550_v39 = vpop.eup %6549  ;;  %v3428_v52 = vmul.f32 %v6548_v49, %v3415_v45  ;;  %v3450_v41 = vadd.f32 %v3434_v22, %v3426_v24  ;;  %6571 = vtanh.f32 %v3449_v9 }
 0x5c1   : > { %v6552_v0 = vpop.eup %6551  ;;  %v3429_v55 = vmul.f32 %v6550_v39, %v3398_v11  ;;  %v3451_v19 = vadd.f32 %v3435_v35, %v3427_v51  ;;  %6573 = vrcp.f32 %v3346_v37 }
 0x5c2   : > { %v6554_v47 = vpop.eup %6553  ;;  %v3430_v60 = vmul.f32 %v6552_v0, %v3412_v16  ;;  %v3452_v29 = vadd.f32 %v3436_v63, %v3428_v52  ;;  %6575 = vtanh.f32 %v3450_v41 }
 0x5c3   : > { %v6556_v23 = vpop.eup %6555  ;;  %v3431_v57 = vmul.f32 %v6554_v47, %v3414_v40  ;;  %v3453_v2 = vadd.f32 %v3437_v59, %v3429_v55  ;;  %6577 = vtanh.f32 %v3451_v19 }
 0x5c4   : > { %v6558_v18 = vpop.eup %6557  ;;  %v3432_v58 = vmul.f32 %v6556_v23, %v3416_v5  ;;  %v3454_v56 = vadd.f32 %v3438_v38, %v3430_v60  ;;  %6579 = vtanh.f32 %v3452_v29 }
 0x5c5   : > { %v6560_v22 = vpop.eup %6559  ;;  %v3455_v61 = vadd.f32 %v3439_v30, %v3431_v57  ;;  %6581 = vtanh.f32 %v3453_v2  ;;  %v3347_v14 = vadd.f32 1.0, %v6558_v18 }
 0x5c6   : > { %v6562_v11 = vpop.eup %6561  ;;  %v3456_v35 = vadd.f32 %v3440_v34, %v3432_v58  ;;  %6583 = vtanh.f32 %v3454_v56  ;;  %v3348_v37 = vadd.f32 1.0, %v6560_v22 }
 0x5c7   : > { %6585 = vtanh.f32 %v3455_v61  ;;  %v3349_v16 = vadd.f32 1.0, %v6562_v11  ;;  %v6564_v63 = vpop.eup %6563 }
 0x5c8   : > { %6587 = vtanh.f32 %v3456_v35  ;;  %v6566_v45 = vpop.eup %6565 }
 0x5c9   : > { %6589 = vrcp.f32 %v3347_v14  ;;  %v6568_v59 = vpop.eup %6567 }
 0x5ca   : > { %6591 = vrcp.f32 %v3348_v37  ;;  %v6570_v24 = vpop.eup %6569 }
 0x5cb   : > { %6593 = vrcp.f32 %v3349_v16 }
 0x5cd   : > { %v6572_v9 = vpop.eup %6571 }
 0x5ce   : > { %v6574_v49 = vpop.eup %6573  ;;  %v3465_v38 = vsub.f32 %v8328_v62, %v6572_v9 }
 0x5cf   : > { %v6576_v30 = vpop.eup %6575 }
 0x5d0   : > { %v6578_v51 = vpop.eup %6577  ;;  %v3466_v39 = vsub.f32 %v8332_v13, %v6576_v30  ;;  %v3473_v34 = vmul.f32 %v6564_v63, %v3465_v38 }
 0x5d1   : > { %v6580_v52 = vpop.eup %6579  ;;  %v3467_v41 = vsub.f32 %v8337_v28, %v6578_v51 }
 0x5d2   : > { %v6582_v0 = vpop.eup %6581  ;;  %v3468_v40 = vsub.f32 %v8340_v10, %v6580_v52  ;;  %v3474_v55 = vmul.f32 %v6566_v45, %v3466_v39  ;;  %v8615_v19 = vadd.f32 %v6572_v9, %v3473_v34 }
 0x5d3   : > { %v6584_v47 = vpop.eup %6583  ;;  %v3469_v5 = vsub.f32 %v8344_v48, %v6582_v0  ;;  %v3475_v62 = vmul.f32 %v6568_v59, %v3467_v41  ;;  %v9369_v41 = vld [vmem:[#allocation27_spill] sm:$0xff] }
 0x5d4   : > { %v6586_v60 = vpop.eup %6585  ;;  %v3470_v29 = vsub.f32 %v8352_v50, %v6584_v47  ;;  %v3476_v13 = vmul.f32 %v6570_v24, %v3468_v40  ;;  %v8619_v23 = vadd.f32 %v6576_v30, %v3474_v55  ;;  %3489 = vst [vmem:[%s7156_s7 + $0x4] sm:$0x1] %v8615_v19  ;;  %v9371_v40 = vld [vmem:[#allocation36_spill] sm:$0xff]  ;;  %v9372_v55 = vld [vmem:[#allocation30_spill] sm:$0xff] }
 0x5d5   : > { %v6588_v28 = vpop.eup %6587  ;;  %v3471_v10 = vsub.f32 %v8358_v32, %v6586_v60  ;;  %v3477_v57 = vmul.f32 %v6574_v49, %v3469_v5  ;;  %v8624_v2 = vadd.f32 %v6578_v51, %v3475_v62  ;;  %v9374_v5 = vld [vmem:[#allocation37_spill] sm:$0xff]  ;;  %v9375_v62 = vld [vmem:[#allocation38_spill] sm:$0xff] }
 0x5d6   : > { %v6590_v18 = vpop.eup %6589  ;;  %v3472_v48 = vsub.f32 %v8360_v17, %v6588_v28  ;;  %v8627_v58 = vadd.f32 %v6580_v52, %v3476_v13  ;;  %3490 = vst [vmem:[%s7156_s7 + $0xc] sm:$0x1] %v8619_v23  ;;  %v3521_v35 = vcombine.low %v8615_v19, %v8619_v23  ;;  %v9368_v52 = vld [vmem:[#allocation35_spill] sm:$0xff] }
 0x5d7   : > { %v6592_v50 = vpop.eup %6591  ;;  %v3478_v56 = vmul.f32 %v6590_v18, %v3470_v29  ;;  %v8631_v22 = vadd.f32 %v6582_v0, %v3477_v57  ;;  %3491 = vst [vmem:[%s7156_s7 + $0x14] sm:$0x1] %v8624_v2  ;;  %v9370_v0 = vld [vmem:[#allocation29_spill] sm:$0xff]  ;;  %v6933_v29 = vld [vmem:[#allocation3 + $0x158] sm:$0xff] }
 0x5d8   : > { %v6594_v32 = vpop.eup %6593  ;;  %v3479_v61 = vmul.f32 %v6592_v50, %v3471_v10  ;;  %3492 = vst [vmem:[%s7156_s7 + $0x1c] sm:$0x1] %v8627_v58  ;;  %v3522_v17 = vcombine.low %v8624_v2, %v8627_v58  ;;  %v3531_v24 = vrot.slane %v3521_v35, %v7542_v1  ;;  %v8749_v35 = vld [vmem:[%s7154_s6 + $0x65] ss:$8 sm:$0x7] }
 0x5d9   : > { %v3480_v14 = vmul.f32 %v6594_v32, %v3472_v48  ;;  %v8639_v11 = vadd.f32 %v6584_v47, %v3478_v56  ;;  %3493 = vst [vmem:[%s7156_s7 + $0x24] sm:$0x1] %v8631_v22  ;;  %v9373_v47 = vld [vmem:[#allocation32_spill] sm:$0xff] }
 0x5da   : > { %v8645_v37 = vadd.f32 %v6586_v60, %v3479_v61  ;;  %v3538_v45 = vrot.slane %v3522_v17, %v7542_v1  ;;  %v9376_v60 = vld [vmem:[#allocation39_spill] sm:$0xff]  ;;  %v8735_v48 = vld [vmem:[%s7154_s6 + $0x5] ss:$8 sm:$0x7] }
 0x5db   : > { %v8647_v16 = vadd.f32 %v6588_v28, %v3480_v14  ;;  %3494 = vst [vmem:[%s7156_s7 + $0x2c] sm:$0x1] %v8639_v11  ;;  %v3523_v63 = vcombine.low %v8631_v22, %v8639_v11  ;;  %v8740_v61 = vld [vmem:[%s7154_s6 + $0x1d] ss:$8 sm:$0x7] }
 0x5dc   : > { %3495 = vst [vmem:[%s7156_s7 + $0x34] sm:$0x1] %v8645_v37  ;;  %v3553_v38 = vcombine.low %v3531_v24, %v3538_v45  ;;  %v8743_v17 = vld [vmem:[%s7154_s6 + $0x35] ss:$8 sm:$0x7] }
 0x5dd   : > { %3496 = vst [vmem:[%s7156_s7 + $0x3c] sm:$0x1] %v8647_v16  ;;  %v3524_v59 = vcombine.low %v8645_v37, %v8647_v16  ;;  %v3545_v9 = vrot.slane %v3523_v63, %v7542_v1  ;;  %v8746_v14 = vld [vmem:[%s7154_s6 + $0x4d] ss:$8 sm:$0x7] }
 0x5de   : > { %v3561_v51 = vrot.slane %v3553_v38, %v7542_v1  ;;  %v8757_v38 = vld [vmem:[%s7154_s6 + $0x95] ss:$8 sm:$0x7] }
 0x5df   : > { %v3552_v49 = vrot.slane %v3524_v59, %v7542_v1 }
 0x5e1   : > { %v3554_v30 = vcombine.low %v3545_v9, %v3552_v49  ;;  %v8754_v49 = vld [vmem:[%s7154_s6 + $0x7d] ss:$8 sm:$0x7] }
 0x5e3   : > { %v3568_v39 = vrot.slane %v3554_v30, %v7542_v1 }
 0x5e5   : > { %v3569_v34 = vcombine.low %v3561_v51, %v3568_v39 }
 0x5e7   : > { %3636 = vmatmul.mubr.f32.vlgmr.msra.gmra.mxu0 %v3569_v34  ;;  %6076 = vmatmul.mubr.f32.vlgmr.msra.gmra.mxu1 %v3569_v34 }
 0x5e8   : > { %4170 = vmatpush1.msra.mxu0 %v8378_v6  ;;  %6079 = vmatpush3.msra.mxu1 %v8381_v12  ;;  %v9349_v6 = vld [vmem:[#allocation12_spill] sm:$0xff]  ;;  %v9350_v12 = vld [vmem:[#allocation22_spill] sm:$0xff] }
 0x5e9   : > { %4171 = vmatprep.subr.mxu0 %v8384_v44  ;;  %6080 = vmatprep.subr.mxu1 %v9237_v4  ;;  %v9351_v44 = vld [vmem:[#allocation13_spill] sm:$0xff] }
 0x5ea   : > { %4172 = vmatpush1.msra.mxu0 %v8388_v21  ;;  %6081 = vmatpush3.msra.mxu1 %v8391_v33  ;;  %v9352_v21 = vld [vmem:[#allocation14_spill] sm:$0xff]  ;;  %v9353_v33 = vld [vmem:[#allocation25_spill] sm:$0xff] }
 0x5eb   : > { %4173 = vmatprep.subr.mxu0 %v8394_v43  ;;  %6082 = vmatprep.subr.mxu1 %v9237_v4  ;;  %v9354_v43 = vld [vmem:[#allocation15_spill] sm:$0xff] }
 0x5ec   : > { %4174 = vmatpush1.msra.mxu0 %v8398_v25  ;;  %6083 = vmatpush3.msra.mxu1 %v8401_v20  ;;  %v9355_v25 = vld [vmem:[#allocation16_spill] sm:$0xff] }
 0x5ed   : > { %4175 = vmatprep.subr.mxu0 %v8404_v27  ;;  %6084 = vmatprep.subr.mxu1 %v9237_v4  ;;  %v9356_v20 = vld [vmem:[#allocation28_spill] sm:$0xff]  ;;  %v9357_v27 = vld [vmem:[#allocation17_spill] sm:$0xff] }
 0x5ee   : > { %4176 = vmatpush1.msra.mxu0 %v8408_v53  ;;  %6085 = vmatpush3.msra.mxu1 %v8411_v31  ;;  %v9358_v53 = vld [vmem:[#allocation18_spill] sm:$0xff]  ;;  %v9359_v31 = vld [vmem:[#allocation31_spill] sm:$0xff] }
 0x5ef   : > { %4177 = vmatprep.subr.mxu0 %v8414_v46  ;;  %6086 = vmatprep.subr.mxu1 %v9237_v4  ;;  %v9360_v46 = vld [vmem:[#allocation19_spill] sm:$0xff] }
 0x5f0   : > { %4178 = vmatpush1.msra.mxu0 %v8418_v42  ;;  %6087 = vmatpush3.msra.mxu1 %v8421_v54  ;;  %v9361_v42 = vld [vmem:[#allocation20_spill] sm:$0xff]  ;;  %v9362_v54 = vld [vmem:[#allocation33_spill] sm:$0xff] }
 0x5f1   : > { %4179 = vmatprep.subr.mxu0 %v8424_v26  ;;  %6088 = vmatprep.subr.mxu1 %v9237_v4  ;;  %v9363_v26 = vld [vmem:[#allocation21_spill] sm:$0xff] }
 0x5f2   : > { %4180 = vmatpush1.msra.mxu0 %v8428_v7  ;;  %6089 = vmatpush3.msra.mxu1 %v8431_v3  ;;  %v9364_v7 = vld [vmem:[#allocation23_spill] sm:$0xff]  ;;  %v9365_v3 = vld [vmem:[#allocation34_spill] sm:$0xff] }
 0x5f3   : > { %4181 = vmatprep.subr.mxu0 %v8434_v36  ;;  %6090 = vmatprep.subr.mxu1 %v9237_v4  ;;  %v9366_v36 = vld [vmem:[#allocation24_spill] sm:$0xff] }
 0x5f4   : > { %4182 = vmatpush1.msra.mxu0 %v8438_v8  ;;  %6091 = vmatpush3.msra.mxu1 %v9349_v6  ;;  %v9367_v8 = vld [vmem:[#allocation26_spill] sm:$0xff] }
 0x5f5   : > { %4183 = vmatprep.subr.mxu0 %v9350_v12  ;;  %6092 = vmatprep.subr.mxu1 %v9237_v4  ;;  %v8763_v12 = vld [vmem:[%s7154_s6 + $0xad] ss:$8 sm:$0x7] }
 0x5f6   : > { %4184 = vmatpush1.msra.mxu0 %v9351_v44  ;;  %6093 = vmatpush3.msra.mxu1 %v9352_v21 }
 0x5f7   : > { %4185 = vmatprep.subr.mxu0 %v9353_v33  ;;  %6094 = vmatprep.subr.mxu1 %v9237_v4 }
 0x5f8   : > { %4186 = vmatpush1.msra.mxu0 %v9354_v43  ;;  %6095 = vmatpush3.msra.mxu1 %v9355_v25 }
 0x5f9   : > { %4187 = vmatprep.subr.mxu0 %v9356_v20  ;;  %6096 = vmatprep.subr.mxu1 %v9237_v4 }
 0x5fa   : > { %4188 = vmatpush1.msra.mxu0 %v9357_v27  ;;  %6097 = vmatpush3.msra.mxu1 %v9358_v53 }
 0x5fb   : > { %4189 = vmatprep.subr.mxu0 %v9359_v31  ;;  %6098 = vmatprep.subr.mxu1 %v9237_v4 }
 0x5fc   : > { %4190 = vmatpush1.msra.mxu0 %v9360_v46  ;;  %6099 = vmatpush3.msra.mxu1 %v9361_v42 }
 0x5fd   : > { %4191 = vmatprep.subr.mxu0 %v9362_v54  ;;  %6100 = vmatprep.subr.mxu1 %v9237_v4 }
 0x5fe   : > { %4192 = vmatpush1.msra.mxu0 %v9363_v26  ;;  %6101 = vmatpush3.msra.mxu1 %v9364_v7 }
 0x5ff   : > { %4193 = vmatprep.subr.mxu0 %v9365_v3  ;;  %6102 = vmatprep.subr.mxu1 %v9237_v4 }
 0x600   : > { %4194 = vmatpush1.msra.mxu0 %v9366_v36  ;;  %6103 = vmatpush3.msra.mxu1 %v9367_v8  ;;  %v3834_v8 = vrot.slane %v8735_v48, 1 }
 0x601   : > { %4195 = vmatprep.subr.mxu0 %v9368_v52  ;;  %6104 = vmatprep.subr.mxu1 %v9237_v4 }
 0x602   : > { %4196 = vmatpush1.msra.mxu0 %v9369_v41  ;;  %6105 = vmatpush3.msra.mxu1 %v9370_v0  ;;  %v3835_v0 = vrot.slane %v8740_v61, 1 }
 0x603   : > { %4197 = vmatprep.subr.mxu0 %v9371_v40  ;;  %6106 = vmatprep.subr.mxu1 %v9237_v4  ;;  %v3836_v40 = vrot.slane %v8743_v17, 1 }
 0x604   : > { %4198 = vmatpush1.msra.mxu0 %v9372_v55  ;;  %6107 = vmatpush3.msra.mxu1 %v9373_v47  ;;  %v3838_v55 = vrot.slane %v8749_v35, 1 }
 0x605   : > { %4199 = vmatprep.subr.mxu0 %v9374_v5  ;;  %6108 = vmatprep.subr.mxu1 %v9237_v4 }
 0x606   : > { %4200 = vmatpush1.msra.mxu0 %v9375_v62  ;;  %4233 = vmatprep.mubr.f32.mxu0 %v9237_v4  ;;  %v3837_v62 = vrot.slane %v8746_v14, 1 }
 0x607   : > { %6109 = vmatpush3.msra.mxu1 %v9376_v60  ;;  %6110 = vmatprep.mubr.msk.f32.mxu1 %vm7028_vm0, %v9237_v4 }
 0x608   : > { %4767 = vmatprep.subr.mxu0 %v6933_v29  ;;  %6113 = vmatprep.subr.mxu1 %v9237_v4 }
 0x6a7   : > { %v3637_v13 = vpop.f32.mrf.mxu0  ;;  %v8731_v28 = vpop.f32.mrf.mxu1 }
 0x6a8   : > { %v3713_v10 = vcombine.high %v3637_v13, %v3637_v13  ;;  %v3720_v57 = vrot.slane %v3637_v13, %v7542_v1 }
 0x6a9   : > { %v6077_v18 = vpop.f32.mrf.mxu1  ;;  %v3639_v9 = vpop.f32.mrf.mxu0 }
 0x6aa   : > { %v3727_v50 = vrot.slane %v3713_v10, %v7542_v1  ;;  %v3728_v56 = vcombine.high %v3720_v57, %v3720_v57  ;;  %v3736_v32 = vrot.slane %v3720_v57, %v7542_v1  ;;  %v3851_v43 = vcombine.high %v3639_v9, %v3639_v9 }
 0x6ab   : > { %v3858_v7 = vrot.slane %v3639_v9, %v7542_v1 }
 0x6ac   : > { %v3729_v63 = vcombine.high %v3727_v50, %v3727_v50  ;;  %v3743_v45 = vrot.slane %v3727_v50, %v7542_v1  ;;  %v3750_v59 = vrot.slane %v3728_v56, %v7542_v1  ;;  %v3758_v24 = vcombine.high %v3736_v32, %v3736_v32 }
 0x6ad   : > { %v3770_v30 = vadd.f32 %v8735_v48, %v3736_v32  ;;  %v3865_v52 = vrot.slane %v3851_v43, %v7542_v1  ;;  %v3866_v47 = vcombine.high %v3858_v7, %v3858_v7  ;;  %v3874_v5 = vrot.slane %v3858_v7, %v7542_v1 }
 0x6ae   : > { %v3757_v51 = vrot.slane %v3729_v63, %v7542_v1  ;;  %v3759_v39 = vcombine.high %v3743_v45, %v3743_v45  ;;  %v3760_v34 = vcombine.high %v3750_v59, %v3750_v59  ;;  %v3771_v6 = vadd.f32 %v8740_v61, %v3750_v59 }
 0x6af   : > { %v3772_v44 = vadd.f32 %v8743_v17, %v3758_v24  ;;  %v3774_v21 = vadd.f32 %v8749_v35, %v3743_v45  ;;  %v5661_v33 = vmul.f32 -1.442695, %v3770_v30  ;;  %v3881_v60 = vrot.slane %v3865_v52, %v7542_v1 }
 0x6b0   : > { %v3761_v25 = vcombine.high %v3757_v51, %v3757_v51  ;;  %v3773_v20 = vadd.f32 %v8746_v14, %v3760_v34  ;;  %v3775_v27 = vadd.f32 %v8754_v49, %v3757_v51  ;;  %v3776_v53 = vadd.f32 %v8757_v38, %v3759_v39 }
 0x6b1   : > { %6595 = vpow2.f32 %v5661_v33  ;;  %v5662_v31 = vmul.f32 -1.442695, %v3771_v6  ;;  %v5663_v46 = vmul.f32 -1.442695, %v3772_v44  ;;  %v5665_v26 = vmul.f32 -1.442695, %v3774_v21 }
 0x6b2   : > { %v3777_v42 = vadd.f32 %v8763_v12, %v3761_v25  ;;  %v5664_v54 = vmul.f32 -1.442695, %v3773_v20  ;;  %v5666_v3 = vmul.f32 -1.442695, %v3775_v27  ;;  %v5667_v36 = vmul.f32 -1.442695, %v3776_v53 }
 0x6b3   : > { %6597 = vpow2.f32 %v5662_v31  ;;  %v3867_v29 = vcombine.high %v3865_v52, %v3865_v52  ;;  %v3888_v13 = vrot.slane %v3866_v47, %v7542_v1  ;;  %v3896_v10 = vcombine.high %v3874_v5, %v3874_v5 }
 0x6b4   : > { %6599 = vpow2.f32 %v5663_v46  ;;  %v5668_v41 = vmul.f32 -1.442695, %v3777_v42  ;;  %v3908_v57 = vadd.f32 %v3874_v5, %v3834_v8  ;;  %v3912_v32 = vadd.f32 %v3881_v60, %v3838_v55 }
 0x6b5   : > { %6601 = vpow2.f32 %v5664_v54  ;;  %v3898_v18 = vcombine.high %v3888_v13, %v3888_v13  ;;  %v3909_v50 = vadd.f32 %v3888_v13, %v3835_v0  ;;  %v3910_v56 = vadd.f32 %v3896_v10, %v3836_v40 }
 0x6b6   : > { %6603 = vpow2.f32 %v5665_v26  ;;  %v5669_v63 = vmul.f32 -1.442695, %v3908_v57  ;;  %v3895_v45 = vrot.slane %v3867_v29, %v7542_v1  ;;  %v3839_v51 = vrot.slane %v8754_v49, 1 }
 0x6b7   : > { %6605 = vpow2.f32 %v5666_v3  ;;  %v3911_v59 = vadd.f32 %v3898_v18, %v3837_v62  ;;  %v5670_v24 = vmul.f32 -1.442695, %v3909_v50  ;;  %v5671_v9 = vmul.f32 -1.442695, %v3910_v56 }
 0x6b8   : > { %6607 = vpow2.f32 %v5667_v36  ;;  %v5673_v34 = vmul.f32 -1.442695, %v3912_v32  ;;  %v3840_v44 = vrot.slane %v8757_v38, 1  ;;  %v3897_v21 = vcombine.high %v3881_v60, %v3881_v60 }
 0x6b9   : > { %6609 = vpow2.f32 %v5668_v41  ;;  %v5672_v39 = vmul.f32 -1.442695, %v3911_v59  ;;  %v3964_v43 = vadd.f32 %v8592_v15, %v8731_v28  ;;  %v3841_v25 = vrot.slane %v8763_v12, 1 }
 0x6ba   : > { %6611 = vpow2.f32 %v5669_v63  ;;  %v3899_v20 = vcombine.high %v3895_v45, %v3895_v45  ;;  %v3913_v42 = vadd.f32 %v3895_v45, %v3839_v51  ;;  %v3914_v7 = vadd.f32 %v3897_v21, %v3840_v44 }
 0x6bb   : > { %6613 = vpow2.f32 %v5670_v24  ;;  %v3966_v8 = vcombine.high %v3964_v43, %v3964_v43  ;;  %v3973_v41 = vrot.slane %v3964_v43, %v7542_v1  ;;  %v4031_v45 = vrot.slane %v8735_v48, 2 }
 0x6bc   : > { %6615 = vpow2.f32 %v5671_v9  ;;  %v3915_v15 = vadd.f32 %v3899_v20, %v3841_v25  ;;  %v5674_v55 = vmul.f32 -1.442695, %v3913_v42  ;;  %v5675_v5 = vmul.f32 -1.442695, %v3914_v7 }
 0x6bd   : > { %6617 = vpow2.f32 %v5672_v39  ;;  %v3980_v62 = vrot.slane %v3966_v8, %v7542_v1  ;;  %v3981_v29 = vcombine.high %v3973_v41, %v3973_v41  ;;  %v3989_v56 = vrot.slane %v3973_v41, %v7542_v1 }
 0x6be   : > { %v6596_v30 = vpop.eup %6595  ;;  %v5676_v60 = vmul.f32 -1.442695, %v3915_v15  ;;  %v4033_v51 = vrot.slane %v8743_v17, 2  ;;  %v4034_v39 = vrot.slane %v8746_v14, 2  ;;  %v4035_v44 = vrot.slane %v8749_v35, 2 }
 0x6bf   : > { %v3802_v6 = vadd.f32 1.0, %v6596_v30  ;;  %v3982_v50 = vcombine.high %v3980_v62, %v3980_v62  ;;  %v4003_v59 = vrot.slane %v3981_v29, %v7542_v1  ;;  %v4032_v30 = vrot.slane %v8740_v61, 2 }
 0x6c0   : > { %v6598_v33 = vpop.eup %6597  ;;  %v3996_v21 = vrot.slane %v3980_v62, %v7542_v1  ;;  %v4011_v25 = vcombine.high %v3989_v56, %v3989_v56  ;;  %v4037_v35 = vrot.slane %v8757_v38, 2 }
 0x6c1   : > { %v6600_v27 = vpop.eup %6599  ;;  %v3803_v53 = vadd.f32 1.0, %v6598_v33  ;;  %6619 = vrcp.f32 %v3802_v6  ;;  %v4010_v48 = vrot.slane %v3982_v50, %v7542_v1  ;;  %v4013_v61 = vcombine.high %v4003_v59, %v4003_v59 }
 0x6c2   : > { %v6602_v31 = vpop.eup %6601  ;;  %v3804_v46 = vadd.f32 1.0, %v6600_v27  ;;  %6621 = vpow2.f32 %v5673_v34 }
 0x6c3   : > { %v6604_v54 = vpop.eup %6603  ;;  %v3805_v26 = vadd.f32 1.0, %v6602_v31  ;;  %6623 = vrcp.f32 %v3803_v53  ;;  %v4036_v31 = vrot.slane %v8754_v49, 2 }
 0x6c4   : > { %v6606_v3 = vpop.eup %6605  ;;  %v3806_v36 = vadd.f32 1.0, %v6604_v54  ;;  %6625 = vrcp.f32 %v3804_v46  ;;  %v4038_v54 = vrot.slane %v8763_v12, 2 }
 0x6c5   : > { %v6608_v28 = vpop.eup %6607  ;;  %v3807_v52 = vadd.f32 1.0, %v6606_v3  ;;  %6627 = vrcp.f32 %v3805_v26 }
 0x6c6   : > { %v6610_v0 = vpop.eup %6609  ;;  %v3808_v40 = vadd.f32 1.0, %v6608_v28  ;;  %6629 = vrcp.f32 %v3806_v36  ;;  %v4012_v36 = vcombine.high %v3996_v21, %v3996_v21 }
 0x6c7   : > { %v3809_v47 = vadd.f32 1.0, %v6610_v0  ;;  %6631 = vrcp.f32 %v3807_v52  ;;  %v6612_v13 = vpop.eup %6611  ;;  %v4014_v52 = vcombine.high %v4010_v48, %v4010_v48 }
 0x6c8   : > { %6633 = vrcp.f32 %v3808_v40  ;;  %v6614_v10 = vpop.eup %6613  ;;  %v3940_v57 = vadd.f32 1.0, %v6612_v13 }
 0x6c9   : > { %6635 = vrcp.f32 %v3809_v47  ;;  %v6616_v18 = vpop.eup %6615  ;;  %v3941_v32 = vadd.f32 1.0, %v6614_v10 }
 0x6ca   : > { %6637 = vpow2.f32 %v5674_v55  ;;  %v6618_v63 = vpop.eup %6617  ;;  %v3942_v24 = vadd.f32 1.0, %v6616_v18 }
 0x6cb   : > { %6639 = vpow2.f32 %v5675_v5  ;;  %v3943_v34 = vadd.f32 1.0, %v6618_v63 }
 0x6cc   : > { %6641 = vpow2.f32 %v5676_v60 }
 0x6cd   : > { %6643 = vrcp.f32 %v3940_v57 }
 0x6ce   : > { %v6620_v9 = vpop.eup %6619  ;;  %6645 = vrcp.f32 %v3941_v32 }
 0x6cf   : > { %v6622_v6 = vpop.eup %6621  ;;  %v4023_v33 = vmul.f32 %v6620_v9, %v3989_v56  ;;  %6647 = vrcp.f32 %v3942_v24 }
 0x6d0   : > { %v6624_v43 = vpop.eup %6623  ;;  %v3944_v20 = vadd.f32 1.0, %v6622_v6  ;;  %6649 = vrcp.f32 %v3943_v34 }
 0x6d1   : > { %v6626_v27 = vpop.eup %6625  ;;  %v4024_v53 = vmul.f32 %v6624_v43, %v4003_v59  ;;  %v4047_v17 = vadd.f32 %v4031_v45, %v4023_v33 }
 0x6d2   : > { %v6628_v14 = vpop.eup %6627  ;;  %v4025_v46 = vmul.f32 %v6626_v27, %v4011_v25 }
 0x6d3   : > { %v6630_v42 = vpop.eup %6629  ;;  %v4026_v26 = vmul.f32 %v6628_v14, %v4013_v61  ;;  %v4048_v7 = vadd.f32 %v4032_v30, %v4024_v53  ;;  %6651 = vtanh.f32 %v4047_v17 }
 0x6d4   : > { %v6632_v3 = vpop.eup %6631  ;;  %v4027_v8 = vmul.f32 %v6630_v42, %v3996_v21  ;;  %v4049_v15 = vadd.f32 %v4033_v51, %v4025_v46  ;;  %6653 = vrcp.f32 %v3944_v20 }
 0x6d5   : > { %v6634_v28 = vpop.eup %6633  ;;  %v4028_v41 = vmul.f32 %v6632_v3, %v4010_v48  ;;  %v4050_v0 = vadd.f32 %v4034_v39, %v4026_v26  ;;  %6655 = vtanh.f32 %v4048_v7 }
 0x6d6   : > { %v6636_v49 = vpop.eup %6635  ;;  %v4029_v38 = vmul.f32 %v6634_v28, %v4012_v36  ;;  %v4051_v40 = vadd.f32 %v4035_v44, %v4027_v8  ;;  %6657 = vtanh.f32 %v4049_v15 }
 0x6d7   : > { %v6638_v55 = vpop.eup %6637  ;;  %v4030_v47 = vmul.f32 %v6636_v49, %v4014_v52  ;;  %v4052_v12 = vadd.f32 %v4036_v31, %v4028_v41  ;;  %6659 = vtanh.f32 %v4050_v0 }
 0x6d8   : > { %v6640_v5 = vpop.eup %6639  ;;  %v4053_v62 = vadd.f32 %v4037_v35, %v4029_v38  ;;  %6661 = vtanh.f32 %v4051_v40  ;;  %v3945_v60 = vadd.f32 1.0, %v6638_v55 }
 0x6d9   : > { %v6642_v29 = vpop.eup %6641  ;;  %v4054_v13 = vadd.f32 %v4038_v54, %v4030_v47  ;;  %6663 = vtanh.f32 %v4052_v12  ;;  %v3946_v10 = vadd.f32 1.0, %v6640_v5  ;;  %v6934_v47 = vld [vmem:[#allocation3 + $0x30] sm:$0xff]  ;;  %v6936_v5 = vld [vmem:[#allocation3 + $0x68] sm:$0xff] }
 0x6da   : > { %6665 = vtanh.f32 %v4053_v62  ;;  %v3947_v57 = vadd.f32 1.0, %v6642_v29  ;;  %v6644_v18 = vpop.eup %6643  ;;  %v6935_v12 = vld [vmem:[#allocation3 + $0x150] sm:$0xff]  ;;  %v6939_v29 = vld [vmem:[#allocation3] sm:$0xff] }
 0x6db   : > { %6667 = vtanh.f32 %v4054_v13  ;;  %v6646_v50 = vpop.eup %6645  ;;  %v6937_v62 = vld [vmem:[#allocation3 + $0x50] sm:$0xff]  ;;  %v6940_v13 = vld [vmem:[#allocation3 + $0x8] sm:$0xff] }
 0x6dc   : > { %6669 = vrcp.f32 %v3945_v60  ;;  %v6648_v56 = vpop.eup %6647  ;;  %v6938_v60 = vld [vmem:[#allocation3 + $0x70] sm:$0xff] }
 0x6dd   : > { %6671 = vrcp.f32 %v3946_v10  ;;  %v6650_v32 = vpop.eup %6649  ;;  %v6941_v10 = vld [vmem:[#allocation3 + $0x78] sm:$0xff] }
 0x6de   : > { %6673 = vrcp.f32 %v3947_v57  ;;  %v6942_v57 = vld [vmem:[#allocation3 + $0x18] sm:$0xff] }
 0x6e0   : > { %v6652_v63 = vpop.eup %6651 }
 0x6e1   : > { %v6654_v45 = vpop.eup %6653  ;;  %v4063_v59 = vsub.f32 %v8615_v19, %v6652_v63 }
 0x6e2   : > { %v6656_v24 = vpop.eup %6655 }
 0x6e3   : > { %v6658_v9 = vpop.eup %6657  ;;  %v4064_v30 = vsub.f32 %v8619_v23, %v6656_v24  ;;  %v4071_v51 = vmul.f32 %v6644_v18, %v4063_v59  ;;  %v6943_v18 = vld [vmem:[#allocation3 + $0xc0] sm:$0xff]  ;;  %v6949_v59 = vld [vmem:[#allocation3 + $0xf0] sm:$0xff] }
 0x6e4   : > { %v6660_v39 = vpop.eup %6659  ;;  %v4065_v34 = vsub.f32 %v8624_v2, %v6658_v9 }
 0x6e5   : > { %v6662_v6 = vpop.eup %6661  ;;  %v4066_v44 = vsub.f32 %v8627_v58, %v6660_v39  ;;  %v4072_v21 = vmul.f32 %v6646_v50, %v4064_v30  ;;  %v8805_v33 = vadd.f32 %v6652_v63, %v4071_v51  ;;  %v6944_v50 = vld [vmem:[#allocation3 + $0x98] sm:$0xff]  ;;  %v6952_v30 = vld [vmem:[#allocation3 + $0x88] sm:$0xff]  ;;  %v6953_v51 = vld [vmem:[#allocation3 + $0x170] sm:$0xff] }
 0x6e6   : > { %v6664_v43 = vpop.eup %6663  ;;  %v4067_v48 = vsub.f32 %v8631_v22, %v6662_v6  ;;  %v4073_v19 = vmul.f32 %v6648_v56, %v4065_v34  ;;  %v6945_v56 = vld [vmem:[#allocation3 + $0x28] sm:$0xff]  ;;  %v6947_v63 = vld [vmem:[#allocation3 + $0x38] sm:$0xff] }
 0x6e7   : > { %v6666_v25 = vpop.eup %6665  ;;  %v4068_v20 = vsub.f32 %v8639_v11, %v6664_v43  ;;  %v4074_v23 = vmul.f32 %v6650_v32, %v4066_v44  ;;  %v8809_v27 = vadd.f32 %v6656_v24, %v4072_v21  ;;  %4087 = vst [vmem:[%s7156_s7 + $0x5] sm:$0x1] %v8805_v33  ;;  %v6946_v32 = vld [vmem:[#allocation3 + $0xc8] sm:$0xff]  ;;  %v6950_v24 = vld [vmem:[#allocation3 + $0x60] sm:$0xff]  ;;  %v6957_v44 = vld [vmem:[#allocation3 + $0xb8] sm:$0xff] }
 0x6e8   : > { %v6668_v2 = vpop.eup %6667  ;;  %v4069_v58 = vsub.f32 %v8645_v37, %v6666_v25  ;;  %v4075_v61 = vmul.f32 %v6654_v45, %v4067_v48  ;;  %v8814_v53 = vadd.f32 %v6658_v9, %v4073_v19  ;;  %v6948_v45 = vld [vmem:[#allocation3 + $0x140] sm:$0xff]  ;;  %v6955_v34 = vld [vmem:[#allocation3 + $0xe8] sm:$0xff]  ;;  %v6961_v19 = vld [vmem:[#allocation3 + $0x138] sm:$0xff] }
 0x6e9   : > { %v6670_v17 = vpop.eup %6669  ;;  %v4070_v22 = vsub.f32 %v8647_v16, %v6668_v2  ;;  %v8817_v14 = vadd.f32 %v6660_v39, %v4074_v23  ;;  %4088 = vst [vmem:[%s7156_s7 + $0xd] sm:$0x1] %v8809_v27  ;;  %v4119_v26 = vcombine.low %v8805_v33, %v8809_v27  ;;  %v6951_v9 = vld [vmem:[#allocation3 + $0xa0] sm:$0xff]  ;;  %v6954_v39 = vld [vmem:[#allocation3 + $0xf8] sm:$0xff]  ;;  %v6958_v21 = vld [vmem:[#allocation3 + $0xa8] sm:$0xff] }
 0x6ea   : > { %v6672_v11 = vpop.eup %6671  ;;  %v4076_v31 = vmul.f32 %v6670_v17, %v4068_v20  ;;  %v8821_v35 = vadd.f32 %v6662_v6, %v4075_v61  ;;  %4089 = vst [vmem:[%s7156_s7 + $0x15] sm:$0x1] %v8814_v53  ;;  %v6956_v6 = vld [vmem:[#allocation3 + $0x20] sm:$0xff]  ;;  %v6964_v23 = vld [vmem:[#allocation3 + $0xd8] sm:$0xff]  ;;  %v6967_v61 = vld [vmem:[#allocation3 + $0x148] sm:$0xff] }
 0x6eb   : > { %v6674_v37 = vpop.eup %6673  ;;  %v4077_v46 = vmul.f32 %v6672_v11, %v4069_v58  ;;  %4090 = vst [vmem:[%s7156_s7 + $0x1d] sm:$0x1] %v8817_v14  ;;  %v4120_v16 = vcombine.low %v8814_v53, %v8817_v14  ;;  %v4129_v28 = vrot.slane %v4119_v26, %v7542_v1  ;;  %v6960_v48 = vld [vmem:[#allocation3 + $0x120] sm:$0xff]  ;;  %v6968_v17 = vld [vmem:[#allocation3 + $0x58] sm:$0xff]  ;;  %v6970_v11 = vld [vmem:[#allocation3 + $0x110] sm:$0xff] }
 0x6ec   : > { %v4078_v42 = vmul.f32 %v6674_v37, %v4070_v22  ;;  %v8829_v54 = vadd.f32 %v6664_v43, %v4076_v31  ;;  %4091 = vst [vmem:[%s7156_s7 + $0x25] sm:$0x1] %v8821_v35  ;;  %v6959_v43 = vld [vmem:[#allocation3 + $0x168] sm:$0xff]  ;;  %v6963_v20 = vld [vmem:[#allocation3 + $0x80] sm:$0xff]  ;;  %v6969_v22 = vld [vmem:[#allocation3 + $0x90] sm:$0xff] }
 0x6ed   : > { %v8835_v7 = vadd.f32 %v6666_v25, %v4077_v46  ;;  %v4136_v8 = vrot.slane %v4120_v16, %v7542_v1  ;;  %v6962_v25 = vld [vmem:[#allocation3 + $0xe0] sm:$0xff]  ;;  %v6971_v31 = vld [vmem:[#allocation3 + $0x118] sm:$0xff]  ;;  %v6974_v16 = vld [vmem:[#allocation3 + $0x108] sm:$0xff] }
 0x6ee   : > { %v8837_v3 = vadd.f32 %v6668_v2, %v4078_v42  ;;  %4092 = vst [vmem:[%s7156_s7 + $0x2d] sm:$0x1] %v8829_v54  ;;  %v4121_v36 = vcombine.low %v8821_v35, %v8829_v54  ;;  %v6965_v2 = vld [vmem:[#allocation3 + $0x130] sm:$0xff]  ;;  %v6966_v58 = vld [vmem:[#allocation3 + $0x100] sm:$0xff]  ;;  %v6972_v37 = vld [vmem:[#allocation3 + $0x178] sm:$0xff] }
 0x6ef   : > { %4093 = vst [vmem:[%s7156_s7 + $0x35] sm:$0x1] %v8835_v7  ;;  %v4151_v0 = vcombine.low %v4129_v28, %v4136_v8  ;;  %v6973_v46 = vld [vmem:[#allocation3 + $0x40] sm:$0xff]  ;;  %v6976_v26 = vld [vmem:[#allocation3 + $0x48] sm:$0xff]  ;;  %v6978_v8 = vld [vmem:[#allocation3 + $0xd0] sm:$0xff] }
 0x6f0   : > { %4094 = vst [vmem:[%s7156_s7 + $0x3d] sm:$0x1] %v8837_v3  ;;  %v4122_v15 = vcombine.low %v8835_v7, %v8837_v3  ;;  %v4143_v52 = vrot.slane %v4121_v36, %v7542_v1  ;;  %v6975_v42 = vld [vmem:[#allocation3 + $0x160] sm:$0xff]  ;;  %v6977_v36 = vld [vmem:[#allocation3 + $0x128] sm:$0xff]  ;;  %v6980_v28 = vld [vmem:[#allocation3 + $0x10] sm:$0xff] }
 0x6f1   : > { %v4159_v38 = vrot.slane %v4151_v0, %v7542_v1 }
 0x6f2   : > { %v4150_v41 = vrot.slane %v4122_v15, %v7542_v1  ;;  %v6979_v15 = vld [vmem:[#allocation3 + $0xb0] sm:$0xff] }
 0x6f4   : > { %v4152_v49 = vcombine.low %v4143_v52, %v4150_v41 }
 0x6f6   : > { %v4166_v40 = vrot.slane %v4152_v49, %v7542_v1 }
 0x6f8   : > { %v4167_v55 = vcombine.low %v4159_v38, %v4166_v40  ;;  %v8877_v40 = vld [vmem:[%s7154_s6 + $0x6] ss:$8 sm:$0x7] }
 0x6fa   : > { %4234 = vmatmul.mubr.f32.vlgmr.msra.gmra.mxu0 %v4167_v55  ;;  %6111 = vmatmul.mubr.f32.vlgmr.msra.gmra.mxu1 %v4167_v55 }
 0x6fb   : > { %4768 = vmatpush1.msra.mxu0 %v6934_v47  ;;  %6114 = vmatpush3.msra.mxu1 %v6935_v12 }
 0x6fc   : > { %4769 = vmatprep.subr.mxu0 %v6936_v5  ;;  %6115 = vmatprep.subr.mxu1 %v9237_v4  ;;  %v8882_v5 = vld [vmem:[%s7154_s6 + $0x1e] ss:$8 sm:$0x7] }
 0x6fd   : > { %4770 = vmatpush1.msra.mxu0 %v6937_v62  ;;  %6116 = vmatpush3.msra.mxu1 %v6938_v60  ;;  %v8888_v62 = vld [vmem:[%s7154_s6 + $0x4e] ss:$8 sm:$0x7] }
 0x6fe   : > { %4771 = vmatprep.subr.mxu0 %v6939_v29  ;;  %6117 = vmatprep.subr.mxu1 %v9237_v4  ;;  %v8891_v60 = vld [vmem:[%s7154_s6 + $0x66] ss:$8 sm:$0x7] }
 0x6ff   : > { %4772 = vmatpush1.msra.mxu0 %v6940_v13  ;;  %6118 = vmatpush3.msra.mxu1 %v6941_v10 }
 0x700   : > { %4773 = vmatprep.subr.mxu0 %v6942_v57  ;;  %6119 = vmatprep.subr.mxu1 %v9237_v4 }
 0x701   : > { %4774 = vmatpush1.msra.mxu0 %v6943_v18  ;;  %6120 = vmatpush3.msra.mxu1 %v6944_v50  ;;  %v8896_v50 = vld [vmem:[%s7154_s6 + $0x7e] ss:$8 sm:$0x7] }
 0x702   : > { %4775 = vmatprep.subr.mxu0 %v6945_v56  ;;  %6121 = vmatprep.subr.mxu1 %v9237_v4  ;;  %v8899_v56 = vld [vmem:[%s7154_s6 + $0x96] ss:$8 sm:$0x7] }
 0x703   : > { %4776 = vmatpush1.msra.mxu0 %v6946_v32  ;;  %6122 = vmatpush3.msra.mxu1 %v6947_v63 }
 0x704   : > { %4777 = vmatprep.subr.mxu0 %v6948_v45  ;;  %6123 = vmatprep.subr.mxu1 %v9237_v4 }
 0x705   : > { %4778 = vmatpush1.msra.mxu0 %v6949_v59  ;;  %6124 = vmatpush3.msra.mxu1 %v6950_v24 }
 0x706   : > { %4779 = vmatprep.subr.mxu0 %v6951_v9  ;;  %6125 = vmatprep.subr.mxu1 %v9237_v4  ;;  %v8905_v9 = vld [vmem:[%s7154_s6 + $0xae] ss:$8 sm:$0x7] }
 0x707   : > { %4780 = vmatpush1.msra.mxu0 %v6952_v30  ;;  %6126 = vmatpush3.msra.mxu1 %v6953_v51 }
 0x708   : > { %4781 = vmatprep.subr.mxu0 %v6954_v39  ;;  %6127 = vmatprep.subr.mxu1 %v9237_v4 }
 0x709   : > { %4782 = vmatpush1.msra.mxu0 %v6955_v34  ;;  %6128 = vmatpush3.msra.mxu1 %v6956_v6 }
 0x70a   : > { %4783 = vmatprep.subr.mxu0 %v6957_v44  ;;  %6129 = vmatprep.subr.mxu1 %v9237_v4 }
 0x70b   : > { %4784 = vmatpush1.msra.mxu0 %v6958_v21  ;;  %6130 = vmatpush3.msra.mxu1 %v6959_v43 }
 0x70c   : > { %4785 = vmatprep.subr.mxu0 %v6960_v48  ;;  %6131 = vmatprep.subr.mxu1 %v9237_v4 }
 0x70d   : > { %4786 = vmatpush1.msra.mxu0 %v6961_v19  ;;  %6132 = vmatpush3.msra.mxu1 %v6962_v25 }
 0x70e   : > { %4787 = vmatprep.subr.mxu0 %v6963_v20  ;;  %6133 = vmatprep.subr.mxu1 %v9237_v4 }
 0x70f   : > { %4788 = vmatpush1.msra.mxu0 %v6964_v23  ;;  %6134 = vmatpush3.msra.mxu1 %v6965_v2 }
 0x710   : > { %4789 = vmatprep.subr.mxu0 %v6966_v58  ;;  %6135 = vmatprep.subr.mxu1 %v9237_v4 }
 0x711   : > { %4790 = vmatpush1.msra.mxu0 %v6967_v61  ;;  %6136 = vmatpush3.msra.mxu1 %v6968_v17  ;;  %v4432_v17 = vrot.slane %v8877_v40, 1 }
 0x712   : > { %4791 = vmatprep.subr.mxu0 %v6969_v22  ;;  %6137 = vmatprep.subr.mxu1 %v9237_v4 }
 0x713   : > { %4792 = vmatpush1.msra.mxu0 %v6970_v11  ;;  %6138 = vmatpush3.msra.mxu1 %v6971_v31  ;;  %v4433_v31 = vrot.slane %v8882_v5, 1 }
 0x714   : > { %4793 = vmatprep.subr.mxu0 %v6972_v37  ;;  %6139 = vmatprep.subr.mxu1 %v9237_v4 }
 0x715   : > { %4794 = vmatpush1.msra.mxu0 %v6973_v46  ;;  %6140 = vmatpush3.msra.mxu1 %v6974_v16  ;;  %v4436_v46 = vrot.slane %v8891_v60, 1 }
 0x716   : > { %4795 = vmatprep.subr.mxu0 %v6975_v42  ;;  %6141 = vmatprep.subr.mxu1 %v9237_v4 }
 0x717   : > { %4796 = vmatpush1.msra.mxu0 %v6976_v26  ;;  %6142 = vmatpush3.msra.mxu1 %v6977_v36  ;;  %v4435_v26 = vrot.slane %v8888_v62, 1 }
 0x718   : > { %4797 = vmatprep.subr.mxu0 %v6978_v8  ;;  %6143 = vmatprep.subr.mxu1 %v9237_v4 }
 0x719   : > { %4798 = vmatpush1.msra.mxu0 %v6979_v15  ;;  %4831 = vmatprep.mubr.f32.mxu0 %v9237_v4 }
 0x71a   : > { %6144 = vmatpush3.msra.mxu1 %v6980_v28  ;;  %6145 = vmatprep.mubr.msk.f32.mxu1 %vm7028_vm0, %v9237_v4  ;;  %v8885_v4 = vld [vmem:[%s7154_s6 + $0x36] ss:$8 sm:$0x7] }
 0x71b   : > { %v4434_v37 = vrot.slane %v8885_v4, 1 }
 0x7ba   : > { %v4235_v52 = vpop.f32.mrf.mxu0  ;;  %v8873_v41 = vpop.f32.mrf.mxu1 }
 0x7bb   : > { %v4311_v0 = vcombine.high %v4235_v52, %v4235_v52  ;;  %v4318_v49 = vrot.slane %v4235_v52, %v7542_v1 }
 0x7bc   : > { %v6112_v38 = vpop.f32.mrf.mxu1  ;;  %v4237_v18 = vpop.f32.mrf.mxu0 }
 0x7bd   : > { %v4325_v55 = vrot.slane %v4311_v0, %v7542_v1  ;;  %v4326_v47 = vcombine.high %v4318_v49, %v4318_v49  ;;  %v4334_v12 = vrot.slane %v4318_v49, %v7542_v1  ;;  %v4449_v34 = vcombine.high %v4237_v18, %v4237_v18 }
 0x7be   : > { %v4456_v2 = vrot.slane %v4237_v18, %v7542_v1  ;;  %v4437_v18 = vrot.slane %v8896_v50, 1 }
 0x7bf   : > { %v4327_v29 = vcombine.high %v4325_v55, %v4325_v55  ;;  %v4341_v13 = vrot.slane %v4325_v55, %v7542_v1  ;;  %v4348_v10 = vrot.slane %v4326_v47, %v7542_v1  ;;  %v4356_v57 = vcombine.high %v4334_v12, %v4334_v12 }
 0x7c0   : > { %v4368_v32 = vadd.f32 %v8877_v40, %v4334_v12  ;;  %v4463_v22 = vrot.slane %v4449_v34, %v7542_v1  ;;  %v4464_v16 = vcombine.high %v4456_v2, %v4456_v2  ;;  %v4472_v42 = vrot.slane %v4456_v2, %v7542_v1 }
 0x7c1   : > { %v4355_v63 = vrot.slane %v4327_v29, %v7542_v1  ;;  %v4357_v45 = vcombine.high %v4341_v13, %v4341_v13  ;;  %v4358_v59 = vcombine.high %v4348_v10, %v4348_v10  ;;  %v4369_v24 = vadd.f32 %v8882_v5, %v4348_v10 }
 0x7c2   : > { %v4370_v30 = vadd.f32 %v8885_v4, %v4356_v57  ;;  %v4372_v51 = vadd.f32 %v8891_v60, %v4341_v13  ;;  %v5685_v39 = vmul.f32 -1.442695, %v4368_v32  ;;  %v4479_v36 = vrot.slane %v4463_v22, %v7542_v1 }
 0x7c3   : > { %v4359_v6 = vcombine.high %v4355_v63, %v4355_v63  ;;  %v4371_v44 = vadd.f32 %v8888_v62, %v4358_v59  ;;  %v4373_v21 = vadd.f32 %v8896_v50, %v4355_v63  ;;  %v4374_v43 = vadd.f32 %v8899_v56, %v4357_v45 }
 0x7c4   : > { %6675 = vpow2.f32 %v5685_v39  ;;  %v5686_v48 = vmul.f32 -1.442695, %v4369_v24  ;;  %v5687_v19 = vmul.f32 -1.442695, %v4370_v30  ;;  %v5689_v23 = vmul.f32 -1.442695, %v4372_v51 }
 0x7c5   : > { %v4375_v25 = vadd.f32 %v8905_v9, %v4359_v6  ;;  %v5688_v20 = vmul.f32 -1.442695, %v4371_v44  ;;  %v5690_v58 = vmul.f32 -1.442695, %v4373_v21  ;;  %v5691_v61 = vmul.f32 -1.442695, %v4374_v43 }
 0x7c6   : > { %6677 = vpow2.f32 %v5686_v48  ;;  %v4465_v8 = vcombine.high %v4463_v22, %v4463_v22  ;;  %v4486_v15 = vrot.slane %v4464_v16, %v7542_v1  ;;  %v4494_v28 = vcombine.high %v4472_v42, %v4472_v42  ;;  %v8926_v51 = vld [vmem:[#allocation4] ss:$0 sm:$0xff] }
 0x7c7   : > { %6679 = vpow2.f32 %v5687_v19  ;;  %v5692_v11 = vmul.f32 -1.442695, %v4375_v25  ;;  %v4506_v52 = vadd.f32 %v4472_v42, %v4432_v17  ;;  %v4510_v55 = vadd.f32 %v4479_v36, %v4436_v46 }
 0x7c8   : > { %6681 = vpow2.f32 %v5688_v20  ;;  %v4496_v0 = vcombine.high %v4486_v15, %v4486_v15  ;;  %v4507_v49 = vadd.f32 %v4486_v15, %v4433_v31  ;;  %v4508_v38 = vadd.f32 %v4494_v28, %v4434_v37 }
 0x7c9   : > { %6683 = vpow2.f32 %v5689_v23  ;;  %v5693_v47 = vmul.f32 -1.442695, %v4506_v52  ;;  %v4493_v12 = vrot.slane %v4465_v8, %v7542_v1  ;;  %v5697_v63 = vmul.f32 -1.442695, %v4510_v55 }
 0x7ca   : > { %6685 = vpow2.f32 %v5690_v58  ;;  %v4509_v29 = vadd.f32 %v4496_v0, %v4435_v26  ;;  %v5694_v13 = vmul.f32 -1.442695, %v4507_v49  ;;  %v5695_v10 = vmul.f32 -1.442695, %v4508_v38 }
 0x7cb   : > { %6687 = vpow2.f32 %v5691_v61  ;;  %v4438_v59 = vrot.slane %v8899_v56, 1  ;;  %v4495_v24 = vcombine.high %v4479_v36, %v4479_v36  ;;  %v4562_v39 = vadd.f32 %v8926_v51, %v8873_v41 }
 0x7cc   : > { %6689 = vpow2.f32 %v5692_v11  ;;  %v5696_v32 = vmul.f32 -1.442695, %v4509_v29  ;;  %v4439_v34 = vrot.slane %v8905_v9, 1  ;;  %v4497_v6 = vcombine.high %v4493_v12, %v4493_v12 }
 0x7cd   : > { %6691 = vpow2.f32 %v5693_v47  ;;  %v4511_v19 = vadd.f32 %v4493_v12, %v4437_v18  ;;  %v4512_v23 = vadd.f32 %v4495_v24, %v4438_v59  ;;  %v4564_v61 = vcombine.high %v4562_v39, %v4562_v39 }
 0x7ce   : > { %6693 = vpow2.f32 %v5694_v13  ;;  %v4513_v41 = vadd.f32 %v4497_v6, %v4439_v34  ;;  %v4571_v11 = vrot.slane %v4562_v39, %v7542_v1  ;;  %v4629_v12 = vrot.slane %v8877_v40, 2 }
 0x7cf   : > { %6695 = vpow2.f32 %v5695_v10  ;;  %v5698_v46 = vmul.f32 -1.442695, %v4511_v19  ;;  %v5699_v42 = vmul.f32 -1.442695, %v4512_v23  ;;  %v4578_v26 = vrot.slane %v4564_v61, %v7542_v1 }
 0x7d0   : > { %6697 = vpow2.f32 %v5696_v32  ;;  %v5700_v36 = vmul.f32 -1.442695, %v4513_v41  ;;  %v4579_v8 = vcombine.high %v4571_v11, %v4571_v11  ;;  %v4587_v38 = vrot.slane %v4571_v11, %v7542_v1 }
 0x7d1   : > { %v6676_v57 = vpop.eup %6675  ;;  %v4580_v49 = vcombine.high %v4578_v26, %v4578_v26  ;;  %v4631_v18 = vrot.slane %v8885_v4, 2  ;;  %v4632_v32 = vrot.slane %v8888_v62, 2  ;;  %v4633_v59 = vrot.slane %v8891_v60, 2 }
 0x7d2   : > { %v4400_v45 = vadd.f32 1.0, %v6676_v57  ;;  %v4601_v29 = vrot.slane %v4579_v8, %v7542_v1  ;;  %v4630_v57 = vrot.slane %v8882_v5, 2  ;;  %v4594_v24 = vrot.slane %v4578_v26, %v7542_v1 }
 0x7d3   : > { %v6678_v30 = vpop.eup %6677  ;;  %v4608_v40 = vrot.slane %v4580_v49, %v7542_v1  ;;  %v4609_v34 = vcombine.high %v4587_v38, %v4587_v38  ;;  %v4635_v60 = vrot.slane %v8899_v56, 2 }
 0x7d4   : > { %v6680_v44 = vpop.eup %6679  ;;  %v4401_v21 = vadd.f32 1.0, %v6678_v30  ;;  %6699 = vrcp.f32 %v4400_v45  ;;  %v4611_v5 = vcombine.high %v4601_v29, %v4601_v29 }
 0x7d5   : > { %v6682_v43 = vpop.eup %6681  ;;  %v4402_v48 = vadd.f32 1.0, %v6680_v44  ;;  %6701 = vpow2.f32 %v5697_v63 }
 0x7d6   : > { %v6684_v25 = vpop.eup %6683  ;;  %v4403_v20 = vadd.f32 1.0, %v6682_v43  ;;  %6703 = vrcp.f32 %v4401_v21  ;;  %v4634_v43 = vrot.slane %v8896_v50, 2 }
 0x7d7   : > { %v6686_v2 = vpop.eup %6685  ;;  %v4404_v58 = vadd.f32 1.0, %v6684_v25  ;;  %6705 = vrcp.f32 %v4402_v48  ;;  %v4636_v25 = vrot.slane %v8905_v9, 2 }
 0x7d8   : > { %v6688_v17 = vpop.eup %6687  ;;  %v4405_v22 = vadd.f32 1.0, %v6686_v2  ;;  %6707 = vrcp.f32 %v4403_v20 }
 0x7d9   : > { %v6690_v31 = vpop.eup %6689  ;;  %v4406_v37 = vadd.f32 1.0, %v6688_v17  ;;  %6709 = vrcp.f32 %v4404_v58  ;;  %v4610_v58 = vcombine.high %v4594_v24, %v4594_v24 }
 0x7da   : > { %v4407_v16 = vadd.f32 1.0, %v6690_v31  ;;  %6711 = vrcp.f32 %v4405_v22  ;;  %v6692_v15 = vpop.eup %6691  ;;  %v4612_v22 = vcombine.high %v4608_v40, %v4608_v40 }
 0x7db   : > { %6713 = vrcp.f32 %v4406_v37  ;;  %v6694_v28 = vpop.eup %6693  ;;  %v4538_v52 = vadd.f32 1.0, %v6692_v15 }
 0x7dc   : > { %6715 = vrcp.f32 %v4407_v16  ;;  %v6696_v0 = vpop.eup %6695  ;;  %v4539_v55 = vadd.f32 1.0, %v6694_v28 }
 0x7dd   : > { %6717 = vpow2.f32 %v5698_v46  ;;  %v6698_v47 = vpop.eup %6697  ;;  %v4540_v13 = vadd.f32 1.0, %v6696_v0 }
 0x7de   : > { %6719 = vpow2.f32 %v5699_v42  ;;  %v4541_v63 = vadd.f32 1.0, %v6698_v47 }
 0x7df   : > { %6721 = vpow2.f32 %v5700_v36 }
 0x7e0   : > { %6723 = vrcp.f32 %v4538_v52 }
 0x7e1   : > { %v6700_v10 = vpop.eup %6699  ;;  %6725 = vrcp.f32 %v4539_v55 }
 0x7e2   : > { %v6702_v45 = vpop.eup %6701  ;;  %v4621_v30 = vmul.f32 %v6700_v10, %v4587_v38  ;;  %6727 = vrcp.f32 %v4540_v13 }
 0x7e3   : > { %v6704_v39 = vpop.eup %6703  ;;  %v4542_v6 = vadd.f32 1.0, %v6702_v45  ;;  %6729 = vrcp.f32 %v4541_v63 }
 0x7e4   : > { %v6706_v44 = vpop.eup %6705  ;;  %v4622_v21 = vmul.f32 %v6704_v39, %v4601_v29  ;;  %v4645_v4 = vadd.f32 %v4629_v12, %v4621_v30 }
 0x7e5   : > { %v6708_v62 = vpop.eup %6707  ;;  %v4623_v48 = vmul.f32 %v6706_v44, %v4609_v34 }
 0x7e6   : > { %v6710_v19 = vpop.eup %6709  ;;  %v4624_v20 = vmul.f32 %v6708_v62, %v4611_v5  ;;  %v4646_v23 = vadd.f32 %v4630_v57, %v4622_v21  ;;  %6731 = vtanh.f32 %v4645_v4 }
 0x7e7   : > { %v6712_v2 = vpop.eup %6711  ;;  %v4625_v61 = vmul.f32 %v6710_v19, %v4594_v24  ;;  %v4647_v41 = vadd.f32 %v4631_v18, %v4623_v48  ;;  %6733 = vrcp.f32 %v4542_v6 }
 0x7e8   : > { %v6714_v17 = vpop.eup %6713  ;;  %v4626_v11 = vmul.f32 %v6712_v2, %v4608_v40  ;;  %v4648_v31 = vadd.f32 %v4632_v32, %v4624_v20  ;;  %6735 = vtanh.f32 %v4646_v23 }
 0x7e9   : > { %v6716_v50 = vpop.eup %6715  ;;  %v4627_v56 = vmul.f32 %v6714_v17, %v4610_v58  ;;  %v4649_v37 = vadd.f32 %v4633_v59, %v4625_v61  ;;  %6737 = vtanh.f32 %v4647_v41 }
 0x7ea   : > { %v6718_v46 = vpop.eup %6717  ;;  %v4628_v16 = vmul.f32 %v6716_v50, %v4612_v22  ;;  %v4650_v9 = vadd.f32 %v4634_v43, %v4626_v11  ;;  %6739 = vtanh.f32 %v4648_v31 }
 0x7eb   : > { %v6720_v42 = vpop.eup %6719  ;;  %v4651_v26 = vadd.f32 %v4635_v60, %v4627_v56  ;;  %6741 = vtanh.f32 %v4649_v37  ;;  %v4543_v36 = vadd.f32 1.0, %v6718_v46 }
 0x7ec   : > { %v6722_v8 = vpop.eup %6721  ;;  %v4652_v15 = vadd.f32 %v4636_v25, %v4628_v16  ;;  %6743 = vtanh.f32 %v4650_v9  ;;  %v4544_v28 = vadd.f32 1.0, %v6720_v42 }
 0x7ed   : > { %6745 = vtanh.f32 %v4651_v26  ;;  %v4545_v52 = vadd.f32 1.0, %v6722_v8  ;;  %v6724_v0 = vpop.eup %6723  ;;  %v9003_v8 = vld [vmem:[%s7154_s6 + $0x7] ss:$8 sm:$0x7] }
 0x7ee   : > { %6747 = vtanh.f32 %v4652_v15  ;;  %v6726_v49 = vpop.eup %6725 }
 0x7ef   : > { %6749 = vrcp.f32 %v4543_v36  ;;  %v6728_v38 = vpop.eup %6727 }
 0x7f0   : > { %6751 = vrcp.f32 %v4544_v28  ;;  %v6730_v55 = vpop.eup %6729 }
 0x7f1   : > { %6753 = vrcp.f32 %v4545_v52 }
 0x7f3   : > { %v6732_v47 = vpop.eup %6731 }
 0x7f4   : > { %v6734_v12 = vpop.eup %6733  ;;  %v4661_v29 = vsub.f32 %v8805_v33, %v6732_v47 }
 0x7f5   : > { %v6736_v13 = vpop.eup %6735 }
 0x7f6   : > { %v6738_v10 = vpop.eup %6737  ;;  %v4662_v57 = vsub.f32 %v8809_v27, %v6736_v13  ;;  %v4669_v18 = vmul.f32 %v6724_v0, %v4661_v29  ;;  %v9008_v0 = vld [vmem:[%s7154_s6 + $0x1f] ss:$8 sm:$0x7] }
 0x7f7   : > { %v6740_v32 = vpop.eup %6739  ;;  %v4663_v63 = vsub.f32 %v8814_v53, %v6738_v10 }
 0x7f8   : > { %v6742_v45 = vpop.eup %6741  ;;  %v4664_v59 = vsub.f32 %v8817_v14, %v6740_v32  ;;  %v4670_v24 = vmul.f32 %v6726_v49, %v4662_v57  ;;  %v8949_v30 = vadd.f32 %v6732_v47, %v4669_v18  ;;  %v9011_v49 = vld [vmem:[%s7154_s6 + $0x37] ss:$8 sm:$0x7] }
 0x7f9   : > { %v6744_v39 = vpop.eup %6743  ;;  %v4665_v40 = vsub.f32 %v8821_v35, %v6742_v45  ;;  %v4671_v33 = vmul.f32 %v6728_v38, %v4663_v63  ;;  %v9014_v38 = vld [vmem:[%s7154_s6 + $0x4f] ss:$8 sm:$0x7] }
 0x7fa   : > { %v6746_v34 = vpop.eup %6745  ;;  %v4666_v6 = vsub.f32 %v8829_v54, %v6744_v39  ;;  %v4672_v27 = vmul.f32 %v6730_v55, %v4664_v59  ;;  %v8953_v44 = vadd.f32 %v6736_v13, %v4670_v24  ;;  %4685 = vst [vmem:[%s7156_s7 + $0x6] sm:$0x1] %v8949_v30  ;;  %v9017_v55 = vld [vmem:[%s7154_s6 + $0x67] ss:$8 sm:$0x7] }
 0x7fb   : > { %v6748_v53 = vpop.eup %6747  ;;  %v4667_v14 = vsub.f32 %v8835_v7, %v6746_v34  ;;  %v4673_v5 = vmul.f32 %v6734_v12, %v4665_v40  ;;  %v8958_v21 = vadd.f32 %v6738_v10, %v4671_v33  ;;  %v9022_v57 = vld [vmem:[%s7154_s6 + $0x7f] ss:$8 sm:$0x7] }
 0x7fc   : > { %v6750_v4 = vpop.eup %6749  ;;  %v4668_v35 = vsub.f32 %v8837_v3, %v6748_v53  ;;  %v8961_v62 = vadd.f32 %v6740_v32, %v4672_v27  ;;  %4686 = vst [vmem:[%s7156_s7 + $0xe] sm:$0x1] %v8953_v44  ;;  %v4717_v20 = vcombine.low %v8949_v30, %v8953_v44  ;;  %v9025_v18 = vld [vmem:[%s7154_s6 + $0x97] ss:$8 sm:$0x7] }
 0x7fd   : > { %v6752_v54 = vpop.eup %6751  ;;  %v4674_v43 = vmul.f32 %v6750_v4, %v4666_v6  ;;  %v8965_v60 = vadd.f32 %v6742_v45, %v4673_v5  ;;  %4687 = vst [vmem:[%s7156_s7 + $0x16] sm:$0x1] %v8958_v21 }
 0x7fe   : > { %v6754_v7 = vpop.eup %6753  ;;  %v4675_v48 = vmul.f32 %v6752_v54, %v4667_v14  ;;  %4688 = vst [vmem:[%s7156_s7 + $0x1e] sm:$0x1] %v8961_v62  ;;  %v4718_v3 = vcombine.low %v8958_v21, %v8961_v62  ;;  %v4727_v17 = vrot.slane %v4717_v20, %v7542_v1  ;;  %v5030_v20 = vrot.slane %v9003_v8, 1 }
 0x7ff   : > { %v4676_v19 = vmul.f32 %v6754_v7, %v4668_v35  ;;  %v8973_v25 = vadd.f32 %v6744_v39, %v4674_v43  ;;  %4689 = vst [vmem:[%s7156_s7 + $0x26] sm:$0x1] %v8965_v60  ;;  %v9031_v39 = vld [vmem:[%s7154_s6 + $0xaf] ss:$8 sm:$0x7]  ;;  %s5726_s6 = sshll.u32 (%p7085_p6), %s7016_s14, 3 }
 0x800   : > { %v8979_v23 = vadd.f32 %v6746_v34, %v4675_v48  ;;  %v4734_v61 = vrot.slane %v4718_v3, %v7542_v1  ;;  %s5361_s25 = scalar_lea.vmem (%p7085_p6), %s9123_s3, %s5726_s6 }
 0x801   : > { %v8981_v2 = vadd.f32 %v6748_v53, %v4676_v19  ;;  %4690 = vst [vmem:[%s7156_s7 + $0x2e] sm:$0x1] %v8973_v25  ;;  %v4719_v58 = vcombine.low %v8965_v60, %v8973_v25 }
 0x802   : > { %4691 = vst [vmem:[%s7156_s7 + $0x36] sm:$0x1] %v8979_v23  ;;  %v4749_v31 = vcombine.low %v4727_v17, %v4734_v61  ;;  %v5032_v17 = vrot.slane %v9011_v49, 1 }
 0x803   : > { %4692 = vst [vmem:[%s7156_s7 + $0x3e] sm:$0x1] %v8981_v2  ;;  %v4720_v41 = vcombine.low %v8979_v23, %v8981_v2  ;;  %v4741_v22 = vrot.slane %v4719_v58, %v7542_v1 }
 0x804   : > { %v4757_v56 = vrot.slane %v4749_v31, %v7542_v1 }
 0x805   : > { %v4748_v11 = vrot.slane %v4720_v41, %v7542_v1  ;;  %v5031_v41 = vrot.slane %v9008_v0, 1 }
 0x807   : > { %v4750_v50 = vcombine.low %v4741_v22, %v4748_v11  ;;  %v5034_v22 = vrot.slane %v9017_v55, 1 }
 0x809   : > { %v4764_v37 = vrot.slane %v4750_v50, %v7542_v1  ;;  %v5033_v50 = vrot.slane %v9014_v38, 1 }
 0x80b   : > { %v4765_v46 = vcombine.low %v4757_v56, %v4764_v37 }
 0x80d   : > { %4832 = vmatmul.mubr.f32.vlgmr.msra.gmra.mxu0 %v4765_v46  ;;  %6146 = vmatmul.mubr.f32.vlgmr.msra.gmra.mxu1 %v4765_v46 }
 0x8cd   : > { %v4833_v16 = vpop.f32.mrf.mxu0  ;;  %v8999_v9 = vpop.f32.mrf.mxu1 }
 0x8ce   : > { %v4909_v42 = vcombine.high %v4833_v16, %v4833_v16  ;;  %v4916_v26 = vrot.slane %v4833_v16, %v7542_v1 }
 0x8cf   : > { %v6147_v36 = vpop.f32.mrf.mxu1  ;;  %v4835_v10 = vpop.f32.mrf.mxu0 }
 0x8d0   : > { %v4923_v15 = vrot.slane %v4909_v42, %v7542_v1  ;;  %v4924_v28 = vcombine.high %v4916_v26, %v4916_v26  ;;  %v4932_v52 = vrot.slane %v4916_v26, %v7542_v1  ;;  %v5047_v6 = vcombine.high %v4835_v10, %v4835_v10 }
 0x8d1   : > { %v5054_v48 = vrot.slane %v4835_v10, %v7542_v1 }
 0x8d2   : > { %v4925_v47 = vcombine.high %v4923_v15, %v4923_v15  ;;  %v4939_v12 = vrot.slane %v4923_v15, %v7542_v1  ;;  %v4946_v29 = vrot.slane %v4924_v28, %v7542_v1  ;;  %v4954_v13 = vcombine.high %v4932_v52, %v4932_v52 }
 0x8d3   : > { %v4966_v32 = vadd.f32 %v9003_v8, %v4932_v52  ;;  %v5061_v58 = vrot.slane %v5047_v6, %v7542_v1  ;;  %v5062_v11 = vcombine.high %v5054_v48, %v5054_v48  ;;  %v5070_v31 = vrot.slane %v5054_v48, %v7542_v1 }
 0x8d4   : > { %v4953_v63 = vrot.slane %v4925_v47, %v7542_v1  ;;  %v4955_v45 = vcombine.high %v4939_v12, %v4939_v12  ;;  %v4956_v59 = vcombine.high %v4946_v29, %v4946_v29  ;;  %v4967_v24 = vadd.f32 %v9008_v0, %v4946_v29 }
 0x8d5   : > { %v4968_v40 = vadd.f32 %v9011_v49, %v4954_v13  ;;  %v4970_v33 = vadd.f32 %v9017_v55, %v4939_v12  ;;  %v5709_v34 = vmul.f32 -1.442695, %v4966_v32  ;;  %v5077_v56 = vrot.slane %v5061_v58, %v7542_v1 }
 0x8d6   : > { %v4957_v27 = vcombine.high %v4953_v63, %v4953_v63  ;;  %v4969_v53 = vadd.f32 %v9014_v38, %v4956_v59  ;;  %v4971_v14 = vadd.f32 %v9022_v57, %v4953_v63  ;;  %v4972_v5 = vadd.f32 %v9025_v18, %v4955_v45 }
 0x8d7   : > { %6755 = vpow2.f32 %v5709_v34  ;;  %v5710_v4 = vmul.f32 -1.442695, %v4967_v24  ;;  %v5711_v35 = vmul.f32 -1.442695, %v4968_v40  ;;  %v5713_v7 = vmul.f32 -1.442695, %v4970_v33 }
 0x8d8   : > { %v4973_v54 = vadd.f32 %v9031_v39, %v4957_v27  ;;  %v5712_v43 = vmul.f32 -1.442695, %v4969_v53  ;;  %v5714_v3 = vmul.f32 -1.442695, %v4971_v14  ;;  %v5715_v19 = vmul.f32 -1.442695, %v4972_v5 }
 0x8d9   : > { %6757 = vpow2.f32 %v5710_v4  ;;  %v5063_v37 = vcombine.high %v5061_v58, %v5061_v58  ;;  %v5084_v46 = vrot.slane %v5062_v11, %v7542_v1  ;;  %v5092_v16 = vcombine.high %v5070_v31, %v5070_v31 }
 0x8da   : > { %6759 = vpow2.f32 %v5711_v35  ;;  %v5716_v61 = vmul.f32 -1.442695, %v4973_v54  ;;  %v5104_v42 = vadd.f32 %v5070_v31, %v5030_v20  ;;  %v5108_v28 = vadd.f32 %v5077_v56, %v5034_v22 }
 0x8db   : > { %6761 = vpow2.f32 %v5712_v43  ;;  %v5094_v26 = vcombine.high %v5084_v46, %v5084_v46  ;;  %v5105_v36 = vadd.f32 %v5084_v46, %v5031_v41  ;;  %v5106_v15 = vadd.f32 %v5092_v16, %v5032_v17 }
 0x8dc   : > { %6763 = vpow2.f32 %v5713_v7  ;;  %v5717_v52 = vmul.f32 -1.442695, %v5104_v42  ;;  %v5091_v47 = vrot.slane %v5063_v37, %v7542_v1  ;;  %v5035_v32 = vrot.slane %v9022_v57, 1 }
 0x8dd   : > { %6765 = vpow2.f32 %v5714_v3  ;;  %v5107_v12 = vadd.f32 %v5094_v26, %v5033_v50  ;;  %v5718_v29 = vmul.f32 -1.442695, %v5105_v36  ;;  %v5719_v13 = vmul.f32 -1.442695, %v5106_v15 }
 0x8de   : > { %6767 = vpow2.f32 %v5715_v19  ;;  %v5721_v45 = vmul.f32 -1.442695, %v5108_v28  ;;  %v5036_v24 = vrot.slane %v9025_v18, 1  ;;  %v5093_v40 = vcombine.high %v5077_v56, %v5077_v56 }
 0x8df   : > { %6769 = vpow2.f32 %v5716_v61  ;;  %v5720_v63 = vmul.f32 -1.442695, %v5107_v12  ;;  %v5160_v34 = vadd.f32 %v8926_v51, %v8999_v9  ;;  %v5037_v6 = vrot.slane %v9031_v39, 1 }
 0x8e0   : > { %6771 = vpow2.f32 %v5717_v52  ;;  %v5095_v27 = vcombine.high %v5091_v47, %v5091_v47  ;;  %v5109_v35 = vadd.f32 %v5091_v47, %v5035_v32  ;;  %v5110_v7 = vadd.f32 %v5093_v40, %v5036_v24 }
 0x8e1   : > { %6773 = vpow2.f32 %v5718_v29  ;;  %v5162_v19 = vcombine.high %v5160_v34, %v5160_v34  ;;  %v5169_v58 = vrot.slane %v5160_v34, %v7542_v1  ;;  %v5227_v52 = vrot.slane %v9003_v8, 2 }
 0x8e2   : > { %6775 = vpow2.f32 %v5719_v13  ;;  %v5111_v51 = vadd.f32 %v5095_v27, %v5037_v6  ;;  %v5722_v17 = vmul.f32 -1.442695, %v5109_v35  ;;  %v5723_v11 = vmul.f32 -1.442695, %v5110_v7 }
 0x8e3   : > { %6777 = vpow2.f32 %v5720_v63  ;;  %v5176_v31 = vrot.slane %v5162_v19, %v7542_v1  ;;  %v5177_v56 = vcombine.high %v5169_v58, %v5169_v58  ;;  %v5185_v36 = vrot.slane %v5169_v58, %v7542_v1 }
 0x8e4   : > { %v6756_v10 = vpop.eup %6755  ;;  %v5724_v50 = vmul.f32 -1.442695, %v5111_v51  ;;  %v5228_v13 = vrot.slane %v9008_v0, 2  ;;  %v5230_v32 = vrot.slane %v9014_v38, 2  ;;  %v5234_v35 = vrot.slane %v9031_v39, 2 }
 0x8e5   : > { %v4998_v59 = vadd.f32 1.0, %v6756_v10  ;;  %v5178_v26 = vcombine.high %v5176_v31, %v5176_v31  ;;  %v5199_v47 = vrot.slane %v5177_v56, %v7542_v1  ;;  %v5229_v10 = vrot.slane %v9011_v49, 2 }
 0x8e6   : > { %v6758_v33 = vpop.eup %6757  ;;  %v5192_v24 = vrot.slane %v5176_v31, %v7542_v1  ;;  %v5207_v34 = vcombine.high %v5185_v36, %v5185_v36 }
 0x8e7   : > { %v6760_v53 = vpop.eup %6759  ;;  %v4999_v14 = vadd.f32 1.0, %v6758_v33  ;;  %6779 = vrcp.f32 %v4998_v59  ;;  %v5231_v59 = vrot.slane %v9017_v55, 2  ;;  %v5206_v8 = vrot.slane %v5178_v26, %v7542_v1 }
 0x8e8   : > { %v6762_v5 = vpop.eup %6761  ;;  %v5000_v4 = vadd.f32 1.0, %v6760_v53  ;;  %6781 = vpow2.f32 %v5721_v45  ;;  %v5209_v0 = vcombine.high %v5199_v47, %v5199_v47  ;;  %v5233_v55 = vrot.slane %v9025_v18, 2 }
 0x8e9   : > { %v6764_v54 = vpop.eup %6763  ;;  %v5001_v43 = vadd.f32 1.0, %v6762_v5  ;;  %6783 = vrcp.f32 %v4999_v14  ;;  %v5232_v14 = vrot.slane %v9022_v57, 2 }
 0x8ea   : > { %v6766_v48 = vpop.eup %6765  ;;  %v5002_v3 = vadd.f32 1.0, %v6764_v54  ;;  %6785 = vrcp.f32 %v5000_v4 }
 0x8eb   : > { %v6768_v9 = vpop.eup %6767  ;;  %v5003_v20 = vadd.f32 1.0, %v6766_v48  ;;  %6787 = vrcp.f32 %v5001_v43  ;;  %v5208_v48 = vcombine.high %v5192_v24, %v5192_v24 }
 0x8ec   : > { %v6770_v61 = vpop.eup %6769  ;;  %v5004_v41 = vadd.f32 1.0, %v6768_v9  ;;  %6789 = vrcp.f32 %v5002_v3  ;;  %v5210_v9 = vcombine.high %v5206_v8, %v5206_v8 }
 0x8ed   : > { %v5005_v22 = vadd.f32 1.0, %v6770_v61  ;;  %6791 = vrcp.f32 %v5003_v20  ;;  %v6772_v37 = vpop.eup %6771 }
 0x8ee   : > { %6793 = vrcp.f32 %v5004_v41  ;;  %v6774_v46 = vpop.eup %6773  ;;  %v5136_v16 = vadd.f32 1.0, %v6772_v37 }
 0x8ef   : > { %6795 = vrcp.f32 %v5005_v22  ;;  %v6776_v42 = vpop.eup %6775  ;;  %v5137_v15 = vadd.f32 1.0, %v6774_v46 }
 0x8f0   : > { %6797 = vpow2.f32 %v5722_v17  ;;  %v6778_v28 = vpop.eup %6777  ;;  %v5138_v12 = vadd.f32 1.0, %v6776_v42 }
 0x8f1   : > { %6799 = vpow2.f32 %v5723_v11  ;;  %v5139_v63 = vadd.f32 1.0, %v6778_v28 }
 0x8f2   : > { %6801 = vpow2.f32 %v5724_v50 }
 0x8f3   : > { %6803 = vrcp.f32 %v5136_v16 }
 0x8f4   : > { %v6780_v29 = vpop.eup %6779  ;;  %6805 = vrcp.f32 %v5137_v15 }
 0x8f5   : > { %v6782_v45 = vpop.eup %6781  ;;  %v5219_v40 = vmul.f32 %v6780_v29, %v5185_v36  ;;  %6807 = vrcp.f32 %v5138_v12 }
 0x8f6   : > { %v6784_v33 = vpop.eup %6783  ;;  %v5140_v6 = vadd.f32 1.0, %v6782_v45  ;;  %6809 = vrcp.f32 %v5139_v63 }
 0x8f7   : > { %v6786_v27 = vpop.eup %6785  ;;  %v5220_v53 = vmul.f32 %v6784_v33, %v5199_v47  ;;  %v5243_v49 = vadd.f32 %v5227_v52, %v5219_v40 }
 0x8f8   : > { %v6788_v38 = vpop.eup %6787  ;;  %v5221_v5 = vmul.f32 %v6786_v27, %v5207_v34 }
 0x8f9   : > { %v6790_v4 = vpop.eup %6789  ;;  %v5222_v54 = vmul.f32 %v6788_v38, %v5209_v0  ;;  %v5244_v43 = vadd.f32 %v5228_v13, %v5220_v53  ;;  %6811 = vtanh.f32 %v5243_v49 }
 0x8fa   : > { %v6792_v7 = vpop.eup %6791  ;;  %v5223_v3 = vmul.f32 %v6790_v4, %v5192_v24  ;;  %v5245_v19 = vadd.f32 %v5229_v10, %v5221_v5  ;;  %6813 = vrcp.f32 %v5140_v6 }
 0x8fb   : > { %v6794_v51 = vpop.eup %6793  ;;  %v5224_v20 = vmul.f32 %v6792_v7, %v5206_v8  ;;  %v5246_v58 = vadd.f32 %v5230_v32, %v5222_v54  ;;  %6815 = vtanh.f32 %v5244_v43 }
 0x8fc   : > { %v6796_v57 = vpop.eup %6795  ;;  %v5225_v18 = vmul.f32 %v6794_v51, %v5208_v48  ;;  %v5247_v61 = vadd.f32 %v5231_v59, %v5223_v3  ;;  %6817 = vtanh.f32 %v5245_v19 }
 0x8fd   : > { %v6798_v41 = vpop.eup %6797  ;;  %v5226_v17 = vmul.f32 %v6796_v57, %v5210_v9  ;;  %v5248_v39 = vadd.f32 %v5232_v14, %v5224_v20  ;;  %6819 = vtanh.f32 %v5246_v58 }
 0x8fe   : > { %v6800_v22 = vpop.eup %6799  ;;  %v5249_v11 = vadd.f32 %v5233_v55, %v5225_v18  ;;  %6821 = vtanh.f32 %v5247_v61  ;;  %v5141_v31 = vadd.f32 1.0, %v6798_v41 }
 0x8ff   : > { %v6802_v50 = vpop.eup %6801  ;;  %v5250_v56 = vadd.f32 %v5234_v35, %v5226_v17  ;;  %6823 = vtanh.f32 %v5248_v39  ;;  %v5142_v37 = vadd.f32 1.0, %v6800_v22 }
 0x900   : > { %6825 = vtanh.f32 %v5249_v11  ;;  %v5143_v46 = vadd.f32 1.0, %v6802_v50  ;;  %v6804_v16 = vpop.eup %6803 }
 0x901   : > { %6827 = vtanh.f32 %v5250_v56  ;;  %v6806_v42 = vpop.eup %6805 }
 0x902   : > { %6829 = vrcp.f32 %v5141_v31  ;;  %v6808_v26 = vpop.eup %6807 }
 0x903   : > { %6831 = vrcp.f32 %v5142_v37  ;;  %v6810_v36 = vpop.eup %6809 }
 0x904   : > { %6833 = vrcp.f32 %v5143_v46 }
 0x906   : > { %v6812_v15 = vpop.eup %6811 }
 0x907   : > { %v6814_v28 = vpop.eup %6813  ;;  %v5259_v52 = vsub.f32 %v8949_v30, %v6812_v15 }
 0x908   : > { %v6816_v47 = vpop.eup %6815 }
 0x909   : > { %v6818_v12 = vpop.eup %6817  ;;  %v5260_v29 = vsub.f32 %v8953_v44, %v6816_v47  ;;  %v5267_v13 = vmul.f32 %v6804_v16, %v5259_v52 }
 0x90a   : > { %v6820_v10 = vpop.eup %6819  ;;  %v5261_v32 = vsub.f32 %v8958_v21, %v6818_v12 }
 0x90b   : > { %v6822_v63 = vpop.eup %6821  ;;  %v5262_v45 = vsub.f32 %v8961_v62, %v6820_v10  ;;  %v5268_v59 = vmul.f32 %v6806_v42, %v5260_v29  ;;  %v5275_v24 = vadd.f32 %v6812_v15, %v5267_v13 }
 0x90c   : > { %v6824_v40 = vpop.eup %6823  ;;  %v5263_v33 = vsub.f32 %v8965_v60, %v6822_v63  ;;  %v5269_v8 = vmul.f32 %v6808_v26, %v5261_v32 }
 0x90d   : > { %v6826_v30 = vpop.eup %6825  ;;  %v5264_v34 = vsub.f32 %v8973_v25, %v6824_v40  ;;  %v5270_v6 = vmul.f32 %v6810_v36, %v5262_v45  ;;  %v5276_v44 = vadd.f32 %v6816_v47, %v5268_v59  ;;  %5283 = vst [vmem:[%s7156_s7 + $0x7] sm:$0x1] %v5275_v24 }
 0x90e   : > { %v6828_v27 = vpop.eup %6827  ;;  %v5265_v21 = vsub.f32 %v8979_v23, %v6826_v30  ;;  %v5271_v0 = vmul.f32 %v6814_v28, %v5263_v33  ;;  %v5277_v62 = vadd.f32 %v6818_v12, %v5269_v8 }
 0x90f   : > { %v6830_v53 = vpop.eup %6829  ;;  %v5266_v49 = vsub.f32 %v8981_v2, %v6828_v27  ;;  %v5278_v38 = vadd.f32 %v6820_v10, %v5270_v6  ;;  %5284 = vst [vmem:[%s7156_s7 + $0xf] sm:$0x1] %v5276_v44  ;;  %v5299_v54 = vcombine.low %v5275_v24, %v5276_v44 }
 0x910   : > { %v6832_v60 = vpop.eup %6831  ;;  %v5272_v14 = vmul.f32 %v6830_v53, %v5264_v34  ;;  %v5279_v25 = vadd.f32 %v6822_v63, %v5271_v0  ;;  %5285 = vst [vmem:[%s7156_s7 + $0x17] sm:$0x1] %v5277_v62 }
 0x911   : > { %v6834_v55 = vpop.eup %6833  ;;  %v5273_v5 = vmul.f32 %v6832_v60, %v5265_v21  ;;  %5286 = vst [vmem:[%s7156_s7 + $0x1f] sm:$0x1] %v5278_v38  ;;  %v5300_v4 = vcombine.low %v5277_v62, %v5278_v38  ;;  %v5309_v19 = vrot.slane %v5299_v54, %v7542_v1 }
 0x912   : > { %v5274_v23 = vmul.f32 %v6834_v55, %v5266_v49  ;;  %v5280_v35 = vadd.f32 %v6824_v40, %v5272_v14  ;;  %5287 = vst [vmem:[%s7156_s7 + $0x27] sm:$0x1] %v5279_v25 }
 0x913   : > { %v5281_v43 = vadd.f32 %v6826_v30, %v5273_v5  ;;  %v5316_v48 = vrot.slane %v5300_v4, %v7542_v1 }
 0x914   : > { %v5282_v7 = vadd.f32 %v6828_v27, %v5274_v23  ;;  %5288 = vst [vmem:[%s7156_s7 + $0x2f] sm:$0x1] %v5280_v35  ;;  %v5301_v2 = vcombine.low %v5279_v25, %v5280_v35  ;;  %v5404_v41 = vld [vmem:[%s7156_s7] sm:$0xff] (%p7085_p6) }
 0x915   : > { %5289 = vst [vmem:[%s7156_s7 + $0x37] sm:$0x1] %v5281_v43  ;;  %v5331_v20 = vcombine.low %v5309_v19, %v5316_v48  ;;  %5405 = vst [vmem:[%s5361_s25] sm:$0xff] (%p7085_p6), %v5404_v41 }
 0x916   : > { %5290 = vst [vmem:[%s7156_s7 + $0x3f] sm:$0x1] %v5282_v7  ;;  %v5302_v3 = vcombine.low %v5281_v43, %v5282_v7  ;;  %v5323_v51 = vrot.slane %v5301_v2, %v7542_v1  ;;  %v5406_v17 = vld [vmem:[%s7156_s7 + $0x8] sm:$0xff] (%p7085_p6) }
 0x917   : > { %v5339_v57 = vrot.slane %v5331_v20, %v7542_v1  ;;  %v5408_v39 = vld [vmem:[%s7156_s7 + $0x10] sm:$0xff] (%p7085_p6)  ;;  %5407 = vst [vmem:[%s5361_s25 + $0x10] sm:$0xff] (%p7085_p6), %v5406_v17 }
 0x918   : > { %v5330_v9 = vrot.slane %v5302_v3, %v7542_v1  ;;  %5409 = vst [vmem:[%s5361_s25 + $0x20] sm:$0xff] (%p7085_p6), %v5408_v39 }
 0x919   : > { %v5412_v22 = vld [vmem:[%s7156_s7 + $0x20] sm:$0xff] (%p7085_p6) }
 0x91a   : > { %v5332_v58 = vcombine.low %v5323_v51, %v5330_v9  ;;  %5413 = vst [vmem:[%s5361_s25 + $0x40] sm:$0xff] (%p7085_p6), %v5412_v22 }
 0x91b   : > { %v5414_v11 = vld [vmem:[%s7156_s7 + $0x28] sm:$0xff] (%p7085_p6) }
 0x91c   : > { %v5346_v18 = vrot.slane %v5332_v58, %v7542_v1  ;;  %5356 = sbr.rel (!%p7085_p6) target bundleno = 2337 (0x921), region = 123  ;;  %v5410_v1 = vld [vmem:[%s7156_s7 + $0x18] sm:$0xff] (%p7085_p6)  ;;  %5415 = vst [vmem:[%s5361_s25 + $0x50] sm:$0xff] (%p7085_p6), %v5414_v11  ;;  %v5416_v31 = vld [vmem:[%s7156_s7 + $0x30] sm:$0xff] (%p7085_p6) }
 0x91d   : > { %5411 = vst [vmem:[%s5361_s25 + $0x30] sm:$0xff] (%p7085_p6), %v5410_v1  ;;  %v5418_v50 = vld [vmem:[%s7156_s7 + $0x38] sm:$0xff] (%p7085_p6)  ;;  %5417 = vst [vmem:[%s5361_s25 + $0x60] sm:$0xff] (%p7085_p6), %v5416_v31 }
 0x91e   : > { %v5347_v61 = vcombine.low %v5339_v57, %v5346_v18  ;;  %5419 = vst [vmem:[%s5361_s25 + $0x70] sm:$0xff] (%p7085_p6), %v5418_v50 }
 0x920   : > { %5349 = vst [vmem:[#allocation2] sm:$0xff] %v5347_v61 }
 0x921 PF: > { %s13_s16 = sadd.s32 1, %s7024_s16   ;;  %s9377_s12 = smov %s7012_s13 }
 0x922   : > { %p10_p13 = scmp.ge.s32.totalorder %s13_s16, 4   ;;  %s9378_s13 = smov %s7090_s22 }
 0x923   : > { %s9379_s14 = smov %s7020_s15  ;;  %s9380_s15 = smov %s9382_s17 }
 0x924   :  { %12 = sbr.rel (!%p10_p13) target bundleno = 3 (0x3), region = 275 }
 0x929   :  { %5435 = vsyncmov [#allocation5] }
 0x92c   :  { %s5436_s21 = vpop.sfrf %5435 }
 0x92d   :  { %p5729_p0 = scmp.ne.s32.totalorder %s5436_s21, 0 }
 0x92f   :  { %5440 = shalt.err (%p5729_p0)  }
 0x930   :  { %5442 = vsyncmov [#allocation5 + $0x1] }
 0x933   :  { %s5443_s7 = vpop.sfrf %5442 }
 0x934   :  { %p5730_p1 = scmp.ne.s32.totalorder %s5443_s7, 0 }
 0x936   :  { %5447 = shalt.err (%p5730_p1)  }

</bundles_post_ra>
